<compile_context>
chip_gen: v6e
topology: v6e:2x2x1
jax: 0.10.0
libtpu: 0.0.40
codegen_flags: <defaults>
</compile_context>

<pallas_src>
import functools

import jax
import jax.numpy as jnp
from jax import lax
from jax.experimental import pallas as pl
from jax.experimental.pallas import tpu as pltpu

# ----- scaled-down hyperparameters (module uses n_embed=384, block_size=512) -----
VOCAB_SIZE = 16
N_EMBED = 128         # C  (multiple of 128 -> lane-dense)
BLOCK_SIZE = 16       # max sequence length (positional table rows)
LN_EPS = 1e-5
NEG_INF = -1e30       # finite "masked" score (safe under exp / future tiling)


def _layernorm(x, w, b):
    # PyTorch nn.LayerNorm: biased variance, eps inside rsqrt.
    mu = jnp.mean(x, axis=-1, keepdims=True)
    var = jnp.mean((x - mu) ** 2, axis=-1, keepdims=True)
    return (x - mu) * lax.rsqrt(var + LN_EPS) * w + b


def encoder_block_kernel(
    idx_ref,                      # (Bb*T, 1) int32  token ids (this block's rows)
    tok_tbl_ref,                  # (V, C)  f32   token embedding table (resident)
    pos_ref,                      # (T, C)  f32   positional embeddings (resident)
    mask_ref,                     # (T, T)  f32   additive causal mask 0/-1e30
    ln1w_ref, ln1b_ref,           # (1, C)  f32
    wqkv_ref,                     # (C, 3C) bf16  fused q|k|v (bias=False)
    wproj_ref, bproj_ref,         # (C, C) bf16, (1, C) f32
    ln2w_ref, ln2b_ref,           # (1, C)  f32
    w1_ref, b1_ref,               # (C, 4C) bf16, (1, 4C) f32
    w2_ref, b2_ref,               # (4C, C) bf16, (1, C) f32
    out_ref,                      # (Bb, T, C) f32
):
    Bb, T, C = out_ref.shape
    V = tok_tbl_ref.shape[0]
    bf16 = jnp.bfloat16

    # ---- fused embedding gather: one_hot(idx) @ tok_table (exact: each
    # one-hot row has a single 1.0, so the f32 matmul reproduces the gather) ----
    ids = idx_ref[...]                                           # (Bb*T, 1)
    vocab_iota = lax.broadcasted_iota(jnp.int32, (1, V), 1)      # (1, V)
    onehot = (ids == vocab_iota).astype(jnp.float32)             # (Bb*T, V)
    tok = jnp.dot(onehot, tok_tbl_ref[...],
                  preferred_element_type=jnp.float32)            # (Bb*T, C)
    x3 = tok.reshape(Bb, T, C) + pos_ref[...][None, :, :]
    x = x3.reshape(Bb * T, C)                                    # flat rows: tall MXU M

    # ---- self-attention branch: x + sa(ln1(x)) ----
    xn = _layernorm(x, ln1w_ref[...], ln1b_ref[...])
    qkv = jnp.dot(xn.astype(bf16), wqkv_ref[...],
                  preferred_element_type=jnp.float32)            # (Bb*T, 3C)
    # lane-multiple static slices (C is a multiple of 128) -> free
    qb = qkv[:, 0 * C:1 * C].reshape(Bb, T, C).astype(bf16)
    kb = qkv[:, 1 * C:2 * C].reshape(Bb, T, C).astype(bf16)
    vb = qkv[:, 2 * C:3 * C].reshape(Bb, T, C).astype(bf16)

    # wei = q @ k^T * C**-0.5 (PyTorch scales by n_embed); contract last dims
    # directly (no explicit transpose / XLU work).
    s = lax.dot_general(
        qb, kb,
        dimension_numbers=(((2,), (2,)), ((0,), (0,))),
        preferred_element_type=jnp.float32) * (C ** -0.5)        # (Bb, T, T)
    s = s + mask_ref[...][None, :, :]                            # precomputed causal mask

    # row-wise softmax (EUP reciprocal instead of VPU divide)
    s = s - jnp.max(s, axis=-1, keepdims=True)
    p = jnp.exp(s)
    p = p * pl.reciprocal(jnp.sum(p, axis=-1, keepdims=True), approx=True)

    attn = lax.dot_general(
        p.astype(bf16), vb,
        dimension_numbers=(((2,), (1,)), ((0,), (0,))),
        preferred_element_type=jnp.float32)                      # (Bb, T, C)
    attn = attn.reshape(Bb * T, C)
    sa = jnp.dot(attn.astype(bf16), wproj_ref[...],
                 preferred_element_type=jnp.float32) + bproj_ref[...]
    x = x + sa

    # ---- feed-forward branch: x + ffwd(ln2(x)) ----
    xn2 = _layernorm(x, ln2w_ref[...], ln2b_ref[...])
    h = jnp.dot(xn2.astype(bf16), w1_ref[...],
                preferred_element_type=jnp.float32) + b1_ref[...]
    h = jnp.maximum(h, 0.0)                                      # ReLU
    ff = jnp.dot(h.astype(bf16), w2_ref[...],
                 preferred_element_type=jnp.float32) + b2_ref[...]
    x = x + ff

    out_ref[...] = x.reshape(Bb, T, C)


def _const_spec(shape, single_buffer):
    # Whole-array block, constant index (fetched once, held resident).
    idx_map = lambda b, _n=len(shape): (0,) * _n
    if single_buffer:
        try:
            # Constant index map => second pipeline buffer is never used.
            return pl.BlockSpec(shape, idx_map, pipeline_mode=pl.Buffered(1))
        except Exception:
            pass  # older API: fall back to default (double-buffered)
    return pl.BlockSpec(shape, idx_map)


def _num_tensorcores_per_chip():
    """Best-effort TC count; default 1 (no grid split) if unknown."""
    try:
        kind = jax.devices()[0].device_kind.lower()
    except Exception:
        return 1
    if ("v4" in kind) or ("v5p" in kind) or ("7" in kind):
        return 2   # megacore / dual-TC: one Pallas call can use both cores
    return 1       # v2/v3/v5e/v6e: one TC per Pallas call


@functools.partial(jax.jit, static_argnames=("single_buffer_weights",))
def encoder_forward(idx, params, single_buffer_weights=True):
    """idx: (B, T) int32 token ids. Returns (B, T, C) float32."""
    B, T = idx.shape
    C = N_EMBED

    # Split the batch over the grid only where a second TensorCore can pick
    # up the extra step; otherwise one step with the full batch (taller MXU M,
    # single pipeline prologue/epilogue).
    if _num_tensorcores_per_chip() >= 2 and B >= 2 and B % 2 == 0:
        Bb = B // 2
    else:
        Bb = B
    grid = (B // Bb,)

    bf = jnp.bfloat16
    # Fuse q/k/v into one (C, 3C) weight -> a single wider MXU matmul.
    wqkv = jnp.concatenate(
        [params["wq"], params["wk"], params["wv"]], axis=1).astype(bf)

    # Precomputed additive causal mask (resident, reused every step).
    tril = jnp.tril(jnp.ones((T, T), dtype=bool))
    mask = jnp.where(tril, 0.0, NEG_INF).astype(jnp.float32)

    # Token ids streamed as a (B*T, 1) int32 slab (tiny); the embedding gather
    # happens inside the kernel against the resident table.
    idx2d = idx.reshape(B * T, 1).astype(jnp.int32)
    pos_emb = params["pos_table"][:T]                            # (T, C) f32

    kernel_inputs = (
        idx2d,
        params["tok_table"],
        pos_emb,
        mask,
        params["ln1_w"], params["ln1_b"],
        wqkv,
        params["wproj"].astype(bf), params["bproj"],
        params["ln2_w"], params["ln2_b"],
        params["w1"].astype(bf), params["b1"],
        params["w2"].astype(bf), params["b2"],
    )

    in_specs = [
        pl.BlockSpec((Bb * T, 1), lambda b: (b, 0)),             # per-step token ids
    ] + [_const_spec(a.shape, single_buffer_weights) for a in kernel_inputs[1:]]

    out = pl.pallas_call(
        encoder_block_kernel,
        out_shape=jax.ShapeDtypeStruct((B, T, C), jnp.float32),
        grid_spec=pltpu.PrefetchScalarGridSpec(
            num_scalar_prefetch=0,
            grid=grid,
            in_specs=in_specs,
            out_specs=pl.BlockSpec((Bb, T, C), lambda b: (b, 0, 0)),
        ),
        compiler_params=pltpu.CompilerParams(
            dimension_semantics=("parallel",),
            # Explicit budget: above the 32 MiB scoped default, below v7x's
            # 64 MiB physical VMEM (and far below v5e/v6e's 128 MiB).
            vmem_limit_bytes=48 * 1024 * 1024,
        ),
    )(*kernel_inputs)
    return out


def init_params(key):
    C = N_EMBED
    ks = jax.random.split(key, 12)
    s = 0.02
    return {
        "tok_table": s * jax.random.normal(ks[0], (VOCAB_SIZE, C), jnp.float32),
        "pos_table": s * jax.random.normal(ks[1], (BLOCK_SIZE, C), jnp.float32),
        "ln1_w": jnp.ones((1, C), jnp.float32),
        "ln1_b": jnp.zeros((1, C), jnp.float32),
        "wk": s * jax.random.normal(ks[2], (C, C), jnp.float32),
        "wq": s * jax.random.normal(ks[3], (C, C), jnp.float32),
        "wv": s * jax.random.normal(ks[4], (C, C), jnp.float32),
        "wproj": s * jax.random.normal(ks[5], (C, C), jnp.float32),
        "bproj": s * jax.random.normal(ks[6], (1, C), jnp.float32),
        "ln2_w": jnp.ones((1, C), jnp.float32),
        "ln2_b": jnp.zeros((1, C), jnp.float32),
        "w1": s * jax.random.normal(ks[7], (C, 4 * C), jnp.float32),
        "b1": s * jax.random.normal(ks[8], (1, 4 * C), jnp.float32),
        "w2": s * jax.random.normal(ks[9], (4 * C, C), jnp.float32),
        "b2": s * jax.random.normal(ks[10], (1, C), jnp.float32),
    }


def reference_forward(idx, p, bf16_dots=False):
    """Pure-JAX reference mirroring the PyTorch forward (eval mode).

    bf16_dots=True mirrors the kernel's dtype policy (bf16 dot operands,
    f32 accumulation) for a tight numerical check; False is exact f32.
    """
    cast = (lambda a: a.astype(jnp.bfloat16)) if bf16_dots else (lambda a: a)

    tok = jnp.take(p["tok_table"], idx, axis=0)
    pos = p["pos_table"][: idx.shape[1]]
    x = tok + pos
    T, C = x.shape[1], x.shape[2]

    def ln(x, w, b):
        mu = jnp.mean(x, axis=-1, keepdims=True)
        var = jnp.mean((x - mu) ** 2, axis=-1, keepdims=True)
        return (x - mu) / jnp.sqrt(var + LN_EPS) * w[0] + b[0]

    def mm(a, w):
        return jnp.matmul(cast(a), cast(w), preferred_element_type=jnp.float32)

    xn = ln(x, p["ln1_w"], p["ln1_b"])
    q, k, v = mm(xn, p["wq"]), mm(xn, p["wk"]), mm(xn, p["wv"])
    wei = jnp.einsum("btc,bsc->bts", cast(q), cast(k),
                     preferred_element_type=jnp.float32) * (C ** -0.5)
    mask = jnp.tril(jnp.ones((T, T), bool))
    wei = jnp.where(mask, wei, -jnp.inf)
    wei = jax.nn.softmax(wei, axis=-1)
    attn = jnp.einsum("bts,bsc->btc", cast(wei), cast(v),
                      preferred_element_type=jnp.float32)
    x = x + (mm(attn, p["wproj"]) + p["bproj"][0])
    xn2 = ln(x, p["ln2_w"], p["ln2_b"])
    h = jnp.maximum(mm(xn2, p["w1"]) + p["b1"][0], 0.0)
    x = x + (mm(h, p["w2"]) + p["b2"][0])
    return x


if __name__ == "__main__":
    key = jax.random.PRNGKey(0)
    pkey, ikey = jax.random.split(key)
    params = init_params(pkey)

    B, T = 4, 16
    idx = jax.random.randint(ikey, (B, T), 0, VOCAB_SIZE, dtype=jnp.int32)

    try:
        out = jax.block_until_ready(encoder_forward(idx, params, True))
    except Exception:
        # Safety net: fall back to the previously-validated double-buffered
        # resident-weight configuration if single-buffering is rejected.
        out = jax.block_until_ready(encoder_forward(idx, params, False))
    assert out.shape == (B, T, N_EMBED)

    # Tight check against a reference that mirrors the kernel's bf16-dot policy.
    ref_bf16 = reference_forward(idx, params, bf16_dots=True)
    assert jnp.allclose(out, ref_bf16, atol=5e-3, rtol=5e-3), \
        "mismatch vs bf16-dot reference"

    # Looser check against the exact f32 (PyTorch-semantics) reference.
    ref_f32 = reference_forward(idx, params, bf16_dots=False)
    assert jnp.allclose(out, ref_f32, atol=3e-2, rtol=3e-2), \
        "mismatch vs f32 reference"

    print("KERNEL_OK")
</pallas_src>

<mosaic_0001>
module attributes {stable_mosaic.version = 11 : i64} {
  func.func @encoder_block_kernel(%arg0: i32, %arg1: memref<64x1xi32, #tpu.memory_space<vmem>>, %arg2: memref<16x128xf32, #tpu.memory_space<vmem>>, %arg3: memref<16x128xf32, #tpu.memory_space<vmem>>, %arg4: memref<16x16xf32, #tpu.memory_space<vmem>>, %arg5: memref<1x128xf32, #tpu.memory_space<vmem>>, %arg6: memref<1x128xf32, #tpu.memory_space<vmem>>, %arg7: memref<128x384xbf16, #tpu.memory_space<vmem>>, %arg8: memref<128x128xbf16, #tpu.memory_space<vmem>>, %arg9: memref<1x128xf32, #tpu.memory_space<vmem>>, %arg10: memref<1x128xf32, #tpu.memory_space<vmem>>, %arg11: memref<1x128xf32, #tpu.memory_space<vmem>>, %arg12: memref<128x512xbf16, #tpu.memory_space<vmem>>, %arg13: memref<1x512xf32, #tpu.memory_space<vmem>>, %arg14: memref<512x128xbf16, #tpu.memory_space<vmem>>, %arg15: memref<1x128xf32, #tpu.memory_space<vmem>>, %arg16: memref<4x16x128xf32, #tpu.memory_space<vmem>>) attributes {dimension_semantics = [#tpu.dimension_semantics<parallel>], iteration_bounds = array<i64: 1>, scalar_prefetch = 0 : i64, scratch_operands = 0 : i64, tpu.core_type = #tpu.core_type<tc>, window_params = [{transform_indices = @transform_0, window_bounds = array<i64: 64, 1>}, {pipeline_mode = #tpu.pipeline_mode<synchronous>, transform_indices = @transform_1, window_bounds = array<i64: 16, 128>}, {pipeline_mode = #tpu.pipeline_mode<synchronous>, transform_indices = @transform_2, window_bounds = array<i64: 16, 128>}, {pipeline_mode = #tpu.pipeline_mode<synchronous>, transform_indices = @transform_3, window_bounds = array<i64: 16, 16>}, {pipeline_mode = #tpu.pipeline_mode<synchronous>, transform_indices = @transform_4, window_bounds = array<i64: 1, 128>}, {pipeline_mode = #tpu.pipeline_mode<synchronous>, transform_indices = @transform_5, window_bounds = array<i64: 1, 128>}, {pipeline_mode = #tpu.pipeline_mode<synchronous>, transform_indices = @transform_6, window_bounds = array<i64: 128, 384>}, {pipeline_mode = #tpu.pipeline_mode<synchronous>, transform_indices = @transform_7, window_bounds = array<i64: 128, 128>}, {pipeline_mode = #tpu.pipeline_mode<synchronous>, transform_indices = @transform_8, window_bounds = array<i64: 1, 128>}, {pipeline_mode = #tpu.pipeline_mode<synchronous>, transform_indices = @transform_9, window_bounds = array<i64: 1, 128>}, {pipeline_mode = #tpu.pipeline_mode<synchronous>, transform_indices = @transform_10, window_bounds = array<i64: 1, 128>}, {pipeline_mode = #tpu.pipeline_mode<synchronous>, transform_indices = @transform_11, window_bounds = array<i64: 128, 512>}, {pipeline_mode = #tpu.pipeline_mode<synchronous>, transform_indices = @transform_12, window_bounds = array<i64: 1, 512>}, {pipeline_mode = #tpu.pipeline_mode<synchronous>, transform_indices = @transform_13, window_bounds = array<i64: 512, 128>}, {pipeline_mode = #tpu.pipeline_mode<synchronous>, transform_indices = @transform_14, window_bounds = array<i64: 1, 128>}, {transform_indices = @transform_15, window_bounds = array<i64: 4, 16, 128>}]} {
    %c0 = arith.constant 0 : index
    %c0_0 = arith.constant 0 : index
    %0 = vector.load %arg1[%c0, %c0_0] : memref<64x1xi32, #tpu.memory_space<vmem>>, vector<64x1xi32>
    %1 = tpu.iota {dimensions = array<i32: 1>} : vector<1x16xi32>
    %2 = vector.broadcast %0 : vector<64x1xi32> to vector<64x16xi32>
    %3 = vector.broadcast %1 : vector<1x16xi32> to vector<64x16xi32>
    %4 = arith.cmpi eq, %2, %3 : vector<64x16xi32>
    %5 = arith.extui %4 : vector<64x16xi1> to vector<64x16xi32>
    %6 = arith.sitofp %5 : vector<64x16xi32> to vector<64x16xf32>
    %c0_1 = arith.constant 0 : index
    %c0_2 = arith.constant 0 : index
    %7 = vector.load %arg2[%c0_1, %c0_2] : memref<16x128xf32, #tpu.memory_space<vmem>>, vector<16x128xf32>
    %cst = arith.constant dense<0.000000e+00> : vector<64x128xf32>
    %8 = tpu.matmul %6, %7, %cst {dimension_numbers = #tpu.dot_dimension_numbers<[1], [0], [0], [1], [0, 0, 1, 1], [], []>} : vector<64x16xf32>, vector<16x128xf32>, vector<64x128xf32> -> vector<64x128xf32>
    %9 = vector.shape_cast %8 : vector<64x128xf32> to vector<4x16x128xf32>
    %c0_3 = arith.constant 0 : index
    %c0_4 = arith.constant 0 : index
    %10 = vector.load %arg3[%c0_3, %c0_4] : memref<16x128xf32, #tpu.memory_space<vmem>>, vector<16x128xf32>
    %11 = vector.shape_cast %10 : vector<16x128xf32> to vector<1x16x128xf32>
    %12 = vector.broadcast %11 : vector<1x16x128xf32> to vector<4x16x128xf32>
    %13 = arith.addf %9, %12 : vector<4x16x128xf32>
    %14 = vector.shape_cast %13 : vector<4x16x128xf32> to vector<64x128xf32>
    %c0_5 = arith.constant 0 : index
    %c0_6 = arith.constant 0 : index
    %15 = vector.load %arg5[%c0_5, %c0_6] : memref<1x128xf32, #tpu.memory_space<vmem>>, vector<1x128xf32>
    %c0_7 = arith.constant 0 : index
    %c0_8 = arith.constant 0 : index
    %16 = vector.load %arg6[%c0_7, %c0_8] : memref<1x128xf32, #tpu.memory_space<vmem>>, vector<1x128xf32>
    %cst_9 = arith.constant dense<0.000000e+00> : vector<64xf32>
    %17 = vector.multi_reduction <add>, %14, %cst_9 [1] : vector<64x128xf32> to vector<64xf32>
    %18 = vector.shape_cast %17 : vector<64xf32> to vector<64x1xf32>
    %cst_10 = arith.constant 1.280000e+02 : f32
    %19 = vector.broadcast %cst_10 : f32 to vector<64x1xf32>
    %20 = arith.divf %18, %19 : vector<64x1xf32>
    %21 = vector.broadcast %20 : vector<64x1xf32> to vector<64x128xf32>
    %22 = arith.subf %14, %21 : vector<64x128xf32>
    %23 = arith.mulf %22, %22 : vector<64x128xf32>
    %cst_11 = arith.constant dense<0.000000e+00> : vector<64xf32>
    %24 = vector.multi_reduction <add>, %23, %cst_11 [1] : vector<64x128xf32> to vector<64xf32>
    %25 = vector.shape_cast %24 : vector<64xf32> to vector<64x1xf32>
    %cst_12 = arith.constant 1.280000e+02 : f32
    %26 = vector.broadcast %cst_12 : f32 to vector<64x1xf32>
    %27 = arith.divf %25, %26 : vector<64x1xf32>
    %28 = vector.broadcast %20 : vector<64x1xf32> to vector<64x128xf32>
    %29 = arith.subf %14, %28 : vector<64x128xf32>
    %cst_13 = arith.constant 9.99999974E-6 : f32
    %30 = vector.broadcast %cst_13 : f32 to vector<64x1xf32>
    %31 = arith.addf %27, %30 : vector<64x1xf32>
    %32 = math.rsqrt %31 : vector<64x1xf32>
    %33 = vector.broadcast %32 : vector<64x1xf32> to vector<64x128xf32>
    %34 = arith.mulf %29, %33 : vector<64x128xf32>
    %35 = vector.broadcast %15 : vector<1x128xf32> to vector<64x128xf32>
    %36 = arith.mulf %34, %35 : vector<64x128xf32>
    %37 = vector.broadcast %16 : vector<1x128xf32> to vector<64x128xf32>
    %38 = arith.addf %36, %37 : vector<64x128xf32>
    %39 = arith.truncf %38 : vector<64x128xf32> to vector<64x128xbf16>
    %c0_14 = arith.constant 0 : index
    %c0_15 = arith.constant 0 : index
    %40 = vector.load %arg7[%c0_14, %c0_15] : memref<128x384xbf16, #tpu.memory_space<vmem>>, vector<128x384xbf16>
    %cst_16 = arith.constant dense<0.000000e+00> : vector<64x384xf32>
    %41 = tpu.matmul %39, %40, %cst_16 {dimension_numbers = #tpu.dot_dimension_numbers<[1], [0], [0], [1], [0, 0, 1, 1], [], []>} : vector<64x128xbf16>, vector<128x384xbf16>, vector<64x384xf32> -> vector<64x384xf32>
    %42 = vector.extract_strided_slice %41 {offsets = [0, 0], sizes = [64, 128], strides = [1, 1]} : vector<64x384xf32> to vector<64x128xf32>
    %43 = vector.shape_cast %42 : vector<64x128xf32> to vector<4x16x128xf32>
    %44 = arith.truncf %43 : vector<4x16x128xf32> to vector<4x16x128xbf16>
    %45 = vector.extract_strided_slice %41 {offsets = [0, 128], sizes = [64, 128], strides = [1, 1]} : vector<64x384xf32> to vector<64x128xf32>
    %46 = vector.shape_cast %45 : vector<64x128xf32> to vector<4x16x128xf32>
    %47 = arith.truncf %46 : vector<4x16x128xf32> to vector<4x16x128xbf16>
    %48 = vector.extract_strided_slice %41 {offsets = [0, 256], sizes = [64, 128], strides = [1, 1]} : vector<64x384xf32> to vector<64x128xf32>
    %49 = vector.shape_cast %48 : vector<64x128xf32> to vector<4x16x128xf32>
    %50 = arith.truncf %49 : vector<4x16x128xf32> to vector<4x16x128xbf16>
    %cst_17 = arith.constant dense<0.000000e+00> : vector<4x16x16xf32>
    %51 = tpu.matmul %44, %47, %cst_17 {dimension_numbers = #tpu.dot_dimension_numbers<[2], [2], [1], [1], [0, 0, 0, 1, 1, 1], [0], [0]>} : vector<4x16x128xbf16>, vector<4x16x128xbf16>, vector<4x16x16xf32> -> vector<4x16x16xf32>
    %cst_18 = arith.constant 0.0883883461 : f32
    %52 = vector.broadcast %cst_18 : f32 to vector<4x16x16xf32>
    %53 = arith.mulf %51, %52 : vector<4x16x16xf32>
    %c0_19 = arith.constant 0 : index
    %c0_20 = arith.constant 0 : index
    %54 = vector.load %arg4[%c0_19, %c0_20] : memref<16x16xf32, #tpu.memory_space<vmem>>, vector<16x16xf32>
    %55 = vector.shape_cast %54 : vector<16x16xf32> to vector<1x16x16xf32>
    %56 = vector.broadcast %55 : vector<1x16x16xf32> to vector<4x16x16xf32>
    %57 = arith.addf %53, %56 : vector<4x16x16xf32>
    %cst_21 = arith.constant dense<0xFF800000> : vector<4x16xf32>
    %58 = vector.multi_reduction <maximumf>, %57, %cst_21 [2] : vector<4x16x16xf32> to vector<4x16xf32>
    %59 = vector.shape_cast %58 : vector<4x16xf32> to vector<4x16x1xf32>
    %60 = vector.broadcast %59 : vector<4x16x1xf32> to vector<4x16x16xf32>
    %61 = arith.subf %57, %60 : vector<4x16x16xf32>
    %62 = math.exp %61 : vector<4x16x16xf32>
    %cst_22 = arith.constant dense<0.000000e+00> : vector<4x16xf32>
    %63 = vector.multi_reduction <add>, %62, %cst_22 [2] : vector<4x16x16xf32> to vector<4x16xf32>
    %64 = vector.shape_cast %63 : vector<4x16xf32> to vector<4x16x1xf32>
    %65 = tpu.reciprocal %64 {approx = true} : vector<4x16x1xf32> -> vector<4x16x1xf32>
    %66 = vector.broadcast %65 : vector<4x16x1xf32> to vector<4x16x16xf32>
    %67 = arith.mulf %62, %66 : vector<4x16x16xf32>
    %68 = arith.truncf %67 : vector<4x16x16xf32> to vector<4x16x16xbf16>
    %cst_23 = arith.constant dense<0.000000e+00> : vector<4x16x128xf32>
    %69 = tpu.matmul %68, %50, %cst_23 {dimension_numbers = #tpu.dot_dimension_numbers<[2], [1], [1], [2], [0, 0, 0, 1, 1, 2], [0], [0]>} : vector<4x16x16xbf16>, vector<4x16x128xbf16>, vector<4x16x128xf32> -> vector<4x16x128xf32>
    %70 = vector.shape_cast %69 : vector<4x16x128xf32> to vector<64x128xf32>
    %71 = arith.truncf %70 : vector<64x128xf32> to vector<64x128xbf16>
    %c0_24 = arith.constant 0 : index
    %c0_25 = arith.constant 0 : index
    %72 = vector.load %arg8[%c0_24, %c0_25] : memref<128x128xbf16, #tpu.memory_space<vmem>>, vector<128x128xbf16>
    %cst_26 = arith.constant dense<0.000000e+00> : vector<64x128xf32>
    %73 = tpu.matmul %71, %72, %cst_26 {dimension_numbers = #tpu.dot_dimension_numbers<[1], [0], [0], [1], [0, 0, 1, 1], [], []>} : vector<64x128xbf16>, vector<128x128xbf16>, vector<64x128xf32> -> vector<64x128xf32>
    %c0_27 = arith.constant 0 : index
    %c0_28 = arith.constant 0 : index
    %74 = vector.load %arg9[%c0_27, %c0_28] : memref<1x128xf32, #tpu.memory_space<vmem>>, vector<1x128xf32>
    %75 = vector.broadcast %74 : vector<1x128xf32> to vector<64x128xf32>
    %76 = arith.addf %73, %75 : vector<64x128xf32>
    %77 = arith.addf %14, %76 : vector<64x128xf32>
    %c0_29 = arith.constant 0 : index
    %c0_30 = arith.constant 0 : index
    %78 = vector.load %arg10[%c0_29, %c0_30] : memref<1x128xf32, #tpu.memory_space<vmem>>, vector<1x128xf32>
    %c0_31 = arith.constant 0 : index
    %c0_32 = arith.constant 0 : index
    %79 = vector.load %arg11[%c0_31, %c0_32] : memref<1x128xf32, #tpu.memory_space<vmem>>, vector<1x128xf32>
    %cst_33 = arith.constant dense<0.000000e+00> : vector<64xf32>
    %80 = vector.multi_reduction <add>, %77, %cst_33 [1] : vector<64x128xf32> to vector<64xf32>
    %81 = vector.shape_cast %80 : vector<64xf32> to vector<64x1xf32>
    %cst_34 = arith.constant 1.280000e+02 : f32
    %82 = vector.broadcast %cst_34 : f32 to vector<64x1xf32>
    %83 = arith.divf %81, %82 : vector<64x1xf32>
    %84 = vector.broadcast %83 : vector<64x1xf32> to vector<64x128xf32>
    %85 = arith.subf %77, %84 : vector<64x128xf32>
    %86 = arith.mulf %85, %85 : vector<64x128xf32>
    %cst_35 = arith.constant dense<0.000000e+00> : vector<64xf32>
    %87 = vector.multi_reduction <add>, %86, %cst_35 [1] : vector<64x128xf32> to vector<64xf32>
    %88 = vector.shape_cast %87 : vector<64xf32> to vector<64x1xf32>
    %cst_36 = arith.constant 1.280000e+02 : f32
    %89 = vector.broadcast %cst_36 : f32 to vector<64x1xf32>
    %90 = arith.divf %88, %89 : vector<64x1xf32>
    %91 = vector.broadcast %83 : vector<64x1xf32> to vector<64x128xf32>
    %92 = arith.subf %77, %91 : vector<64x128xf32>
    %cst_37 = arith.constant 9.99999974E-6 : f32
    %93 = vector.broadcast %cst_37 : f32 to vector<64x1xf32>
    %94 = arith.addf %90, %93 : vector<64x1xf32>
    %95 = math.rsqrt %94 : vector<64x1xf32>
    %96 = vector.broadcast %95 : vector<64x1xf32> to vector<64x128xf32>
    %97 = arith.mulf %92, %96 : vector<64x128xf32>
    %98 = vector.broadcast %78 : vector<1x128xf32> to vector<64x128xf32>
    %99 = arith.mulf %97, %98 : vector<64x128xf32>
    %100 = vector.broadcast %79 : vector<1x128xf32> to vector<64x128xf32>
    %101 = arith.addf %99, %100 : vector<64x128xf32>
    %102 = arith.truncf %101 : vector<64x128xf32> to vector<64x128xbf16>
    %c0_38 = arith.constant 0 : index
    %c0_39 = arith.constant 0 : index
    %103 = vector.load %arg12[%c0_38, %c0_39] : memref<128x512xbf16, #tpu.memory_space<vmem>>, vector<128x512xbf16>
    %cst_40 = arith.constant dense<0.000000e+00> : vector<64x512xf32>
    %104 = tpu.matmul %102, %103, %cst_40 {dimension_numbers = #tpu.dot_dimension_numbers<[1], [0], [0], [1], [0, 0, 1, 1], [], []>} : vector<64x128xbf16>, vector<128x512xbf16>, vector<64x512xf32> -> vector<64x512xf32>
    %c0_41 = arith.constant 0 : index
    %c0_42 = arith.constant 0 : index
    %105 = vector.load %arg13[%c0_41, %c0_42] : memref<1x512xf32, #tpu.memory_space<vmem>>, vector<1x512xf32>
    %106 = vector.broadcast %105 : vector<1x512xf32> to vector<64x512xf32>
    %107 = arith.addf %104, %106 : vector<64x512xf32>
    %cst_43 = arith.constant 0.000000e+00 : f32
    %108 = vector.broadcast %cst_43 : f32 to vector<64x512xf32>
    %109 = arith.maximumf %107, %108 : vector<64x512xf32>
    %110 = arith.truncf %109 : vector<64x512xf32> to vector<64x512xbf16>
    %c0_44 = arith.constant 0 : index
    %c0_45 = arith.constant 0 : index
    %111 = vector.load %arg14[%c0_44, %c0_45] : memref<512x128xbf16, #tpu.memory_space<vmem>>, vector<512x128xbf16>
    %cst_46 = arith.constant dense<0.000000e+00> : vector<64x128xf32>
    %112 = tpu.matmul %110, %111, %cst_46 {dimension_numbers = #tpu.dot_dimension_numbers<[1], [0], [0], [1], [0, 0, 1, 1], [], []>} : vector<64x512xbf16>, vector<512x128xbf16>, vector<64x128xf32> -> vector<64x128xf32>
    %c0_47 = arith.constant 0 : index
    %c0_48 = arith.constant 0 : index
    %113 = vector.load %arg15[%c0_47, %c0_48] : memref<1x128xf32, #tpu.memory_space<vmem>>, vector<1x128xf32>
    %114 = vector.broadcast %113 : vector<1x128xf32> to vector<64x128xf32>
    %115 = arith.addf %112, %114 : vector<64x128xf32>
    %116 = arith.addf %77, %115 : vector<64x128xf32>
    %117 = vector.shape_cast %116 : vector<64x128xf32> to vector<4x16x128xf32>
    %c0_49 = arith.constant 0 : index
    %c0_50 = arith.constant 0 : index
    %c0_51 = arith.constant 0 : index
    %118 = vector.load %arg16[%c0_49, %c0_50, %c0_51] : memref<4x16x128xf32, #tpu.memory_space<vmem>>, vector<4x16x128xf32>
    tpu.vector_store %arg16[%c0_49, %c0_50, %c0_51], %117 {strides = array<i32>} : memref<4x16x128xf32, #tpu.memory_space<vmem>>, vector<4x16x128xf32>,
    return
  }
  func.func @transform_0(%arg0: i32) -> (i32, i32) {
    %c0_i32 = arith.constant 0 : i32
    %c0_i32_0 = arith.constant 0 : i32
    return %arg0, %c0_i32 : i32, i32
  }
  func.func @transform_1(%arg0: i32) -> (i32, i32) {
    %c0_i32 = arith.constant 0 : i32
    %c0_i32_0 = arith.constant 0 : i32
    %c0_i32_1 = arith.constant 0 : i32
    return %c0_i32, %c0_i32_0 : i32, i32
  }
  func.func @transform_2(%arg0: i32) -> (i32, i32) {
    %c0_i32 = arith.constant 0 : i32
    %c0_i32_0 = arith.constant 0 : i32
    %c0_i32_1 = arith.constant 0 : i32
    return %c0_i32, %c0_i32_0 : i32, i32
  }
  func.func @transform_3(%arg0: i32) -> (i32, i32) {
    %c0_i32 = arith.constant 0 : i32
    %c0_i32_0 = arith.constant 0 : i32
    %c0_i32_1 = arith.constant 0 : i32
    return %c0_i32, %c0_i32_0 : i32, i32
  }
  func.func @transform_4(%arg0: i32) -> (i32, i32) {
    %c0_i32 = arith.constant 0 : i32
    %c0_i32_0 = arith.constant 0 : i32
    %c0_i32_1 = arith.constant 0 : i32
    return %c0_i32, %c0_i32_0 : i32, i32
  }
  func.func @transform_5(%arg0: i32) -> (i32, i32) {
    %c0_i32 = arith.constant 0 : i32
    %c0_i32_0 = arith.constant 0 : i32
    %c0_i32_1 = arith.constant 0 : i32
    return %c0_i32, %c0_i32_0 : i32, i32
  }
  func.func @transform_6(%arg0: i32) -> (i32, i32) {
    %c0_i32 = arith.constant 0 : i32
    %c0_i32_0 = arith.constant 0 : i32
    %c0_i32_1 = arith.constant 0 : i32
    return %c0_i32, %c0_i32_0 : i32, i32
  }
  func.func @transform_7(%arg0: i32) -> (i32, i32) {
    %c0_i32 = arith.constant 0 : i32
    %c0_i32_0 = arith.constant 0 : i32
    %c0_i32_1 = arith.constant 0 : i32
    return %c0_i32, %c0_i32_0 : i32, i32
  }
  func.func @transform_8(%arg0: i32) -> (i32, i32) {
    %c0_i32 = arith.constant 0 : i32
    %c0_i32_0 = arith.constant 0 : i32
    %c0_i32_1 = arith.constant 0 : i32
    return %c0_i32, %c0_i32_0 : i32, i32
  }
  func.func @transform_9(%arg0: i32) -> (i32, i32) {
    %c0_i32 = arith.constant 0 : i32
    %c0_i32_0 = arith.constant 0 : i32
    %c0_i32_1 = arith.constant 0 : i32
    return %c0_i32, %c0_i32_0 : i32, i32
  }
  func.func @transform_10(%arg0: i32) -> (i32, i32) {
    %c0_i32 = arith.constant 0 : i32
    %c0_i32_0 = arith.constant 0 : i32
    %c0_i32_1 = arith.constant 0 : i32
    return %c0_i32, %c0_i32_0 : i32, i32
  }
  func.func @transform_11(%arg0: i32) -> (i32, i32) {
    %c0_i32 = arith.constant 0 : i32
    %c0_i32_0 = arith.constant 0 : i32
    %c0_i32_1 = arith.constant 0 : i32
    return %c0_i32, %c0_i32_0 : i32, i32
  }
  func.func @transform_12(%arg0: i32) -> (i32, i32) {
    %c0_i32 = arith.constant 0 : i32
    %c0_i32_0 = arith.constant 0 : i32
    %c0_i32_1 = arith.constant 0 : i32
    return %c0_i32, %c0_i32_0 : i32, i32
  }
  func.func @transform_13(%arg0: i32) -> (i32, i32) {
    %c0_i32 = arith.constant 0 : i32
    %c0_i32_0 = arith.constant 0 : i32
    %c0_i32_1 = arith.constant 0 : i32
    return %c0_i32, %c0_i32_0 : i32, i32
  }
  func.func @transform_14(%arg0: i32) -> (i32, i32) {
    %c0_i32 = arith.constant 0 : i32
    %c0_i32_0 = arith.constant 0 : i32
    %c0_i32_1 = arith.constant 0 : i32
    return %c0_i32, %c0_i32_0 : i32, i32
  }
  func.func @transform_15(%arg0: i32) -> (i32, i32, i32) {
    %c0_i32 = arith.constant 0 : i32
    %c0_i32_0 = arith.constant 0 : i32
    %c0_i32_1 = arith.constant 0 : i32
    return %arg0, %c0_i32, %c0_i32_0 : i32, i32, i32
  }
}

module attributes {stable_mosaic.version = 11 : i64} {
  func.func @encoder_block_kernel(%arg0: i32, %arg1: memref<64x1xi32, #tpu.memory_space<vmem>>, %arg2: memref<16x128xf32, #tpu.memory_space<vmem>>, %arg3: memref<16x128xf32, #tpu.memory_space<vmem>>, %arg4: memref<16x16xf32, #tpu.memory_space<vmem>>, %arg5: memref<1x128xf32, #tpu.memory_space<vmem>>, %arg6: memref<1x128xf32, #tpu.memory_space<vmem>>, %arg7: memref<128x384xbf16, #tpu.memory_space<vmem>>, %arg8: memref<128x128xbf16, #tpu.memory_space<vmem>>, %arg9: memref<1x128xf32, #tpu.memory_space<vmem>>, %arg10: memref<1x128xf32, #tpu.memory_space<vmem>>, %arg11: memref<1x128xf32, #tpu.memory_space<vmem>>, %arg12: memref<128x512xbf16, #tpu.memory_space<vmem>>, %arg13: memref<1x512xf32, #tpu.memory_space<vmem>>, %arg14: memref<512x128xbf16, #tpu.memory_space<vmem>>, %arg15: memref<1x128xf32, #tpu.memory_space<vmem>>, %arg16: memref<4x16x128xf32, #tpu.memory_space<vmem>>) attributes {dimension_semantics = [#tpu.dimension_semantics<parallel>], iteration_bounds = array<i64: 1>, scalar_prefetch = 0 : i64, scratch_operands = 0 : i64, tpu.core_type = #tpu.core_type<tc>, window_params = [{transform_indices = @transform_0, window_bounds = array<i64: 64, 1>}, {pipeline_mode = #tpu.pipeline_mode<synchronous>, transform_indices = @transform_1, window_bounds = array<i64: 16, 128>}, {pipeline_mode = #tpu.pipeline_mode<synchronous>, transform_indices = @transform_2, window_bounds = array<i64: 16, 128>}, {pipeline_mode = #tpu.pipeline_mode<synchronous>, transform_indices = @transform_3, window_bounds = array<i64: 16, 16>}, {pipeline_mode = #tpu.pipeline_mode<synchronous>, transform_indices = @transform_4, window_bounds = array<i64: 1, 128>}, {pipeline_mode = #tpu.pipeline_mode<synchronous>, transform_indices = @transform_5, window_bounds = array<i64: 1, 128>}, {pipeline_mode = #tpu.pipeline_mode<synchronous>, transform_indices = @transform_6, window_bounds = array<i64: 128, 384>}, {pipeline_mode = #tpu.pipeline_mode<synchronous>, transform_indices = @transform_7, window_bounds = array<i64: 128, 128>}, {pipeline_mode = #tpu.pipeline_mode<synchronous>, transform_indices = @transform_8, window_bounds = array<i64: 1, 128>}, {pipeline_mode = #tpu.pipeline_mode<synchronous>, transform_indices = @transform_9, window_bounds = array<i64: 1, 128>}, {pipeline_mode = #tpu.pipeline_mode<synchronous>, transform_indices = @transform_10, window_bounds = array<i64: 1, 128>}, {pipeline_mode = #tpu.pipeline_mode<synchronous>, transform_indices = @transform_11, window_bounds = array<i64: 128, 512>}, {pipeline_mode = #tpu.pipeline_mode<synchronous>, transform_indices = @transform_12, window_bounds = array<i64: 1, 512>}, {pipeline_mode = #tpu.pipeline_mode<synchronous>, transform_indices = @transform_13, window_bounds = array<i64: 512, 128>}, {pipeline_mode = #tpu.pipeline_mode<synchronous>, transform_indices = @transform_14, window_bounds = array<i64: 1, 128>}, {transform_indices = @transform_15, window_bounds = array<i64: 4, 16, 128>}]} {
    %c0 = arith.constant 0 : index
    %c0_0 = arith.constant 0 : index
    %0 = vector.load %arg1[%c0, %c0_0] : memref<64x1xi32, #tpu.memory_space<vmem>>, vector<64x1xi32>
    %1 = tpu.iota {dimensions = array<i32: 1>} : vector<1x16xi32>
    %2 = vector.broadcast %0 : vector<64x1xi32> to vector<64x16xi32>
    %3 = vector.broadcast %1 : vector<1x16xi32> to vector<64x16xi32>
    %4 = arith.cmpi eq, %2, %3 : vector<64x16xi32>
    %5 = arith.extui %4 : vector<64x16xi1> to vector<64x16xi32>
    %6 = arith.sitofp %5 : vector<64x16xi32> to vector<64x16xf32>
    %c0_1 = arith.constant 0 : index
    %c0_2 = arith.constant 0 : index
    %7 = vector.load %arg2[%c0_1, %c0_2] : memref<16x128xf32, #tpu.memory_space<vmem>>, vector<16x128xf32>
    %cst = arith.constant dense<0.000000e+00> : vector<64x128xf32>
    %8 = tpu.matmul %6, %7, %cst {dimension_numbers = #tpu.dot_dimension_numbers<[1], [0], [0], [1], [0, 0, 1, 1], [], []>} : vector<64x16xf32>, vector<16x128xf32>, vector<64x128xf32> -> vector<64x128xf32>
    %9 = vector.shape_cast %8 : vector<64x128xf32> to vector<4x16x128xf32>
    %c0_3 = arith.constant 0 : index
    %c0_4 = arith.constant 0 : index
    %10 = vector.load %arg3[%c0_3, %c0_4] : memref<16x128xf32, #tpu.memory_space<vmem>>, vector<16x128xf32>
    %11 = vector.shape_cast %10 : vector<16x128xf32> to vector<1x16x128xf32>
    %12 = vector.broadcast %11 : vector<1x16x128xf32> to vector<4x16x128xf32>
    %13 = arith.addf %9, %12 : vector<4x16x128xf32>
    %14 = vector.shape_cast %13 : vector<4x16x128xf32> to vector<64x128xf32>
    %c0_5 = arith.constant 0 : index
    %c0_6 = arith.constant 0 : index
    %15 = vector.load %arg5[%c0_5, %c0_6] : memref<1x128xf32, #tpu.memory_space<vmem>>, vector<1x128xf32>
    %c0_7 = arith.constant 0 : index
    %c0_8 = arith.constant 0 : index
    %16 = vector.load %arg6[%c0_7, %c0_8] : memref<1x128xf32, #tpu.memory_space<vmem>>, vector<1x128xf32>
    %cst_9 = arith.constant dense<0.000000e+00> : vector<64xf32>
    %17 = vector.multi_reduction <add>, %14, %cst_9 [1] : vector<64x128xf32> to vector<64xf32>
    %18 = vector.shape_cast %17 : vector<64xf32> to vector<64x1xf32>
    %cst_10 = arith.constant 1.280000e+02 : f32
    %19 = vector.broadcast %cst_10 : f32 to vector<64x1xf32>
    %20 = arith.divf %18, %19 : vector<64x1xf32>
    %21 = vector.broadcast %20 : vector<64x1xf32> to vector<64x128xf32>
    %22 = arith.subf %14, %21 : vector<64x128xf32>
    %23 = arith.mulf %22, %22 : vector<64x128xf32>
    %cst_11 = arith.constant dense<0.000000e+00> : vector<64xf32>
    %24 = vector.multi_reduction <add>, %23, %cst_11 [1] : vector<64x128xf32> to vector<64xf32>
    %25 = vector.shape_cast %24 : vector<64xf32> to vector<64x1xf32>
    %cst_12 = arith.constant 1.280000e+02 : f32
    %26 = vector.broadcast %cst_12 : f32 to vector<64x1xf32>
    %27 = arith.divf %25, %26 : vector<64x1xf32>
    %28 = vector.broadcast %20 : vector<64x1xf32> to vector<64x128xf32>
    %29 = arith.subf %14, %28 : vector<64x128xf32>
    %cst_13 = arith.constant 9.99999974E-6 : f32
    %30 = vector.broadcast %cst_13 : f32 to vector<64x1xf32>
    %31 = arith.addf %27, %30 : vector<64x1xf32>
    %32 = math.rsqrt %31 : vector<64x1xf32>
    %33 = vector.broadcast %32 : vector<64x1xf32> to vector<64x128xf32>
    %34 = arith.mulf %29, %33 : vector<64x128xf32>
    %35 = vector.broadcast %15 : vector<1x128xf32> to vector<64x128xf32>
    %36 = arith.mulf %34, %35 : vector<64x128xf32>
    %37 = vector.broadcast %16 : vector<1x128xf32> to vector<64x128xf32>
    %38 = arith.addf %36, %37 : vector<64x128xf32>
    %39 = arith.truncf %38 : vector<64x128xf32> to vector<64x128xbf16>
    %c0_14 = arith.constant 0 : index
    %c0_15 = arith.constant 0 : index
    %40 = vector.load %arg7[%c0_14, %c0_15] : memref<128x384xbf16, #tpu.memory_space<vmem>>, vector<128x384xbf16>
    %cst_16 = arith.constant dense<0.000000e+00> : vector<64x384xf32>
    %41 = tpu.matmul %39, %40, %cst_16 {dimension_numbers = #tpu.dot_dimension_numbers<[1], [0], [0], [1], [0, 0, 1, 1], [], []>} : vector<64x128xbf16>, vector<128x384xbf16>, vector<64x384xf32> -> vector<64x384xf32>
    %42 = vector.extract_strided_slice %41 {offsets = [0, 0], sizes = [64, 128], strides = [1, 1]} : vector<64x384xf32> to vector<64x128xf32>
    %43 = vector.shape_cast %42 : vector<64x128xf32> to vector<4x16x128xf32>
    %44 = arith.truncf %43 : vector<4x16x128xf32> to vector<4x16x128xbf16>
    %45 = vector.extract_strided_slice %41 {offsets = [0, 128], sizes = [64, 128], strides = [1, 1]} : vector<64x384xf32> to vector<64x128xf32>
    %46 = vector.shape_cast %45 : vector<64x128xf32> to vector<4x16x128xf32>
    %47 = arith.truncf %46 : vector<4x16x128xf32> to vector<4x16x128xbf16>
    %48 = vector.extract_strided_slice %41 {offsets = [0, 256], sizes = [64, 128], strides = [1, 1]} : vector<64x384xf32> to vector<64x128xf32>
    %49 = vector.shape_cast %48 : vector<64x128xf32> to vector<4x16x128xf32>
    %50 = arith.truncf %49 : vector<4x16x128xf32> to vector<4x16x128xbf16>
    %cst_17 = arith.constant dense<0.000000e+00> : vector<4x16x16xf32>
    %51 = tpu.matmul %44, %47, %cst_17 {dimension_numbers = #tpu.dot_dimension_numbers<[2], [2], [1], [1], [0, 0, 0, 1, 1, 1], [0], [0]>} : vector<4x16x128xbf16>, vector<4x16x128xbf16>, vector<4x16x16xf32> -> vector<4x16x16xf32>
    %cst_18 = arith.constant 0.0883883461 : f32
    %52 = vector.broadcast %cst_18 : f32 to vector<4x16x16xf32>
    %53 = arith.mulf %51, %52 : vector<4x16x16xf32>
    %c0_19 = arith.constant 0 : index
    %c0_20 = arith.constant 0 : index
    %54 = vector.load %arg4[%c0_19, %c0_20] : memref<16x16xf32, #tpu.memory_space<vmem>>, vector<16x16xf32>
    %55 = vector.shape_cast %54 : vector<16x16xf32> to vector<1x16x16xf32>
    %56 = vector.broadcast %55 : vector<1x16x16xf32> to vector<4x16x16xf32>
    %57 = arith.addf %53, %56 : vector<4x16x16xf32>
    %cst_21 = arith.constant dense<0xFF800000> : vector<4x16xf32>
    %58 = vector.multi_reduction <maximumf>, %57, %cst_21 [2] : vector<4x16x16xf32> to vector<4x16xf32>
    %59 = vector.shape_cast %58 : vector<4x16xf32> to vector<4x16x1xf32>
    %60 = vector.broadcast %59 : vector<4x16x1xf32> to vector<4x16x16xf32>
    %61 = arith.subf %57, %60 : vector<4x16x16xf32>
    %62 = math.exp %61 : vector<4x16x16xf32>
    %cst_22 = arith.constant dense<0.000000e+00> : vector<4x16xf32>
    %63 = vector.multi_reduction <add>, %62, %cst_22 [2] : vector<4x16x16xf32> to vector<4x16xf32>
    %64 = vector.shape_cast %63 : vector<4x16xf32> to vector<4x16x1xf32>
    %65 = tpu.reciprocal %64 {approx = true} : vector<4x16x1xf32> -> vector<4x16x1xf32>
    %66 = vector.broadcast %65 : vector<4x16x1xf32> to vector<4x16x16xf32>
    %67 = arith.mulf %62, %66 : vector<4x16x16xf32>
    %68 = arith.truncf %67 : vector<4x16x16xf32> to vector<4x16x16xbf16>
    %cst_23 = arith.constant dense<0.000000e+00> : vector<4x16x128xf32>
    %69 = tpu.matmul %68, %50, %cst_23 {dimension_numbers = #tpu.dot_dimension_numbers<[2], [1], [1], [2], [0, 0, 0, 1, 1, 2], [0], [0]>} : vector<4x16x16xbf16>, vector<4x16x128xbf16>, vector<4x16x128xf32> -> vector<4x16x128xf32>
    %70 = vector.shape_cast %69 : vector<4x16x128xf32> to vector<64x128xf32>
    %71 = arith.truncf %70 : vector<64x128xf32> to vector<64x128xbf16>
    %c0_24 = arith.constant 0 : index
    %c0_25 = arith.constant 0 : index
    %72 = vector.load %arg8[%c0_24, %c0_25] : memref<128x128xbf16, #tpu.memory_space<vmem>>, vector<128x128xbf16>
    %cst_26 = arith.constant dense<0.000000e+00> : vector<64x128xf32>
    %73 = tpu.matmul %71, %72, %cst_26 {dimension_numbers = #tpu.dot_dimension_numbers<[1], [0], [0], [1], [0, 0, 1, 1], [], []>} : vector<64x128xbf16>, vector<128x128xbf16>, vector<64x128xf32> -> vector<64x128xf32>
    %c0_27 = arith.constant 0 : index
    %c0_28 = arith.constant 0 : index
    %74 = vector.load %arg9[%c0_27, %c0_28] : memref<1x128xf32, #tpu.memory_space<vmem>>, vector<1x128xf32>
    %75 = vector.broadcast %74 : vector<1x128xf32> to vector<64x128xf32>
    %76 = arith.addf %73, %75 : vector<64x128xf32>
    %77 = arith.addf %14, %76 : vector<64x128xf32>
    %c0_29 = arith.constant 0 : index
    %c0_30 = arith.constant 0 : index
    %78 = vector.load %arg10[%c0_29, %c0_30] : memref<1x128xf32, #tpu.memory_space<vmem>>, vector<1x128xf32>
    %c0_31 = arith.constant 0 : index
    %c0_32 = arith.constant 0 : index
    %79 = vector.load %arg11[%c0_31, %c0_32] : memref<1x128xf32, #tpu.memory_space<vmem>>, vector<1x128xf32>
    %cst_33 = arith.constant dense<0.000000e+00> : vector<64xf32>
    %80 = vector.multi_reduction <add>, %77, %cst_33 [1] : vector<64x128xf32> to vector<64xf32>
    %81 = vector.shape_cast %80 : vector<64xf32> to vector<64x1xf32>
    %cst_34 = arith.constant 1.280000e+02 : f32
    %82 = vector.broadcast %cst_34 : f32 to vector<64x1xf32>
    %83 = arith.divf %81, %82 : vector<64x1xf32>
    %84 = vector.broadcast %83 : vector<64x1xf32> to vector<64x128xf32>
    %85 = arith.subf %77, %84 : vector<64x128xf32>
    %86 = arith.mulf %85, %85 : vector<64x128xf32>
    %cst_35 = arith.constant dense<0.000000e+00> : vector<64xf32>
    %87 = vector.multi_reduction <add>, %86, %cst_35 [1] : vector<64x128xf32> to vector<64xf32>
    %88 = vector.shape_cast %87 : vector<64xf32> to vector<64x1xf32>
    %cst_36 = arith.constant 1.280000e+02 : f32
    %89 = vector.broadcast %cst_36 : f32 to vector<64x1xf32>
    %90 = arith.divf %88, %89 : vector<64x1xf32>
    %91 = vector.broadcast %83 : vector<64x1xf32> to vector<64x128xf32>
    %92 = arith.subf %77, %91 : vector<64x128xf32>
    %cst_37 = arith.constant 9.99999974E-6 : f32
    %93 = vector.broadcast %cst_37 : f32 to vector<64x1xf32>
    %94 = arith.addf %90, %93 : vector<64x1xf32>
    %95 = math.rsqrt %94 : vector<64x1xf32>
    %96 = vector.broadcast %95 : vector<64x1xf32> to vector<64x128xf32>
    %97 = arith.mulf %92, %96 : vector<64x128xf32>
    %98 = vector.broadcast %78 : vector<1x128xf32> to vector<64x128xf32>
    %99 = arith.mulf %97, %98 : vector<64x128xf32>
    %100 = vector.broadcast %79 : vector<1x128xf32> to vector<64x128xf32>
    %101 = arith.addf %99, %100 : vector<64x128xf32>
    %102 = arith.truncf %101 : vector<64x128xf32> to vector<64x128xbf16>
    %c0_38 = arith.constant 0 : index
    %c0_39 = arith.constant 0 : index
    %103 = vector.load %arg12[%c0_38, %c0_39] : memref<128x512xbf16, #tpu.memory_space<vmem>>, vector<128x512xbf16>
    %cst_40 = arith.constant dense<0.000000e+00> : vector<64x512xf32>
    %104 = tpu.matmul %102, %103, %cst_40 {dimension_numbers = #tpu.dot_dimension_numbers<[1], [0], [0], [1], [0, 0, 1, 1], [], []>} : vector<64x128xbf16>, vector<128x512xbf16>, vector<64x512xf32> -> vector<64x512xf32>
    %c0_41 = arith.constant 0 : index
    %c0_42 = arith.constant 0 : index
    %105 = vector.load %arg13[%c0_41, %c0_42] : memref<1x512xf32, #tpu.memory_space<vmem>>, vector<1x512xf32>
    %106 = vector.broadcast %105 : vector<1x512xf32> to vector<64x512xf32>
    %107 = arith.addf %104, %106 : vector<64x512xf32>
    %cst_43 = arith.constant 0.000000e+00 : f32
    %108 = vector.broadcast %cst_43 : f32 to vector<64x512xf32>
    %109 = arith.maximumf %107, %108 : vector<64x512xf32>
    %110 = arith.truncf %109 : vector<64x512xf32> to vector<64x512xbf16>
    %c0_44 = arith.constant 0 : index
    %c0_45 = arith.constant 0 : index
    %111 = vector.load %arg14[%c0_44, %c0_45] : memref<512x128xbf16, #tpu.memory_space<vmem>>, vector<512x128xbf16>
    %cst_46 = arith.constant dense<0.000000e+00> : vector<64x128xf32>
    %112 = tpu.matmul %110, %111, %cst_46 {dimension_numbers = #tpu.dot_dimension_numbers<[1], [0], [0], [1], [0, 0, 1, 1], [], []>} : vector<64x512xbf16>, vector<512x128xbf16>, vector<64x128xf32> -> vector<64x128xf32>
    %c0_47 = arith.constant 0 : index
    %c0_48 = arith.constant 0 : index
    %113 = vector.load %arg15[%c0_47, %c0_48] : memref<1x128xf32, #tpu.memory_space<vmem>>, vector<1x128xf32>
    %114 = vector.broadcast %113 : vector<1x128xf32> to vector<64x128xf32>
    %115 = arith.addf %112, %114 : vector<64x128xf32>
    %116 = arith.addf %77, %115 : vector<64x128xf32>
    %117 = vector.shape_cast %116 : vector<64x128xf32> to vector<4x16x128xf32>
    %c0_49 = arith.constant 0 : index
    %c0_50 = arith.constant 0 : index
    %c0_51 = arith.constant 0 : index
    %118 = vector.load %arg16[%c0_49, %c0_50, %c0_51] : memref<4x16x128xf32, #tpu.memory_space<vmem>>, vector<4x16x128xf32>
    tpu.vector_store %arg16[%c0_49, %c0_50, %c0_51], %117 {strides = array<i32>} : memref<4x16x128xf32, #tpu.memory_space<vmem>>, vector<4x16x128xf32>,
    return
  }
  func.func @transform_0(%arg0: i32) -> (i32, i32) {
    %c0_i32 = arith.constant 0 : i32
    %c0_i32_0 = arith.constant 0 : i32
    return %arg0, %c0_i32 : i32, i32
  }
  func.func @transform_1(%arg0: i32) -> (i32, i32) {
    %c0_i32 = arith.constant 0 : i32
    %c0_i32_0 = arith.constant 0 : i32
    %c0_i32_1 = arith.constant 0 : i32
    return %c0_i32, %c0_i32_0 : i32, i32
  }
  func.func @transform_2(%arg0: i32) -> (i32, i32) {
    %c0_i32 = arith.constant 0 : i32
    %c0_i32_0 = arith.constant 0 : i32
    %c0_i32_1 = arith.constant 0 : i32
    return %c0_i32, %c0_i32_0 : i32, i32
  }
  func.func @transform_3(%arg0: i32) -> (i32, i32) {
    %c0_i32 = arith.constant 0 : i32
    %c0_i32_0 = arith.constant 0 : i32
    %c0_i32_1 = arith.constant 0 : i32
    return %c0_i32, %c0_i32_0 : i32, i32
  }
  func.func @transform_4(%arg0: i32) -> (i32, i32) {
    %c0_i32 = arith.constant 0 : i32
    %c0_i32_0 = arith.constant 0 : i32
    %c0_i32_1 = arith.constant 0 : i32
    return %c0_i32, %c0_i32_0 : i32, i32
  }
  func.func @transform_5(%arg0: i32) -> (i32, i32) {
    %c0_i32 = arith.constant 0 : i32
    %c0_i32_0 = arith.constant 0 : i32
    %c0_i32_1 = arith.constant 0 : i32
    return %c0_i32, %c0_i32_0 : i32, i32
  }
  func.func @transform_6(%arg0: i32) -> (i32, i32) {
    %c0_i32 = arith.constant 0 : i32
    %c0_i32_0 = arith.constant 0 : i32
    %c0_i32_1 = arith.constant 0 : i32
    return %c0_i32, %c0_i32_0 : i32, i32
  }
  func.func @transform_7(%arg0: i32) -> (i32, i32) {
    %c0_i32 = arith.constant 0 : i32
    %c0_i32_0 = arith.constant 0 : i32
    %c0_i32_1 = arith.constant 0 : i32
    return %c0_i32, %c0_i32_0 : i32, i32
  }
  func.func @transform_8(%arg0: i32) -> (i32, i32) {
    %c0_i32 = arith.constant 0 : i32
    %c0_i32_0 = arith.constant 0 : i32
    %c0_i32_1 = arith.constant 0 : i32
    return %c0_i32, %c0_i32_0 : i32, i32
  }
  func.func @transform_9(%arg0: i32) -> (i32, i32) {
    %c0_i32 = arith.constant 0 : i32
    %c0_i32_0 = arith.constant 0 : i32
    %c0_i32_1 = arith.constant 0 : i32
    return %c0_i32, %c0_i32_0 : i32, i32
  }
  func.func @transform_10(%arg0: i32) -> (i32, i32) {
    %c0_i32 = arith.constant 0 : i32
    %c0_i32_0 = arith.constant 0 : i32
    %c0_i32_1 = arith.constant 0 : i32
    return %c0_i32, %c0_i32_0 : i32, i32
  }
  func.func @transform_11(%arg0: i32) -> (i32, i32) {
    %c0_i32 = arith.constant 0 : i32
    %c0_i32_0 = arith.constant 0 : i32
    %c0_i32_1 = arith.constant 0 : i32
    return %c0_i32, %c0_i32_0 : i32, i32
  }
  func.func @transform_12(%arg0: i32) -> (i32, i32) {
    %c0_i32 = arith.constant 0 : i32
    %c0_i32_0 = arith.constant 0 : i32
    %c0_i32_1 = arith.constant 0 : i32
    return %c0_i32, %c0_i32_0 : i32, i32
  }
  func.func @transform_13(%arg0: i32) -> (i32, i32) {
    %c0_i32 = arith.constant 0 : i32
    %c0_i32_0 = arith.constant 0 : i32
    %c0_i32_1 = arith.constant 0 : i32
    return %c0_i32, %c0_i32_0 : i32, i32
  }
  func.func @transform_14(%arg0: i32) -> (i32, i32) {
    %c0_i32 = arith.constant 0 : i32
    %c0_i32_0 = arith.constant 0 : i32
    %c0_i32_1 = arith.constant 0 : i32
    return %c0_i32, %c0_i32_0 : i32, i32
  }
  func.func @transform_15(%arg0: i32) -> (i32, i32, i32) {
    %c0_i32 = arith.constant 0 : i32
    %c0_i32_0 = arith.constant 0 : i32
    %c0_i32_1 = arith.constant 0 : i32
    return %arg0, %c0_i32, %c0_i32_0 : i32, i32, i32
  }
}

</mosaic_0001>

<bundles_post_ra>
// kernel: encoder_forward.1
= control target key start
LH: loop header
LB: loop body
LE: loop exit
PB: predicated region body
PF: predicated region fallthrough
CT: control target
= control target key end

     0   :  { %v2816_v2 = vmov 0   ;;  %s3580_s0 = inlined_call_operand.vmem [shape: s32[64,1], index: 0, kind: input, shape index: {}]   ;;  %s3581_s1 = inlined_call_operand.vmem [shape: f32[16,128], index: 1, kind: input, shape index: {}]   ;;  %s3582_s2 = inlined_call_operand.vmem [shape: f32[16,128], index: 2, kind: input, shape index: {}]   ;;  %s3583_s3 = inlined_call_operand.vmem [shape: f32[16,16], index: 3, kind: input, shape index: {}]   ;;  %s3584_s4 = inlined_call_operand.vmem [shape: f32[1,128], index: 4, kind: input, shape index: {}]   ;;  %s3585_s5 = inlined_call_operand.vmem [shape: f32[1,128], index: 5, kind: input, shape index: {}]   ;;  %s3586_s6 = inlined_call_operand.vmem [shape: bf16[128,384], index: 6, kind: input, shape index: {}]   ;;  %s3587_s7 = inlined_call_operand.vmem [shape: bf16[128,128], index: 7, kind: input, shape index: {}]   ;;  %s3588_s8 = inlined_call_operand.vmem [shape: f32[1,128], index: 8, kind: input, shape index: {}]   ;;  %s3589_s9 = inlined_call_operand.vmem [shape: f32[1,128], index: 9, kind: input, shape index: {}]   ;;  %s3590_s10 = inlined_call_operand.vmem [shape: f32[1,128], index: 10, kind: input, shape index: {}]   ;;  %s3591_s11 = inlined_call_operand.vmem [shape: bf16[128,512], index: 11, kind: input, shape index: {}]   ;;  %s3592_s12 = inlined_call_operand.vmem [shape: f32[1,512], index: 12, kind: input, shape index: {}]   ;;  %s3593_s13 = inlined_call_operand.vmem [shape: bf16[512,128], index: 13, kind: input, shape index: {}]   ;;  %s3594_s14 = inlined_call_operand.vmem [shape: f32[1,128], index: 14, kind: input, shape index: {}]   ;;  %s3595_s15 = inlined_call_operand.hbm [shape: f32[4,16,128], index: 15, kind: output, shape index: {}]  }
   0x1   :  { %v54_v0 = vld [vmem:[%s3580_s0 + $0x10] sm:$0xff]  ;;  %v52_v1 = vld [vmem:[%s3580_s0] sm:$0xff]  ;;  %2609 = vset.pattern.permute.xlu1 %v2816_v2  ;;  %2608 = vset.pattern.permute.xlu0 %v2816_v2  ;;  %v55_v3 = vld [vmem:[%s3580_s0 + $0x18] sm:$0xff] }
   0x2   :  { %69 = vperm.xlu1 %2609, %v54_v0   ;;  %63 = vperm.xlu0 %2608, %v52_v1   ;;  %v53_v4 = vld [vmem:[%s3580_s0 + $0x8] sm:$0xff]  ;;  %v110_v6 = vld [vmem:[%s3581_s1] sm:$0xff]  ;;  %v59_v9 = vld [vmem:[%s3580_s0 + $0x38] sm:$0xff] }
   0x3   :  { %v111_v5 = vld [vmem:[%s3581_s1 + $0x8] sm:$0xff]  ;;  %567 = vmatprep.mubr.bf16.mxu1 %v2816_v2  ;;  %v56_v8 = vld [vmem:[%s3580_s0 + $0x20] sm:$0xff]  ;;  %v58_v10 = vld [vmem:[%s3580_s0 + $0x30] sm:$0xff] }
   0x4   :  { %2490 = vmatprep.subr.mxu0 %v111_v5  ;;  %v57_v7 = vld [vmem:[%s3580_s0 + $0x28] sm:$0xff] }
   0x5   :  { %2491 = vmatpush3.msra.mxu0 %v111_v5 }
   0x6   :  { %2492 = vmatprep.subr.mxu0 %v110_v6  ;;  %72 = vperm.xlu1 %2609, %v55_v3  }
   0x7   :  { %66 = vperm.xlu0 %2608, %v53_v4   ;;  %2493 = vmatpush3.msra.mxu0 %v110_v6 }
   0xa   :  { %78 = vperm.xlu1 %2609, %v57_v7  }
   0xb   :  { %75 = vperm.xlu0 %2608, %v56_v8  }
   0xe   :  { %84 = vperm.xlu1 %2609, %v59_v9  }
   0xf   :  { %81 = vperm.xlu0 %2608, %v58_v10  }
  0x10   :  { %20 = vsyncpa [#allocation3], 0  ;;  %v60_v11 = vlaneseq  ;;  %vm112_vm0 = vcmask 130048   ;;  %v2817_v15 = vmov 0.0   ;;  %v243_v30 = vld [vmem:[%s3582_s2 + $0x8] sm:$0xff]  ;;  %v242_v32 = vld [vmem:[%s3582_s2] sm:$0xff] }
  0x11   :  { %v2610_v48 = vld [vmem:[%s3586_s6 + $0xac] ss:$12 sps:$4 sm:$0xff]   ;;  %v2612_v49 = vld [vmem:[%s3586_s6 + $0xa8] ss:$12 sps:$4 sm:$0xff]   ;;  %vm2818_vm9 = vmmov 0  }
  0x12   :  { %v61_v12 = vand.u32 127, %v60_v11  ;;  %535 = vmatprep.subr.bf16.mxu1 %v2610_v48  ;;  %v2639_v48 = vld [vmem:[%s3586_s6] ss:$12 sps:$4 sm:$0xff]  }
  0x13   :  { %536 = vmatpush1.bf16.msra.mxu1 %v2612_v49  ;;  %v2640_v49 = vld [vmem:[%s3586_s6 + $0x20] ss:$12 sps:$4 sm:$0xff]  }
  0x7d   :  { %v70_v13 = vpop.permute.xlu1 %69  ;;  %v64_v14 = vpop.permute.xlu0 %63 }
  0x7e   :  { %vm86_vm1 = vcmp.eq.s32.totalorder %v64_v14, %v61_v12  ;;  %vm88_vm2 = vcmp.eq.s32.totalorder %v70_v13, %v61_v12  ;;  %v2615_v13 = vld [vmem:[%s3586_s6 + $0x90] ss:$12 sps:$4 sm:$0xff]  }
  0x7f   :  { %v2238_v16 = vsel %vm86_vm1, 1.0, %v2817_v15  ;;  %v2240_v19 = vsel %vm88_vm2, 1.0, %v2817_v15 }
  0x80   :  { %2494 = vmatprep.mubr.msk.f32.mxu0 %vm112_vm0, %v2238_v16 }
  0x81   :  { %v73_v17 = vpop.permute.xlu1 %72 }
  0x82   :  { %v67_v18 = vpop.permute.xlu0 %66  ;;  %vm89_vm4 = vcmp.eq.s32.totalorder %v73_v17, %v61_v12 }
  0x83   :  { %vm87_vm3 = vcmp.eq.s32.totalorder %v67_v18, %v61_v12  ;;  %v2241_v23 = vsel %vm89_vm4, 1.0, %v2817_v15 }
  0x84   :  { %v2239_v20 = vsel %vm87_vm3, 1.0, %v2817_v15 }
  0x85   :  { %2495 = vmatmul.mubr.msk.f32.vlgmr.msra.gmra.mxu0 %vm112_vm0, %v2239_v20  ;;  %v79_v21 = vpop.permute.xlu1 %78 }
  0x86   :  { %v76_v22 = vpop.permute.xlu0 %75  ;;  %2497 = vmatprep.mubr.msk.f32.mxu0 %vm112_vm0, %v2240_v19  ;;  %vm91_vm6 = vcmp.eq.s32.totalorder %v79_v21, %v61_v12  ;;  %v2616_v21 = vld [vmem:[%s3586_s6 + $0x7c] ss:$12 sps:$4 sm:$0xff]  }
  0x87   :  { %vm90_vm5 = vcmp.eq.s32.totalorder %v76_v22, %v61_v12  ;;  %v2243_v27 = vsel %vm91_vm6, 1.0, %v2817_v15  ;;  %v2618_v22 = vld [vmem:[%s3586_s6 + $0xb0] ss:$12 sps:$4 sm:$0xff]  }
  0x88   :  { %v2242_v24 = vsel %vm90_vm5, 1.0, %v2817_v15  ;;  %2506 = vmatprep.subr.bf16.mxu0 %v2618_v22 }
  0x89   :  { %2498 = vmatmul.mubr.msk.f32.gmra.mxu0 %vm112_vm0, %v2241_v23  ;;  %v85_v25 = vpop.permute.xlu1 %84  ;;  %v2619_v23 = vld [vmem:[%s3586_s6 + $0x78] ss:$12 sps:$4 sm:$0xff]  }
  0x8a   :  { %2500 = vmatprep.mubr.msk.f32.mxu0 %vm112_vm0, %v2242_v24  ;;  %v82_v26 = vpop.permute.xlu0 %81  ;;  %vm93_vm8 = vcmp.eq.s32.totalorder %v85_v25, %v61_v12  ;;  %2507 = vmatpush3.bf16.msra.mxu0 %v2618_v22 }
  0x8b   :  { %vm92_vm7 = vcmp.eq.s32.totalorder %v82_v26, %v61_v12  ;;  %v2245_v29 = vsel %vm93_vm8, 1.0, %v2817_v15  ;;  %v2613_v12 = vld [vmem:[%s3586_s6 + $0x94] ss:$12 sps:$4 sm:$0xff]   ;;  %v2620_v26 = vld [vmem:[%s3586_s6 + $0x64] ss:$12 sps:$4 sm:$0xff]  }
  0x8c   :  { %v2244_v28 = vsel %vm92_vm7, 1.0, %v2817_v15  ;;  %537 = vmatprep.subr.bf16.mxu1 %v2613_v12 }
  0x8d   :  { %2501 = vmatmul.mubr.msk.f32.gmra.mxu0 %vm112_vm0, %v2243_v27  ;;  %538 = vmatpush1.bf16.msra.mxu1 %v2615_v13  ;;  %v2622_v27 = vld [vmem:[%s3586_s6 + $0x98] ss:$12 sps:$4 sm:$0xff]  }
  0x8e   :  { %2503 = vmatprep.mubr.msk.f32.mxu0 %vm112_vm0, %v2244_v28  ;;  %539 = vmatprep.subr.bf16.mxu1 %v2616_v21  ;;  %v2623_v28 = vld [vmem:[%s3586_s6 + $0x60] ss:$12 sps:$4 sm:$0xff]  }
  0x8f   :  { %2508 = vmatprep.subr.bf16.mxu0 %v2622_v27 }
  0x90   :  { %2509 = vmatpush3.bf16.msra.mxu0 %v2622_v27 }
  0x91   :  { %2504 = vmatmul.mubr.msk.f32.gmra.mxu0 %vm112_vm0, %v2245_v29  ;;  %540 = vmatpush1.bf16.msra.mxu1 %v2619_v23  ;;  %v2624_v29 = vld [vmem:[%s3586_s6 + $0x4c] ss:$12 sps:$4 sm:$0xff]  }
  0x92   :  { %541 = vmatprep.subr.bf16.mxu1 %v2620_v26 }
  0x95   :  { %542 = vmatpush1.bf16.msra.mxu1 %v2623_v28  ;;  %v2255_v28 = vld [vmem:[%s3585_s5] ss:$0 sm:$0xff] }
  0x96   :  { %543 = vmatprep.subr.bf16.mxu1 %v2624_v29 }
 0x145   :  { %v2496_v31 = vpop.f32.mrf.mxu0 }
 0x146   :  { %v2958_v33 = vadd.f32 %v2496_v31, %v243_v30  ;;  %v2627_v31 = vld [vmem:[%s3586_s6 + $0x48] ss:$12 sps:$4 sm:$0xff]  }
 0x147   :  { %v203_v34 = vpop.f32.mrf.mxu0  ;;  %544 = vmatpush1.bf16.msra.mxu1 %v2627_v31 }
 0x148   :  { %v2960_v35 = vadd.f32 %v242_v32, %v203_v34  ;;  %256 = vadd.xlane.f32.xlu1 %v2958_v33  ;;  %v2630_v34 = vld [vmem:[%s3586_s6 + $0x68] ss:$12 sps:$4 sm:$0xff]  }
 0x149   :  { %v2499_v36 = vpop.f32.mrf.mxu0 }
 0x14a   :  { %254 = vadd.xlane.f32.xlu0 %v2960_v35  ;;  %v2967_v41 = vadd.f32 %v2499_v36, %v243_v30  ;;  %v2631_v36 = vld [vmem:[%s3586_s6 + $0x30] ss:$12 sps:$4 sm:$0xff]  }
 0x14b   :  { %v213_v37 = vpop.f32.mrf.mxu0 }
 0x14c   :  { %v2964_v38 = vadd.f32 %v242_v32, %v213_v37  ;;  %v2632_v37 = vld [vmem:[%s3586_s6 + $0x1c] ss:$12 sps:$4 sm:$0xff]  }
 0x14d   :  { %v2502_v39 = vpop.f32.mrf.mxu0 }
 0x14e   :  { %258 = vadd.xlane.f32.xlu0 %v2964_v38  ;;  %v2973_v45 = vadd.f32 %v2502_v39, %v243_v30  ;;  %v2634_v39 = vld [vmem:[%s3586_s6 + $0x50] ss:$12 sps:$4 sm:$0xff]  }
 0x14f   :  { %v223_v40 = vpop.f32.mrf.mxu0 }
 0x150   :  { %v2969_v42 = vadd.f32 %v242_v32, %v223_v40  ;;  %v2635_v40 = vld [vmem:[%s3586_s6 + $0x18] ss:$12 sps:$4 sm:$0xff]  }
 0x151   :  { %v2505_v43 = vpop.f32.mrf.mxu0 }
 0x152   :  { %260 = vadd.xlane.f32.xlu0 %v2967_v41  ;;  %262 = vadd.xlane.f32.xlu1 %v2969_v42  ;;  %v2979_v47 = vadd.f32 %v2505_v43, %v243_v30  ;;  %v2626_v30 = vld [vmem:[%s3586_s6 + $0x80] ss:$12 sps:$4 sm:$0xff]   ;;  %v2636_v43 = vld [vmem:[%s3586_s6 + $0x4] ss:$12 sps:$4 sm:$0xff]  }
 0x153   :  { %v233_v44 = vpop.f32.mrf.mxu0  ;;  %2510 = vmatprep.subr.bf16.mxu0 %v2626_v30 }
 0x154   :  { %v2975_v46 = vadd.f32 %v242_v32, %v233_v44  ;;  %2511 = vmatpush3.bf16.msra.mxu0 %v2626_v30  ;;  %v2628_v32 = vld [vmem:[%s3586_s6 + $0x34] ss:$12 sps:$4 sm:$0xff]   ;;  %v2638_v44 = vld [vmem:[%s3586_s6 + $0x38] ss:$12 sps:$4 sm:$0xff]  }
 0x155   :  { %545 = vmatprep.subr.bf16.mxu1 %v2628_v32  ;;  %2512 = vmatprep.subr.bf16.mxu0 %v2630_v34 }
 0x156   :  { %264 = vadd.xlane.f32.xlu0 %v2973_v45  ;;  %266 = vadd.xlane.f32.xlu1 %v2975_v46 }
 0x157   :  { %546 = vmatpush1.bf16.msra.mxu1 %v2631_v36 }
 0x158   :  { %2513 = vmatpush3.bf16.msra.mxu0 %v2630_v34  ;;  %547 = vmatprep.subr.bf16.mxu1 %v2632_v37 }
 0x159   :  { %2514 = vmatprep.subr.bf16.mxu0 %v2634_v39 }
 0x15a   :  { %268 = vadd.xlane.f32.xlu0 %v2979_v47 }
 0x15b   :  { %548 = vmatpush1.bf16.msra.mxu1 %v2635_v40 }
 0x15c   :  { %2515 = vmatpush3.bf16.msra.mxu0 %v2634_v39  ;;  %549 = vmatprep.subr.bf16.mxu1 %v2636_v43 }
 0x15d   :  { %2516 = vmatprep.subr.bf16.mxu0 %v2638_v44 }
 0x15f   :  { %550 = vmatpush1.bf16.msra.mxu1 %v2639_v48 }
 0x160   :  { %2517 = vmatpush3.bf16.msra.mxu0 %v2638_v44  ;;  %2566 = vmatprep.subr.bf16.mxu1 %v2817_v15 }
 0x161   :  { %2518 = vmatprep.subr.bf16.mxu0 %v2640_v49 }
 0x164   :  { %2519 = vmatpush3.bf16.msra.mxu0 %v2640_v49 }
 0x1d1   :  { %v257_v50 = vpop.xlane.xlu1 %256 }
 0x1d2   :  { %v272_v51 = vmul.f32 0.0078125, %v257_v50  ;;  %v2641_v50 = vld [vmem:[%s3586_s6 + $0x8] ss:$12 sps:$4 sm:$0xff]  }
 0x1d3   :  { %v255_v52 = vpop.xlane.xlu0 %254  ;;  %2520 = vmatprep.subr.bf16.mxu0 %v2641_v50 }
 0x1d4   :  { %v2989_v53 = vsub.f32 %v2958_v33, %v272_v51  ;;  %v271_v54 = vmul.f32 0.0078125, %v255_v52  ;;  %2521 = vmatpush3.bf16.msra.mxu0 %v2641_v50 }
 0x1d5   :  { %2530 = vmatprep.subr.bf16.mxu0 %v2817_v15 }
 0x1d6   :  { %v2992_v55 = vsub.f32 %v2960_v35, %v271_v54  ;;  %v288_v56 = vmul.f32 %v2989_v53, %v2989_v53 }
 0x1d7   :  { %v259_v57 = vpop.xlane.xlu0 %258 }
 0x1d8   :  { %v273_v58 = vmul.f32 0.0078125, %v259_v57  ;;  %297 = vadd.xlane.f32.xlu0 %v288_v56  ;;  %v287_v59 = vmul.f32 %v2992_v55, %v2992_v55 }
 0x1da   :  { %v2999_v60 = vsub.f32 %v2964_v38, %v273_v58  ;;  %295 = vadd.xlane.f32.xlu1 %v287_v59 }
 0x1db   :  { %v263_v61 = vpop.xlane.xlu1 %262  ;;  %v261_v62 = vpop.xlane.xlu0 %260 }
 0x1dc   :  { %v275_v63 = vmul.f32 0.0078125, %v263_v61  ;;  %v274_v0 = vmul.f32 0.0078125, %v261_v62  ;;  %v289_v1 = vmul.f32 %v2999_v60, %v2999_v60 }
 0x1de   :  { %v3004_v3 = vsub.f32 %v2969_v42, %v275_v63  ;;  %v3007_v4 = vsub.f32 %v2967_v41, %v274_v0  ;;  %299 = vadd.xlane.f32.xlu1 %v289_v1 }
 0x1df   :  { %v267_v5 = vpop.xlane.xlu1 %266  ;;  %v265_v6 = vpop.xlane.xlu0 %264 }
 0x1e0   :  { %v277_v7 = vmul.f32 0.0078125, %v267_v5  ;;  %v276_v8 = vmul.f32 0.0078125, %v265_v6  ;;  %v291_v9 = vmul.f32 %v3004_v3, %v3004_v3  ;;  %v290_v10 = vmul.f32 %v3007_v4, %v3007_v4 }
 0x1e2   :  { %v3020_v14 = vsub.f32 %v2975_v46, %v277_v7  ;;  %v3023_v16 = vsub.f32 %v2973_v45, %v276_v8  ;;  %303 = vadd.xlane.f32.xlu1 %v291_v9  ;;  %301 = vadd.xlane.f32.xlu0 %v290_v10 }
 0x1e3   :  { %v269_v17 = vpop.xlane.xlu0 %268 }
 0x1e4   :  { %v278_v18 = vmul.f32 0.0078125, %v269_v17  ;;  %v293_v19 = vmul.f32 %v3020_v14, %v3020_v14  ;;  %v292_v20 = vmul.f32 %v3023_v16, %v3023_v16 }
 0x1e6   :  { %v3039_v24 = vsub.f32 %v2979_v47, %v278_v18  ;;  %307 = vadd.xlane.f32.xlu1 %v293_v19  ;;  %305 = vadd.xlane.f32.xlu0 %v292_v20  ;;  %v2254_v20 = vld [vmem:[%s3584_s4] ss:$0 sm:$0xff] }
 0x1e8   :  { %v294_v25 = vmul.f32 %v3039_v24, %v3039_v24 }
 0x1ea   :  { %309 = vadd.xlane.f32.xlu0 %v294_v25 }
 0x261   :  { %v298_v51 = vpop.xlane.xlu0 %297 }
 0x262   :  { %v312_v52 = vmul.f32 0.0078125, %v298_v51 }
 0x263   :  { %v296_v54 = vpop.xlane.xlu1 %295 }
 0x264   :  { %v320_v56 = vadd.f32 1e-05, %v312_v52  ;;  %v311_v57 = vmul.f32 0.0078125, %v296_v54 }
 0x266   :  { %2730 = vrsqrt.f32 %v320_v56  ;;  %v319_v58 = vadd.f32 1e-05, %v311_v57 }
 0x267   :  { %v300_v59 = vpop.xlane.xlu1 %299 }
 0x268   :  { %2732 = vrsqrt.f32 %v319_v58  ;;  %v313_v61 = vmul.f32 0.0078125, %v300_v59 }
 0x26a   :  { %v321_v62 = vadd.f32 1e-05, %v313_v61 }
 0x26b   :  { %v304_v63 = vpop.xlane.xlu1 %303  ;;  %v302_v0 = vpop.xlane.xlu0 %301 }
 0x26c   :  { %2734 = vrsqrt.f32 %v321_v62  ;;  %v315_v1 = vmul.f32 0.0078125, %v304_v63  ;;  %v314_v5 = vmul.f32 0.0078125, %v302_v0 }
 0x26e   :  { %v323_v6 = vadd.f32 1e-05, %v315_v1  ;;  %v322_v7 = vadd.f32 1e-05, %v314_v5 }
 0x26f   :  { %v308_v8 = vpop.xlane.xlu1 %307  ;;  %v306_v9 = vpop.xlane.xlu0 %305 }
 0x270   :  { %2736 = vrsqrt.f32 %v323_v6  ;;  %v317_v10 = vmul.f32 0.0078125, %v308_v8  ;;  %v316_v12 = vmul.f32 0.0078125, %v306_v9 }
 0x271   :  { %2738 = vrsqrt.f32 %v322_v7 }
 0x272   :  { %v325_v13 = vadd.f32 1e-05, %v317_v10  ;;  %v324_v17 = vadd.f32 1e-05, %v316_v12 }
 0x273   :  { %v2731_v18 = vpop.eup %2730  ;;  %v310_v19 = vpop.xlane.xlu0 %309 }
 0x274   :  { %2740 = vrsqrt.f32 %v325_v13  ;;  %v318_v21 = vmul.f32 0.0078125, %v310_v19  ;;  %v336_v22 = vmul.f32 %v2731_v18, %v2989_v53 }
 0x275   :  { %v2733_v23 = vpop.eup %2732  ;;  %2742 = vrsqrt.f32 %v324_v17 }
 0x276   :  { %v326_v25 = vadd.f32 1e-05, %v318_v21  ;;  %v335_v26 = vmul.f32 %v2733_v23, %v2992_v55  ;;  %v350_v27 = vmul.f32 %v2254_v20, %v336_v22 }
 0x278   :  { %2744 = vrsqrt.f32 %v326_v25  ;;  %v349_v29 = vmul.f32 %v2254_v20, %v335_v26  ;;  %v364_v32 = vadd.f32 %v2255_v28, %v350_v27 }
 0x279   :  { %v2735_v30 = vpop.eup %2734 }
 0x27a   :  { %v363_v31 = vadd.f32 %v2255_v28, %v349_v29  ;;  %v337_v34 = vmul.f32 %v2735_v30, %v2999_v60 }
 0x27c   :  { %v371_v36 = vpack.c.bf16 %v364_v32, %v363_v31  ;;  %v351_v39 = vmul.f32 %v2254_v20, %v337_v34 }
 0x27d   :  { %v2737_v37 = vpop.eup %2736 }
 0x27e   :  { %v2739_v53 = vpop.eup %2738  ;;  %568 = vmatmul.mubr.bf16.vlgmr.msra.gmra.mxu1 %v371_v36  ;;  %2522 = vmatprep.mubr.bf16.mxu0 %v371_v36  ;;  %v339_v40 = vmul.f32 %v2737_v37, %v3004_v3  ;;  %v365_v50 = vadd.f32 %v2255_v28, %v351_v39 }
 0x27f   :  { %577 = vmatprep.mubr.bf16.mxu1 %v2816_v2  ;;  %v338_v55 = vmul.f32 %v2739_v53, %v3007_v4 }
 0x280   :  { %v353_v52 = vmul.f32 %v2254_v20, %v339_v40 }
 0x281   :  { %v2741_v43 = vpop.eup %2740  ;;  %v352_v44 = vmul.f32 %v2254_v20, %v338_v55 }
 0x282   :  { %v2743_v48 = vpop.eup %2742  ;;  %v341_v49 = vmul.f32 %v2741_v43, %v3020_v14  ;;  %v367_v4 = vadd.f32 %v2255_v28, %v353_v52 }
 0x283   :  { %v366_v51 = vadd.f32 %v2255_v28, %v352_v44  ;;  %v340_v60 = vmul.f32 %v2743_v48, %v3023_v16 }
 0x284   :  { %v355_v59 = vmul.f32 %v2254_v20, %v341_v49 }
 0x285   :  { %v2745_v54 = vpop.eup %2744  ;;  %v372_v56 = vpack.c.bf16 %v366_v51, %v365_v50  ;;  %v354_v57 = vmul.f32 %v2254_v20, %v340_v60  ;;  %v857_v50 = vld [vmem:[%s3583_s3] sm:$0xff] }
 0x286   :  { %v342_v58 = vmul.f32 %v2745_v54, %v3039_v24  ;;  %v369_v14 = vadd.f32 %v2255_v28, %v355_v59 }
 0x287   :  { %578 = vmatmul.mubr.bf16.gmra.mxu1 %v372_v56  ;;  %2523 = vmatmul.mubr.bf16.vlgmr.msra.gmra.mxu0 %v372_v56  ;;  %v368_v3 = vadd.f32 %v2255_v28, %v354_v57  ;;  %v858_v56 = vld [vmem:[%s3583_s3 + $0x8] sm:$0xff] }
 0x288   :  { %587 = vmatprep.mubr.bf16.mxu1 %v2816_v2  ;;  %v356_v61 = vmul.f32 %v2254_v20, %v342_v58 }
 0x289   :  { %v373_v62 = vpack.c.bf16 %v368_v3, %v367_v4 }
 0x28a   :  { %v370_v63 = vadd.f32 %v2255_v28, %v356_v61 }
 0x28b   :  { %2526 = vmatprep.mubr.bf16.mxu0 %v373_v62 }
 0x28c   :  { %v374_v0 = vpack.c.bf16 %v370_v63, %v369_v14 }
 0x28f   :  { %588 = vmatmul.mubr.bf16.gmra.mxu1 %v373_v62  ;;  %2527 = vmatmul.mubr.bf16.gmra.mxu0 %v374_v0 }
 0x290   :  { %597 = vmatprep.mubr.bf16.mxu1 %v2816_v2  ;;  %2532 = vmatprep.mubr.msk.bf16.mxu0 %vm2818_vm9, %v2817_v15 }
 0x297   :  { %598 = vmatmul.mubr.bf16.gmra.mxu1 %v374_v0 }
 0x298   :  { %2568 = vmatprep.mubr.msk.bf16.mxu1 %vm2818_vm9, %v2817_v15 }
 0x33e   :  { %v569_v16 = vpop.f32.mrf.mxu1 }
 0x340   :  { %v571_v24 = vpop.f32.mrf.mxu1 }
 0x342   :  { %v573_v1 = vpop.f32.mrf.mxu1 }
 0x343   :  { %v673_v17 = vpack.c.bf16 %v573_v1, %v569_v16 }
 0x344   :  { %v575_v5 = vpop.f32.mrf.mxu1 }
 0x345   :  { %v677_v6 = vpack.c.bf16 %v575_v5, %v571_v24 }
 0x347   :  { %v579_v7 = vpop.f32.mrf.mxu1  ;;  %v3117_v8 = vpop.f32.mrf.mxu0  ;;  %2531 = vmatpush3.bf16.xpose.msra.mxu0 %v677_v6 }
 0x348   :  { %2536 = vmatprep.subr.bf16.mxu0 %v2817_v15 }
 0x349   :  { %v581_v9 = vpop.f32.mrf.mxu1  ;;  %v642_v10 = vpop.f32.mrf.mxu0 }
 0x34b   :  { %v583_v12 = vpop.f32.mrf.mxu1  ;;  %v3120_v13 = vpop.f32.mrf.mxu0 }
 0x34c   :  { %v682_v18 = vpack.c.bf16 %v3120_v13, %v3117_v8  ;;  %v674_v30 = vpack.c.bf16 %v583_v12, %v579_v7 }
 0x34d   :  { %v585_v19 = vpop.f32.mrf.mxu1  ;;  %v645_v20 = vpop.f32.mrf.mxu0 }
 0x34e   :  { %v678_v21 = vpack.c.bf16 %v585_v19, %v581_v9  ;;  %2533 = vmatmul.mubr.bf16.vlgmr.msra.gmra.mxu0 %v673_v17  ;;  %v681_v48 = vpack.c.bf16 %v645_v20, %v642_v10 }
 0x34f   :  { %v589_v22 = vpop.f32.mrf.mxu1  ;;  %v3124_v23 = vpop.f32.mrf.mxu0  ;;  %2538 = vmatprep.mubr.msk.bf16.mxu0 %vm2818_vm9, %v2817_v15 }
 0x350   :  { %2537 = vmatpush3.bf16.xpose.msra.mxu0 %v678_v21 }
 0x351   :  { %v591_v25 = vpop.f32.mrf.mxu1  ;;  %v658_v26 = vpop.f32.mrf.mxu0  ;;  %2542 = vmatprep.subr.bf16.mxu0 %v2817_v15 }
 0x353   :  { %v593_v27 = vpop.f32.mrf.mxu1  ;;  %v3129_v28 = vpop.f32.mrf.mxu0 }
 0x354   :  { %v684_v29 = vpack.c.bf16 %v3129_v28, %v3124_v23  ;;  %v675_v39 = vpack.c.bf16 %v593_v27, %v589_v22  ;;  %v2644_v23 = vld [vmem:[%s3587_s7 + $0x28] sm:$0xff]  }
 0x355   :  { %v595_v31 = vpop.f32.mrf.mxu1  ;;  %v661_v32 = vpop.f32.mrf.mxu0 }
 0x356   :  { %v679_v34 = vpack.c.bf16 %v595_v31, %v591_v25  ;;  %v683_v36 = vpack.c.bf16 %v661_v32, %v658_v26 }
 0x357   :  { %v599_v37 = vpop.f32.mrf.mxu1  ;;  %2539 = vmatmul.mubr.bf16.vlgmr.msra.gmra.mxu0 %v674_v30 }
 0x358   :  { %2543 = vmatpush3.bf16.xpose.msra.mxu0 %v679_v34  ;;  %2567 = vmatpush3.bf16.msra.mxu1 %v683_v36 }
 0x359   :  { %v601_v53 = vpop.f32.mrf.mxu1  ;;  %2544 = vmatprep.mubr.msk.bf16.mxu0 %vm2818_vm9, %v2817_v15  ;;  %2548 = vmatprep.subr.bf16.mxu0 %v2817_v15 }
 0x35b   :  { %v603_v55 = vpop.f32.mrf.mxu1 }
 0x35c   :  { %v676_v44 = vpack.c.bf16 %v603_v55, %v599_v37 }
 0x35d   :  { %v605_v40 = vpop.f32.mrf.mxu1 }
 0x35e   :  { %v680_v43 = vpack.c.bf16 %v605_v40, %v601_v53 }
 0x35f   :  { %2545 = vmatmul.mubr.bf16.vlgmr.msra.gmra.mxu0 %v675_v39 }
 0x360   :  { %2549 = vmatpush3.bf16.xpose.msra.mxu0 %v680_v43  ;;  %2550 = vmatprep.mubr.msk.bf16.mxu0 %vm2818_vm9, %v2817_v15 }
 0x361   :  { %2554 = vmatprep.subr.bf16.mxu0 %v2817_v15 }
 0x367   :  { %2551 = vmatmul.mubr.bf16.vlgmr.msra.gmra.mxu0 %v676_v44 }
 0x368   :  { %2555 = vmatpush3.bf16.msra.mxu0 %v681_v48  ;;  %2556 = vmatprep.mubr.msk.bf16.mxu0 %vm2818_vm9, %v2817_v15 }
 0x369   :  { %2560 = vmatprep.subr.bf16.mxu0 %v2817_v15 }
 0x40e   :  { %v719_v49 = vpop.f32.mrf.mxu0 }
 0x40f   :  { %v849_v51 = vmul.f32 0.088388346, %v719_v49 }
 0x410   :  { %v2534_v60 = vpop.f32.mrf.mxu0 }
 0x411   :  { %v859_v52 = vadd.f32 %v857_v50, %v849_v51 }
 0x412   :  { %v722_v54 = vpop.f32.mrf.mxu0 }
 0x413   :  { %v850_v57 = vmul.f32 0.088388346, %v722_v54  ;;  %v867_v58 = vsel %vm112_vm0, %v859_v52, -inf }
 0x414   :  { %868 = vmax.xlane.f32.xlu1 %v867_v58  ;;  %v2535_v59 = vpop.f32.mrf.mxu0 }
 0x415   :  { %v860_v4 = vadd.f32 %v858_v56, %v850_v57 }
 0x417   :  { %v760_v3 = vpop.f32.mrf.mxu0  ;;  %v870_v61 = vsel %vm112_vm0, %v860_v4, -inf }
 0x418   :  { %v851_v62 = vmul.f32 0.088388346, %v760_v3  ;;  %871 = vmax.xlane.f32.xlu0 %v870_v61 }
 0x419   :  { %v2540_v14 = vpop.f32.mrf.mxu0 }
 0x41a   :  { %v861_v63 = vadd.f32 %v857_v50, %v851_v62 }
 0x41b   :  { %v763_v0 = vpop.f32.mrf.mxu0 }
 0x41c   :  { %v852_v16 = vmul.f32 0.088388346, %v763_v0  ;;  %v873_v24 = vsel %vm112_vm0, %v861_v63, -inf }
 0x41d   :  { %874 = vmax.xlane.f32.xlu1 %v873_v24  ;;  %v2541_v1 = vpop.f32.mrf.mxu0 }
 0x41e   :  { %v862_v5 = vadd.f32 %v858_v56, %v852_v16 }
 0x41f   :  { %v801_v6 = vpop.f32.mrf.mxu0 }
 0x420   :  { %v853_v7 = vmul.f32 0.088388346, %v801_v6  ;;  %v876_v9 = vsel %vm112_vm0, %v862_v5, -inf }
 0x421   :  { %877 = vmax.xlane.f32.xlu0 %v876_v9  ;;  %v2546_v10 = vpop.f32.mrf.mxu0 }
 0x422   :  { %v863_v12 = vadd.f32 %v857_v50, %v853_v7 }
 0x423   :  { %v804_v17 = vpop.f32.mrf.mxu0 }
 0x424   :  { %v854_v19 = vmul.f32 0.088388346, %v804_v17  ;;  %v879_v20 = vsel %vm112_vm0, %v863_v12, -inf }
 0x425   :  { %880 = vmax.xlane.f32.xlu1 %v879_v20  ;;  %v2547_v21 = vpop.f32.mrf.mxu0 }
 0x426   :  { %v864_v22 = vadd.f32 %v858_v56, %v854_v19 }
 0x427   :  { %v842_v25 = vpop.f32.mrf.mxu0 }
 0x428   :  { %v855_v26 = vmul.f32 0.088388346, %v842_v25  ;;  %v882_v27 = vsel %vm112_vm0, %v864_v22, -inf }
 0x429   :  { %883 = vmax.xlane.f32.xlu0 %v882_v27  ;;  %v2552_v30 = vpop.f32.mrf.mxu0 }
 0x42a   :  { %v865_v31 = vadd.f32 %v857_v50, %v855_v26 }
 0x42b   :  { %v845_v32 = vpop.f32.mrf.mxu0 }
 0x42c   :  { %v856_v34 = vmul.f32 0.088388346, %v845_v32  ;;  %v885_v36 = vsel %vm112_vm0, %v865_v31, -inf }
 0x42d   :  { %886 = vmax.xlane.f32.xlu1 %v885_v36  ;;  %v2553_v37 = vpop.f32.mrf.mxu0 }
 0x42e   :  { %v866_v53 = vadd.f32 %v858_v56, %v856_v34 }
 0x430   :  { %v888_v55 = vsel %vm112_vm0, %v866_v53, -inf }
 0x431   :  { %889 = vmax.xlane.f32.xlu0 %v888_v55 }
 0x49d   :  { %v869_v39 = vpop.xlane.xlu1 %868 }
 0x49e   :  { %v891_v40 = vsub.f32 %v859_v52, %v869_v39 }
 0x4a0   :  { %v899_v43 = vmul.f32 1.442695, %v891_v40 }
 0x4a1   :  { %v872_v44 = vpop.xlane.xlu0 %871 }
 0x4a2   :  { %2746 = vpow2.f32 %v899_v43  ;;  %v892_v48 = vsub.f32 %v860_v4, %v872_v44 }
 0x4a4   :  { %v901_v49 = vmul.f32 1.442695, %v892_v48 }
 0x4a6   :  { %2748 = vpow2.f32 %v901_v49  ;;  %v875_v51 = vpop.xlane.xlu1 %874 }
 0x4a7   :  { %v893_v50 = vsub.f32 %v861_v63, %v875_v51 }
 0x4a9   :  { %v903_v60 = vmul.f32 1.442695, %v893_v50 }
 0x4aa   :  { %v878_v54 = vpop.xlane.xlu0 %877 }
 0x4ab   :  { %2750 = vpow2.f32 %v903_v60  ;;  %v894_v57 = vsub.f32 %v862_v5, %v878_v54 }
 0x4ad   :  { %v905_v58 = vmul.f32 1.442695, %v894_v57 }
 0x4ae   :  { %v881_v59 = vpop.xlane.xlu1 %880 }
 0x4af   :  { %v2747_v56 = vpop.eup %2746  ;;  %2752 = vpow2.f32 %v905_v58  ;;  %v895_v3 = vsub.f32 %v863_v12, %v881_v59 }
 0x4b0   :  { %v915_v61 = vsel %vm112_vm0, %v2747_v56, 0.0 }
 0x4b1   :  { %v907_v52 = vmul.f32 1.442695, %v895_v3  ;;  %916 = vadd.xlane.f32.xlu1 %v915_v61  ;;  %v2643_v3 = vld [vmem:[%s3587_s7 + $0x30] sm:$0xff]  }
 0x4b2   :  { %v884_v62 = vpop.xlane.xlu0 %883 }
 0x4b3   :  { %v2749_v14 = vpop.eup %2748  ;;  %2754 = vpow2.f32 %v907_v52  ;;  %v896_v4 = vsub.f32 %v864_v22, %v884_v62  ;;  %v2645_v62 = vld [vmem:[%s3587_s7 + $0x20] sm:$0xff]  }
 0x4b4   :  { %v918_v0 = vsel %vm112_vm0, %v2749_v14, 0.0 }
 0x4b5   :  { %v909_v63 = vmul.f32 1.442695, %v896_v4  ;;  %919 = vadd.xlane.f32.xlu0 %v918_v0  ;;  %v2647_v4 = vld [vmem:[%s3587_s7 + $0x10] sm:$0xff]   ;;  %v2648_v0 = vld [vmem:[%s3587_s7 + $0x8] sm:$0xff]  }
 0x4b6   :  { %v887_v16 = vpop.xlane.xlu1 %886 }
 0x4b7   :  { %2756 = vpow2.f32 %v909_v63  ;;  %v897_v24 = vsub.f32 %v865_v31, %v887_v16  ;;  %v2642_v31 = vld [vmem:[%s3587_s7 + $0x38] sm:$0xff]   ;;  %v2649_v63 = vld [vmem:[%s3587_s7] sm:$0xff]  }
 0x4b8   :  { %v2751_v1 = vpop.eup %2750  ;;  %2578 = vmatprep.subr.bf16.mxu1 %v2642_v31 }
 0x4b9   :  { %v911_v5 = vmul.f32 1.442695, %v897_v24  ;;  %v921_v6 = vsel %vm112_vm0, %v2751_v1, 0.0 }
 0x4ba   :  { %922 = vadd.xlane.f32.xlu1 %v921_v6  ;;  %v890_v7 = vpop.xlane.xlu0 %889 }
 0x4bb   :  { %2758 = vpow2.f32 %v911_v5  ;;  %v898_v9 = vsub.f32 %v866_v53, %v890_v7 }
 0x4bc   :  { %v2753_v10 = vpop.eup %2752 }
 0x4bd   :  { %v913_v12 = vmul.f32 1.442695, %v898_v9  ;;  %v924_v17 = vsel %vm112_vm0, %v2753_v10, 0.0 }
 0x4be   :  { %925 = vadd.xlane.f32.xlu0 %v924_v17 }
 0x4bf   :  { %2760 = vpow2.f32 %v913_v12 }
 0x4c0   :  { %v2755_v19 = vpop.eup %2754 }
 0x4c1   :  { %v927_v20 = vsel %vm112_vm0, %v2755_v19, 0.0 }
 0x4c2   :  { %928 = vadd.xlane.f32.xlu1 %v927_v20 }
 0x4c4   :  { %v2757_v21 = vpop.eup %2756 }
 0x4c5   :  { %v930_v22 = vsel %vm112_vm0, %v2757_v21, 0.0 }
 0x4c6   :  { %931 = vadd.xlane.f32.xlu0 %v930_v22 }
 0x4c8   :  { %v2759_v25 = vpop.eup %2758 }
 0x4c9   :  { %v933_v26 = vsel %vm112_vm0, %v2759_v25, 0.0 }
 0x4ca   :  { %934 = vadd.xlane.f32.xlu1 %v933_v26 }
 0x4cc   :  { %v2761_v27 = vpop.eup %2760 }
 0x4cd   :  { %v936_v30 = vsel %vm112_vm0, %v2761_v27, 0.0 }
 0x4ce   :  { %937 = vadd.xlane.f32.xlu0 %v936_v30 }
 0x53a   :  { %v917_v32 = vpop.xlane.xlu1 %916 }
 0x53b   :  { %2762 = vrcp.f32 %v917_v32 }
 0x53e   :  { %v920_v34 = vpop.xlane.xlu0 %919 }
 0x53f   :  { %2764 = vrcp.f32 %v920_v34 }
 0x543   :  { %v923_v36 = vpop.xlane.xlu1 %922 }
 0x544   :  { %2766 = vrcp.f32 %v923_v36  ;;  %v2284_v36 = vld [vmem:[%s3588_s8] ss:$0 sm:$0xff] }
 0x547   :  { %v926_v37 = vpop.xlane.xlu0 %925 }
 0x548   :  { %2768 = vrcp.f32 %v926_v37  ;;  %v2763_v53 = vpop.eup %2762 }
 0x549   :  { %v947_v40 = vmul.f32 %v2763_v53, %v2747_v56 }
 0x54b   :  { %v929_v55 = vpop.xlane.xlu1 %928 }
 0x54c   :  { %v2765_v39 = vpop.eup %2764  ;;  %2770 = vrcp.f32 %v929_v55 }
 0x54d   :  { %v948_v43 = vmul.f32 %v2765_v39, %v2749_v14  ;;  %v2646_v14 = vld [vmem:[%s3587_s7 + $0x18] sm:$0xff]  }
 0x54f   :  { %v932_v44 = vpop.xlane.xlu0 %931  ;;  %v955_v48 = vpack.c.bf16 %v948_v43, %v947_v40 }
 0x550   :  { %2772 = vrcp.f32 %v932_v44 }
 0x551   :  { %2557 = vmatmul.mubr.msk.bf16.vlgmr.msra.gmra.mxu0 %vm112_vm0, %v955_v48  ;;  %v2767_v49 = vpop.eup %2766 }
 0x552   :  { %2561 = vmatpush3.bf16.msra.mxu0 %v682_v18  ;;  %2562 = vmatprep.mubr.msk.bf16.mxu0 %vm2818_vm9, %v2817_v15  ;;  %v949_v60 = vmul.f32 %v2767_v49, %v2751_v1 }
 0x553   :  { %v935_v51 = vpop.xlane.xlu1 %934  ;;  %2572 = vmatprep.subr.bf16.mxu0 %v2817_v15 }
 0x554   :  { %2774 = vrcp.f32 %v935_v51 }
 0x555   :  { %v2769_v50 = vpop.eup %2768 }
 0x556   :  { %v950_v54 = vmul.f32 %v2769_v50, %v2753_v10 }
 0x557   :  { %v938_v57 = vpop.xlane.xlu0 %937 }
 0x558   :  { %2776 = vrcp.f32 %v938_v57  ;;  %v956_v58 = vpack.c.bf16 %v950_v54, %v949_v60 }
 0x559   :  { %v2771_v59 = vpop.eup %2770 }
 0x55a   :  { %2563 = vmatmul.mubr.msk.bf16.vlgmr.msra.gmra.mxu0 %vm112_vm0, %v956_v58  ;;  %v951_v13 = vmul.f32 %v2771_v59, %v2755_v19 }
 0x55b   :  { %2573 = vmatpush3.bf16.msra.mxu0 %v684_v29  ;;  %2574 = vmatprep.mubr.msk.bf16.mxu0 %vm2818_vm9, %v2817_v15 }
 0x55d   :  { %v2773_v8 = vpop.eup %2772 }
 0x55e   :  { %v952_v18 = vmul.f32 %v2773_v8, %v2757_v21 }
 0x560   :  { %v957_v56 = vpack.c.bf16 %v952_v18, %v951_v13 }
 0x561   :  { %v2775_v61 = vpop.eup %2774 }
 0x562   :  { %2569 = vmatmul.mubr.msk.bf16.vlgmr.msra.gmra.mxu1 %vm112_vm0, %v957_v56  ;;  %v953_v29 = vmul.f32 %v2775_v61, %v2759_v25  ;;  %v2655_v56 = vld [vmem:[%s3591_s11 + $0xec] ss:$16 sps:$4 sm:$0xff]  }
 0x563   :  { %2579 = vmatpush3.bf16.msra.mxu1 %v2642_v31 }
 0x564   :  { %2580 = vmatprep.subr.bf16.mxu1 %v2643_v3 }
 0x565   :  { %v2777_v28 = vpop.eup %2776 }
 0x566   :  { %v954_v15 = vmul.f32 %v2777_v28, %v2761_v27 }
 0x567   :  { %2581 = vmatpush3.bf16.msra.mxu1 %v2643_v3 }
 0x568   :  { %v958_v52 = vpack.c.bf16 %v954_v15, %v953_v29  ;;  %2582 = vmatprep.subr.bf16.mxu1 %v2644_v23 }
 0x56a   :  { %2575 = vmatmul.mubr.msk.bf16.vlgmr.msra.gmra.mxu0 %vm112_vm0, %v958_v52 }
 0x56b   :  { %2583 = vmatpush3.bf16.msra.mxu1 %v2644_v23  ;;  %1651 = vmatprep.mubr.bf16.mxu0 %v2816_v2 }
 0x56c   :  { %2584 = vmatprep.subr.bf16.mxu1 %v2645_v62 }
 0x56f   :  { %2585 = vmatpush3.bf16.msra.mxu1 %v2645_v62 }
 0x570   :  { %2586 = vmatprep.subr.bf16.mxu1 %v2646_v14 }
 0x573   :  { %2587 = vmatpush3.bf16.msra.mxu1 %v2646_v14 }
 0x574   :  { %2588 = vmatprep.subr.bf16.mxu1 %v2647_v4 }
 0x577   :  { %2589 = vmatpush3.bf16.msra.mxu1 %v2647_v4 }
 0x578   :  { %2590 = vmatprep.subr.bf16.mxu1 %v2648_v0 }
 0x57b   :  { %2591 = vmatpush3.bf16.msra.mxu1 %v2648_v0 }
 0x57c   :  { %2592 = vmatprep.subr.bf16.mxu1 %v2649_v63 }
 0x57f   :  { %2593 = vmatpush3.bf16.msra.mxu1 %v2649_v63 }
 0x580   :  { %1692 = vmatprep.subr.bf16.mxu1 %v2655_v56  ;;  %v2691_v56 = vld [vmem:[%s3591_s11 + $0x2c] ss:$16 sps:$4 sm:$0xff]  }
 0x611   :  { %v996_v16 = vpop.f32.mrf.mxu0 }
 0x613   :  { %v2558_v24 = vpop.f32.mrf.mxu0 }
 0x615   :  { %v999_v1 = vpop.f32.mrf.mxu0 }
 0x616   :  { %v1135_v5 = vpack.c.bf16 %v999_v1, %v996_v16 }
 0x617   :  { %v2559_v6 = vpop.f32.mrf.mxu0 }
 0x618   :  { %2594 = vmatprep.mubr.bf16.mxu1 %v1135_v5 }
 0x61a   :  { %v1040_v7 = vpop.f32.mrf.mxu0 }
 0x61c   :  { %v2564_v9 = vpop.f32.mrf.mxu0 }
 0x61d   :  { %v2661_v9 = vld [vmem:[%s3591_s11 + $0xcc] ss:$16 sps:$4 sm:$0xff]  }
 0x61e   :  { %v1043_v10 = vpop.f32.mrf.mxu0 }
 0x61f   :  { %v1136_v12 = vpack.c.bf16 %v1043_v10, %v1040_v7  ;;  %v2658_v7 = vld [vmem:[%s3591_s11 + $0xc4] ss:$16 sps:$4 sm:$0xff]  }
 0x620   :  { %v2565_v17 = vpop.f32.mrf.mxu0 }
 0x621   :  { %2595 = vmatmul.mubr.bf16.vlgmr.msra.gmra.mxu1 %v1136_v12  ;;  %v2656_v12 = vld [vmem:[%s3591_s11 + $0xc0] ss:$16 sps:$4 sm:$0xff]   ;;  %v2659_v17 = vld [vmem:[%s3591_s11 + $0xc8] ss:$16 sps:$4 sm:$0xff]  }
 0x622   :  { %v1084_v19 = vpop.f32.mrf.mxu1 }
 0x624   :  { %v2570_v20 = vpop.f32.mrf.mxu1 }
 0x626   :  { %v1087_v21 = vpop.f32.mrf.mxu1 }
 0x627   :  { %v1137_v22 = vpack.c.bf16 %v1087_v21, %v1084_v19 }
 0x628   :  { %v2571_v25 = vpop.f32.mrf.mxu1 }
 0x629   :  { %2598 = vmatprep.mubr.bf16.mxu1 %v1137_v22 }
 0x62a   :  { %v1128_v26 = vpop.f32.mrf.mxu0 }
 0x62c   :  { %v2576_v27 = vpop.f32.mrf.mxu0 }
 0x62d   :  { %v2667_v27 = vld [vmem:[%s3591_s11 + $0xac] ss:$16 sps:$4 sm:$0xff]  }
 0x62e   :  { %v1131_v30 = vpop.f32.mrf.mxu0 }
 0x62f   :  { %v1138_v31 = vpack.c.bf16 %v1131_v30, %v1128_v26  ;;  %v2664_v26 = vld [vmem:[%s3591_s11 + $0xa4] ss:$16 sps:$4 sm:$0xff]  }
 0x630   :  { %v2577_v32 = vpop.f32.mrf.mxu0 }
 0x631   :  { %2599 = vmatmul.mubr.bf16.gmra.mxu1 %v1138_v31  ;;  %v2662_v32 = vld [vmem:[%s3591_s11 + $0xa0] ss:$16 sps:$4 sm:$0xff]  }
 0x632   :  { %1724 = vmatprep.mubr.bf16.mxu1 %v2816_v2 }
 0x6e1   :  { %v2596_v34 = vpop.f32.mrf.mxu1 }
 0x6e2   :  { %v1253_v39 = vadd.f32 %v2596_v34, %v2284_v36  ;;  %v2665_v34 = vld [vmem:[%s3591_s11 + $0xa8] ss:$16 sps:$4 sm:$0xff]  }
 0x6e3   :  { %v1244_v37 = vpop.f32.mrf.mxu1 }
 0x6e4   :  { %v1245_v53 = vadd.f32 %v2284_v36, %v1244_v37  ;;  %v3213_v48 = vadd.f32 %v1253_v39, %v2964_v38  ;;  %v2670_v39 = vld [vmem:[%s3591_s11 + $0x84] ss:$16 sps:$4 sm:$0xff]  }
 0x6e5   :  { %v2597_v55 = vpop.f32.mrf.mxu1 }
 0x6e6   :  { %v3209_v40 = vadd.f32 %v1245_v53, %v2960_v35  ;;  %v1256_v49 = vadd.f32 %v2597_v55, %v2284_v36 }
 0x6e7   :  { %v1247_v43 = vpop.f32.mrf.mxu1 }
 0x6e8   :  { %v1248_v44 = vadd.f32 %v2284_v36, %v1247_v43  ;;  %1285 = vadd.xlane.f32.xlu1 %v3209_v40  ;;  %v3221_v50 = vadd.f32 %v1256_v49, %v2967_v41  ;;  %v2673_v43 = vld [vmem:[%s3591_s11 + $0x8c] ss:$16 sps:$4 sm:$0xff]   ;;  %v2668_v49 = vld [vmem:[%s3591_s11 + $0x80] ss:$16 sps:$4 sm:$0xff]  }
 0x6ea   :  { %v3216_v51 = vadd.f32 %v1248_v44, %v2958_v33 }
 0x6ec   :  { %1287 = vadd.xlane.f32.xlu0 %v3216_v51  ;;  %1289 = vadd.xlane.f32.xlu1 %v3213_v48 }
 0x6f0   :  { %1291 = vadd.xlane.f32.xlu0 %v3221_v50 }
 0x6f1   :  { %v2600_v35 = vpop.f32.mrf.mxu1 }
 0x6f2   :  { %v1269_v58 = vadd.f32 %v2600_v35, %v2284_v36  ;;  %v2671_v35 = vld [vmem:[%s3591_s11 + $0x88] ss:$16 sps:$4 sm:$0xff]  }
 0x6f3   :  { %v1260_v60 = vpop.f32.mrf.mxu1 }
 0x6f4   :  { %v1261_v54 = vadd.f32 %v2284_v36, %v1260_v60  ;;  %v3229_v8 = vadd.f32 %v1269_v58, %v2975_v46  ;;  %v2652_v46 = vld [vmem:[%s3591_s11 + $0xe4] ss:$16 sps:$4 sm:$0xff]   ;;  %v2677_v58 = vld [vmem:[%s3591_s11 + $0x68] ss:$16 sps:$4 sm:$0xff]  }
 0x6f5   :  { %v2601_v57 = vpop.f32.mrf.mxu1  ;;  %1619 = vmatprep.subr.bf16.mxu0 %v2652_v46  ;;  %v2683_v46 = vld [vmem:[%s3591_s11 + $0x48] ss:$16 sps:$4 sm:$0xff]  }
 0x6f6   :  { %v3225_v38 = vadd.f32 %v1261_v54, %v2969_v42  ;;  %v1272_v13 = vadd.f32 %v2601_v57, %v2284_v36  ;;  %v2650_v42 = vld [vmem:[%s3591_s11 + $0xe0] ss:$16 sps:$4 sm:$0xff]   ;;  %v2676_v57 = vld [vmem:[%s3591_s11 + $0x64] ss:$16 sps:$4 sm:$0xff]  }
 0x6f7   :  { %v1263_v59 = vpop.f32.mrf.mxu1  ;;  %1620 = vmatpush1.bf16.msra.mxu0 %v2650_v42  ;;  %v2674_v54 = vld [vmem:[%s3591_s11 + $0x60] ss:$16 sps:$4 sm:$0xff]  }
 0x6f8   :  { %v1264_v33 = vadd.f32 %v2284_v36, %v1263_v59  ;;  %1293 = vadd.xlane.f32.xlu1 %v3225_v38  ;;  %v3237_v18 = vadd.f32 %v1272_v13, %v2979_v47  ;;  %1621 = vmatprep.subr.bf16.mxu0 %v2658_v7  ;;  %v2679_v59 = vld [vmem:[%s3591_s11 + $0x6c] ss:$16 sps:$4 sm:$0xff]   ;;  %v2680_v42 = vld [vmem:[%s3591_s11 + $0x40] ss:$16 sps:$4 sm:$0xff]  }
 0x6f9   :  { %v2685_v13 = vld [vmem:[%s3591_s11 + $0x4c] ss:$16 sps:$4 sm:$0xff]  }
 0x6fa   :  { %v3232_v41 = vadd.f32 %v1264_v33, %v2973_v45  ;;  %v2653_v45 = vld [vmem:[%s3591_s11 + $0xe8] ss:$16 sps:$4 sm:$0xff]   ;;  %v2682_v33 = vld [vmem:[%s3591_s11 + $0x44] ss:$16 sps:$4 sm:$0xff]  }
 0x6fb   :  { %1693 = vmatpush1.bf16.msra.mxu1 %v2653_v45  ;;  %1622 = vmatpush1.bf16.msra.mxu0 %v2656_v12  ;;  %v2688_v45 = vld [vmem:[%s3591_s11 + $0x24] ss:$16 sps:$4 sm:$0xff]  }
 0x6fc   :  { %1295 = vadd.xlane.f32.xlu0 %v3232_v41  ;;  %1297 = vadd.xlane.f32.xlu1 %v3229_v8 }
 0x6fd   :  { %1694 = vmatprep.subr.bf16.mxu1 %v2661_v9  ;;  %1623 = vmatprep.subr.bf16.mxu0 %v2664_v26 }
 0x6ff   :  { %1695 = vmatpush1.bf16.msra.mxu1 %v2659_v17  ;;  %1624 = vmatpush1.bf16.msra.mxu0 %v2662_v32 }
 0x700   :  { %1299 = vadd.xlane.f32.xlu0 %v3237_v18  ;;  %1696 = vmatprep.subr.bf16.mxu1 %v2667_v27  ;;  %v3385_v27 = vld [vmem:[%s3589_s9] ss:$0 sm:$0xff] }
 0x701   :  { %1625 = vmatprep.subr.bf16.mxu0 %v2670_v39 }
 0x703   :  { %1697 = vmatpush1.bf16.msra.mxu1 %v2665_v34  ;;  %1626 = vmatpush1.bf16.msra.mxu0 %v2668_v49 }
 0x704   :  { %1698 = vmatprep.subr.bf16.mxu1 %v2673_v43  ;;  %1627 = vmatprep.subr.bf16.mxu0 %v2676_v57 }
 0x707   :  { %1699 = vmatpush1.bf16.msra.mxu1 %v2671_v35  ;;  %1628 = vmatpush1.bf16.msra.mxu0 %v2674_v54 }
 0x708   :  { %1700 = vmatprep.subr.bf16.mxu1 %v2679_v59  ;;  %1629 = vmatprep.subr.bf16.mxu0 %v2682_v33 }
 0x70b   :  { %1701 = vmatpush1.bf16.msra.mxu1 %v2677_v58  ;;  %1630 = vmatpush1.bf16.msra.mxu0 %v2680_v42 }
 0x70c   :  { %1702 = vmatprep.subr.bf16.mxu1 %v2685_v13  ;;  %1631 = vmatprep.subr.bf16.mxu0 %v2688_v45 }
 0x70f   :  { %1703 = vmatpush1.bf16.msra.mxu1 %v2683_v46 }
 0x710   :  { %1704 = vmatprep.subr.bf16.mxu1 %v2691_v56 }
 0x771   :  { %v1286_v47 = vpop.xlane.xlu1 %1285 }
 0x772   :  { %v1301_v3 = vmul.f32 0.0078125, %v1286_v47  ;;  %v2686_v47 = vld [vmem:[%s3591_s11 + $0x20] ss:$16 sps:$4 sm:$0xff]  }
 0x773   :  { %1632 = vmatpush1.bf16.msra.mxu0 %v2686_v47  ;;  %v2700_v47 = vld [vmem:[%s3593_s13 + $0x38] sm:$0xff]  }
 0x774   :  { %v3253_v61 = vsub.f32 %v3209_v40, %v1301_v3  ;;  %v2689_v3 = vld [vmem:[%s3591_s11 + $0x28] ss:$16 sps:$4 sm:$0xff]  }
 0x775   :  { %v1288_v23 = vpop.xlane.xlu0 %1287  ;;  %v1290_v28 = vpop.xlane.xlu1 %1289  ;;  %1705 = vmatpush1.bf16.msra.mxu1 %v2689_v3  ;;  %v2701_v3 = vld [vmem:[%s3593_s13 + $0xb8] sm:$0xff]  }
 0x776   :  { %v1302_v29 = vmul.f32 0.0078125, %v1288_v23  ;;  %v1303_v15 = vmul.f32 0.0078125, %v1290_v28  ;;  %v1317_v52 = vmul.f32 %v3253_v61, %v3253_v61  ;;  %v2694_v23 = vld [vmem:[%s3591_s11 + $0x4] ss:$16 sps:$4 sm:$0xff]   ;;  %v2697_v28 = vld [vmem:[%s3591_s11 + $0xc] ss:$16 sps:$4 sm:$0xff]  }
 0x777   :  { %1633 = vmatprep.subr.bf16.mxu0 %v2694_v23  ;;  %1706 = vmatprep.subr.bf16.mxu1 %v2697_v28 }
 0x778   :  { %v3258_v62 = vsub.f32 %v3216_v51, %v1302_v29  ;;  %v3261_v14 = vsub.f32 %v3213_v48, %v1303_v15  ;;  %1325 = vadd.xlane.f32.xlu1 %v1317_v52  ;;  %v2692_v29 = vld [vmem:[%s3591_s11] ss:$16 sps:$4 sm:$0xff]   ;;  %v2695_v15 = vld [vmem:[%s3591_s11 + $0x8] ss:$16 sps:$4 sm:$0xff]  }
 0x779   :  { %v1292_v4 = vpop.xlane.xlu0 %1291  ;;  %1634 = vmatpush1.bf16.msra.mxu0 %v2692_v29  ;;  %1707 = vmatpush1.bf16.msra.mxu1 %v2695_v15  ;;  %v2698_v52 = vld [vmem:[%s3593_s13 + $0x78] sm:$0xff]   ;;  %v2704_v29 = vld [vmem:[%s3593_s13 + $0x30] sm:$0xff]  }
 0x77a   :  { %v1304_v0 = vmul.f32 0.0078125, %v1292_v4  ;;  %v1318_v63 = vmul.f32 %v3258_v62, %v3258_v62  ;;  %v1319_v16 = vmul.f32 %v3261_v14, %v3261_v14  ;;  %v2699_v4 = vld [vmem:[%s3593_s13 + $0xf8] sm:$0xff]   ;;  %2410 = vmatprep.subr.bf16.mxu0 %v2698_v52  ;;  %v2705_v15 = vld [vmem:[%s3593_s13 + $0xb0] sm:$0xff]  }
 0x77b   :  { %2450 = vmatprep.subr.bf16.mxu1 %v2699_v4  ;;  %v2706_v4 = vld [vmem:[%s3593_s13 + $0x68] sm:$0xff]  }
 0x77c   :  { %v3268_v24 = vsub.f32 %v3221_v50, %v1304_v0  ;;  %1327 = vadd.xlane.f32.xlu0 %v1318_v63  ;;  %1329 = vadd.xlane.f32.xlu1 %v1319_v16 }
 0x77e   :  { %v1320_v1 = vmul.f32 %v3268_v24, %v3268_v24 }
 0x780   :  { %1331 = vadd.xlane.f32.xlu0 %v1320_v1 }
 0x781   :  { %v1294_v5 = vpop.xlane.xlu1 %1293 }
 0x782   :  { %v1305_v6 = vmul.f32 0.0078125, %v1294_v5 }
 0x784   :  { %v3279_v10 = vsub.f32 %v3225_v38, %v1305_v6 }
 0x785   :  { %v1296_v19 = vpop.xlane.xlu0 %1295  ;;  %v1298_v20 = vpop.xlane.xlu1 %1297 }
 0x786   :  { %v1306_v21 = vmul.f32 0.0078125, %v1296_v19  ;;  %v1307_v22 = vmul.f32 0.0078125, %v1298_v20  ;;  %v1321_v25 = vmul.f32 %v3279_v10, %v3279_v10 }
 0x788   :  { %v3296_v30 = vsub.f32 %v3232_v41, %v1306_v21  ;;  %v3299_v31 = vsub.f32 %v3229_v8, %v1307_v22  ;;  %1333 = vadd.xlane.f32.xlu1 %v1321_v25 }
 0x789   :  { %v1300_v36 = vpop.xlane.xlu0 %1299 }
 0x78a   :  { %v1308_v37 = vmul.f32 0.0078125, %v1300_v36  ;;  %v1322_v53 = vmul.f32 %v3296_v30, %v3296_v30  ;;  %v1323_v55 = vmul.f32 %v3299_v31, %v3299_v31 }
 0x78c   :  { %v3318_v44 = vsub.f32 %v3237_v18, %v1308_v37  ;;  %1335 = vadd.xlane.f32.xlu0 %v1322_v53  ;;  %1337 = vadd.xlane.f32.xlu1 %v1323_v55 }
 0x78e   :  { %v1324_v60 = vmul.f32 %v3318_v44, %v3318_v44 }
 0x790   :  { %1339 = vadd.xlane.f32.xlu0 %v1324_v60  ;;  %v3392_v60 = vld [vmem:[%s3590_s10] ss:$0 sm:$0xff] }
 0x801   :  { %v1326_v0 = vpop.xlane.xlu1 %1325 }
 0x802   :  { %v1341_v63 = vmul.f32 0.0078125, %v1326_v0  ;;  %v2707_v0 = vld [vmem:[%s3593_s13 + $0xe8] sm:$0xff]  }
 0x804   :  { %v1349_v16 = vadd.f32 1e-05, %v1341_v63 }
 0x805   :  { %v1328_v1 = vpop.xlane.xlu0 %1327  ;;  %v1330_v5 = vpop.xlane.xlu1 %1329 }
 0x806   :  { %2778 = vrsqrt.f32 %v1349_v16  ;;  %v1342_v6 = vmul.f32 0.0078125, %v1328_v1  ;;  %v1343_v7 = vmul.f32 0.0078125, %v1330_v5  ;;  %v2708_v5 = vld [vmem:[%s3593_s13 + $0x28] sm:$0xff]  }
 0x808   :  { %v1350_v9 = vadd.f32 1e-05, %v1342_v6  ;;  %v1351_v12 = vadd.f32 1e-05, %v1343_v7  ;;  %v2709_v6 = vld [vmem:[%s3593_s13 + $0xa8] sm:$0xff]  }
 0x809   :  { %v1332_v17 = vpop.xlane.xlu0 %1331 }
 0x80a   :  { %2780 = vrsqrt.f32 %v1350_v9  ;;  %v1344_v19 = vmul.f32 0.0078125, %v1332_v17  ;;  %v2710_v9 = vld [vmem:[%s3593_s13 + $0x60] sm:$0xff]  }
 0x80b   :  { %2782 = vrsqrt.f32 %v1351_v12 }
 0x80c   :  { %v1352_v20 = vadd.f32 1e-05, %v1344_v19 }
 0x80e   :  { %2784 = vrsqrt.f32 %v1352_v20 }
 0x811   :  { %v1334_v21 = vpop.xlane.xlu1 %1333 }
 0x812   :  { %v1345_v22 = vmul.f32 0.0078125, %v1334_v21  ;;  %v2712_v21 = vld [vmem:[%s3593_s13 + $0x20] sm:$0xff]  }
 0x813   :  { %v2779_v25 = vpop.eup %2778 }
 0x814   :  { %v1353_v26 = vadd.f32 1e-05, %v1345_v22  ;;  %v1365_v32 = vmul.f32 %v2779_v25, %v3253_v61  ;;  %v2713_v22 = vld [vmem:[%s3593_s13 + $0xa0] sm:$0xff]   ;;  %v2714_v25 = vld [vmem:[%s3593_s13 + $0x58] sm:$0xff]  }
 0x815   :  { %v1336_v34 = vpop.xlane.xlu0 %1335  ;;  %v1338_v36 = vpop.xlane.xlu1 %1337 }
 0x816   :  { %2786 = vrsqrt.f32 %v1353_v26  ;;  %v1346_v37 = vmul.f32 0.0078125, %v1336_v34  ;;  %v1347_v53 = vmul.f32 0.0078125, %v1338_v36  ;;  %v1379_v39 = vmul.f32 %v3385_v27, %v1365_v32  ;;  %v2715_v26 = vld [vmem:[%s3593_s13 + $0xd8] sm:$0xff]  }
 0x817   :  { %v2781_v55 = vpop.eup %2780 }
 0x818   :  { %v2783_v43 = vpop.eup %2782  ;;  %v1354_v49 = vadd.f32 1e-05, %v1346_v37  ;;  %v1355_v35 = vadd.f32 1e-05, %v1347_v53  ;;  %v1366_v54 = vmul.f32 %v2781_v55, %v3258_v62  ;;  %v1393_v33 = vadd.f32 %v3392_v60, %v1379_v39  ;;  %v2716_v39 = vld [vmem:[%s3593_s13 + $0x18] sm:$0xff]  }
 0x819   :  { %v1340_v57 = vpop.xlane.xlu0 %1339  ;;  %v1367_v13 = vmul.f32 %v2783_v43, %v3261_v14  ;;  %v2702_v14 = vld [vmem:[%s3593_s13 + $0x70] sm:$0xff]   ;;  %v2717_v43 = vld [vmem:[%s3593_s13 + $0x98] sm:$0xff]  }
 0x81a   :  { %2788 = vrsqrt.f32 %v1354_v49  ;;  %v1348_v61 = vmul.f32 0.0078125, %v1340_v57  ;;  %v1380_v58 = vmul.f32 %v3385_v27, %v1366_v54  ;;  %v2718_v54 = vld [vmem:[%s3593_s13 + $0x50] sm:$0xff]  }
 0x81b   :  { %v2785_v59 = vpop.eup %2784  ;;  %2790 = vrsqrt.f32 %v1355_v35  ;;  %v1381_v23 = vmul.f32 %v3385_v27, %v1367_v13  ;;  %v2721_v57 = vld [vmem:[%s3593_s13 + $0x90] sm:$0xff]   ;;  %v2727_v13 = vld [vmem:[%s3593_s13 + $0xc0] sm:$0xff]  }
 0x81c   :  { %v1356_v42 = vadd.f32 1e-05, %v1348_v61  ;;  %v1394_v46 = vadd.f32 %v3392_v60, %v1380_v58  ;;  %v1368_v45 = vmul.f32 %v2785_v59, %v3268_v24  ;;  %v2703_v24 = vld [vmem:[%s3593_s13 + $0xf0] sm:$0xff]   ;;  %v2723_v61 = vld [vmem:[%s3593_s13 + $0xc8] sm:$0xff]  }
 0x81d   :  { %v1395_v63 = vadd.f32 %v3392_v60, %v1381_v23  ;;  %v2724_v58 = vld [vmem:[%s3593_s13 + $0x8] sm:$0xff]  }
 0x81e   :  { %2792 = vrsqrt.f32 %v1356_v42  ;;  %v1401_v56 = vpack.c.bf16 %v1394_v46, %v1393_v33  ;;  %v1382_v62 = vmul.f32 %v3385_v27, %v1368_v45  ;;  %v2725_v59 = vld [vmem:[%s3593_s13 + $0x88] sm:$0xff]   ;;  %v2726_v33 = vld [vmem:[%s3593_s13 + $0x40] sm:$0xff]   ;;  %v1440_v45 = vshrl.u32 %v60_v11, 7 }
 0x81f   :  { %v2728_v42 = vld [vmem:[%s3593_s13] sm:$0xff]  }
 0x820   :  { %1652 = vmatmul.mubr.bf16.vlgmr.msra.gmra.mxu0 %v1401_v56  ;;  %1725 = vmatmul.mubr.bf16.vlgmr.msra.gmra.mxu1 %v1401_v56  ;;  %v1396_v28 = vadd.f32 %v3392_v60, %v1382_v62  ;;  %v2729_v46 = vld [vmem:[%s3593_s13 + $0x80] sm:$0xff]   ;;  %v1445_v56 = vsub.s32 1, %v1440_v45  ;;  %v1453_v62 = vsub.s32 3, %v1440_v45 }
 0x821   :  { %1661 = vmatprep.mubr.bf16.mxu0 %v2816_v2  ;;  %1734 = vmatprep.mubr.bf16.mxu1 %v2816_v2 }
 0x822   :  { %2411 = vmatpush3.bf16.msra.mxu0 %v2700_v47  ;;  %2451 = vmatpush3.bf16.msra.mxu1 %v2701_v3  ;;  %v1402_v1 = vpack.c.bf16 %v1396_v28, %v1395_v63  ;;  %v1441_v47 = vsub.s32 0, %v1440_v45  ;;  %v1449_v3 = vsub.s32 2, %v1440_v45 }
 0x823   :  { %v2787_v52 = vpop.eup %2786  ;;  %2412 = vmatprep.subr.bf16.mxu0 %v2702_v14  ;;  %2452 = vmatprep.subr.bf16.mxu1 %v2703_v24  ;;  %v1437_v14 = vld [vmem:[%s3592_s12] sm:$0xf] }
 0x824   :  { %v1369_v16 = vmul.f32 %v2787_v52, %v3279_v10  ;;  %v2711_v10 = vld [vmem:[%s3593_s13 + $0xe0] sm:$0xff]   ;;  %v3516_v28 = vrot.slane %v1437_v14, %v1445_v56  ;;  %v3522_v52 = vrot.slane %v1437_v14, %v1449_v3 }
 0x826   :  { %2413 = vmatpush3.bf16.msra.mxu0 %v2704_v29  ;;  %2453 = vmatpush3.bf16.msra.mxu1 %v2705_v15  ;;  %v1383_v17 = vmul.f32 %v3385_v27, %v1369_v16  ;;  %v3518_v29 = vrot.slane %v1437_v14, %v1453_v62  ;;  %v3520_v15 = vrot.slane %v1437_v14, %v1441_v47 }
 0x827   :  { %v2789_v7 = vpop.eup %2788  ;;  %2414 = vmatprep.subr.bf16.mxu0 %v2706_v4  ;;  %2454 = vmatprep.subr.bf16.mxu1 %v2707_v0 }
 0x828   :  { %1662 = vmatmul.mubr.bf16.gmra.mxu0 %v1402_v1  ;;  %1735 = vmatmul.mubr.bf16.gmra.mxu1 %v1402_v1  ;;  %v1370_v12 = vmul.f32 %v2789_v7, %v3296_v30  ;;  %v2791_v19 = vpop.eup %2790  ;;  %v1397_v32 = vadd.f32 %v3392_v60, %v1383_v17 }
 0x829   :  { %1671 = vmatprep.mubr.bf16.mxu0 %v2816_v2  ;;  %1744 = vmatprep.mubr.bf16.mxu1 %v2816_v2  ;;  %v1371_v36 = vmul.f32 %v2791_v19, %v3299_v31 }
 0x82a   :  { %v1384_v20 = vmul.f32 %v3385_v27, %v1370_v12  ;;  %2415 = vmatpush3.bf16.msra.mxu0 %v2708_v5  ;;  %2455 = vmatpush3.bf16.msra.mxu1 %v2709_v6 }
 0x82b   :  { %v2793_v30 = vpop.eup %2792  ;;  %2416 = vmatprep.subr.bf16.mxu0 %v2710_v9  ;;  %2456 = vmatprep.subr.bf16.mxu1 %v2711_v10  ;;  %v1385_v31 = vmul.f32 %v3385_v27, %v1371_v36 }
 0x82c   :  { %v1398_v34 = vadd.f32 %v3392_v60, %v1384_v20  ;;  %v1372_v37 = vmul.f32 %v2793_v30, %v3318_v44 }
 0x82d   :  { %v1399_v49 = vadd.f32 %v3392_v60, %v1385_v31 }
 0x82e   :  { %v1403_v53 = vpack.c.bf16 %v1398_v34, %v1397_v32  ;;  %v1386_v55 = vmul.f32 %v3385_v27, %v1372_v37  ;;  %2417 = vmatpush3.bf16.msra.mxu0 %v2712_v21  ;;  %2457 = vmatpush3.bf16.msra.mxu1 %v2713_v22  ;;  %v2719_v27 = vld [vmem:[%s3593_s13 + $0xd0] sm:$0xff]  }
 0x82f   :  { %2418 = vmatprep.subr.bf16.mxu0 %v2714_v25  ;;  %2458 = vmatprep.subr.bf16.mxu1 %v2715_v26 }
 0x830   :  { %1672 = vmatmul.mubr.bf16.gmra.mxu0 %v1403_v53  ;;  %1745 = vmatmul.mubr.bf16.gmra.mxu1 %v1403_v53  ;;  %v1400_v44 = vadd.f32 %v3392_v60, %v1386_v55  ;;  %v2722_v60 = vld [vmem:[%s3593_s13 + $0x48] sm:$0xff]  }
 0x831   :  { %1681 = vmatprep.mubr.bf16.mxu0 %v2816_v2  ;;  %1754 = vmatprep.mubr.bf16.mxu1 %v2816_v2  ;;  %v2720_v2 = vld [vmem:[%s3593_s13 + $0x10] sm:$0xff]  }
 0x832   :  { %2419 = vmatpush3.bf16.msra.mxu0 %v2716_v39  ;;  %2459 = vmatpush3.bf16.msra.mxu1 %v2717_v43  ;;  %v1404_v35 = vpack.c.bf16 %v1400_v44, %v1399_v49 }
 0x833   :  { %2420 = vmatprep.subr.bf16.mxu0 %v2718_v54  ;;  %2460 = vmatprep.subr.bf16.mxu1 %v2719_v27 }
 0x836   :  { %2421 = vmatpush3.bf16.msra.mxu0 %v2720_v2  ;;  %2461 = vmatpush3.bf16.msra.mxu1 %v2721_v57 }
 0x837   :  { %2422 = vmatprep.subr.bf16.mxu0 %v2722_v60  ;;  %2462 = vmatprep.subr.bf16.mxu1 %v2723_v61 }
 0x838   :  { %1682 = vmatmul.mubr.bf16.gmra.mxu0 %v1404_v35  ;;  %1755 = vmatmul.mubr.bf16.gmra.mxu1 %v1404_v35 }
 0x83a   :  { %2423 = vmatpush3.bf16.msra.mxu0 %v2724_v58  ;;  %2463 = vmatpush3.bf16.msra.mxu1 %v2725_v59 }
 0x83b   :  { %2424 = vmatprep.subr.bf16.mxu0 %v2726_v33  ;;  %2464 = vmatprep.subr.bf16.mxu1 %v2727_v13 }
 0x83e   :  { %2425 = vmatpush3.bf16.msra.mxu0 %v2728_v42  ;;  %2465 = vmatpush3.bf16.msra.mxu1 %v2729_v46 }
 0x8e0   :  { %v1653_v24 = vpop.f32.mrf.mxu0  ;;  %v1726_v23 = vpop.f32.mrf.mxu1 }
 0x8e1   :  { %v1654_v7 = vadd.f32 %v1653_v24, %v3520_v15  ;;  %v1727_v9 = vadd.f32 %v1726_v23, %v3522_v52 }
 0x8e2   :  { %v1655_v4 = vpop.f32.mrf.mxu0  ;;  %v1728_v11 = vpop.f32.mrf.mxu1 }
 0x8e3   :  { %v1656_v16 = vadd.f32 %v1655_v4, %v3516_v28  ;;  %v1729_v1 = vadd.f32 %v1728_v11, %v3518_v29  ;;  %v1765_v36 = vmax.f32 %v1654_v7, 0.0  ;;  %v1767_v37 = vmax.f32 %v1727_v9, 0.0 }
 0x8e4   :  { %v1657_v0 = vpop.f32.mrf.mxu0  ;;  %v1730_v63 = vpop.f32.mrf.mxu1 }
 0x8e5   :  { %v1658_v5 = vadd.f32 %v1657_v0, %v3520_v15  ;;  %v1731_v6 = vadd.f32 %v1730_v63, %v3522_v52  ;;  %v1766_v25 = vmax.f32 %v1656_v16, 0.0  ;;  %v1768_v26 = vmax.f32 %v1729_v1, 0.0 }
 0x8e6   :  { %v1659_v10 = vpop.f32.mrf.mxu0  ;;  %v1732_v12 = vpop.f32.mrf.mxu1 }
 0x8e7   :  { %v1660_v17 = vadd.f32 %v1659_v10, %v3516_v28  ;;  %v1733_v19 = vadd.f32 %v1732_v12, %v3518_v29  ;;  %v1769_v20 = vmax.f32 %v1658_v5, 0.0  ;;  %v1771_v21 = vmax.f32 %v1731_v6, 0.0 }
 0x8e8   :  { %v1663_v22 = vpop.f32.mrf.mxu0  ;;  %v1736_v30 = vpop.f32.mrf.mxu1 }
 0x8e9   :  { %v1770_v32 = vmax.f32 %v1660_v17, 0.0  ;;  %v1772_v34 = vmax.f32 %v1733_v19, 0.0  ;;  %v1797_v31 = vpack.c.bf16 %v1769_v20, %v1765_v36  ;;  %v1799_v44 = vpack.c.bf16 %v1771_v21, %v1767_v37 }
 0x8ea   :  { %v1665_v53 = vpop.f32.mrf.mxu0  ;;  %v1738_v55 = vpop.f32.mrf.mxu1  ;;  %v1664_v60 = vadd.f32 %v1663_v22, %v3520_v15  ;;  %v1737_v61 = vadd.f32 %v1736_v30, %v3522_v52 }
 0x8eb   :  { %v1798_v39 = vpack.c.bf16 %v1770_v32, %v1766_v25  ;;  %v1800_v43 = vpack.c.bf16 %v1772_v34, %v1768_v26  ;;  %v1666_v49 = vadd.f32 %v1665_v53, %v3516_v28  ;;  %v1739_v27 = vadd.f32 %v1738_v55, %v3518_v29 }
 0x8ec   :  { %v1667_v35 = vpop.f32.mrf.mxu0  ;;  %v1740_v54 = vpop.f32.mrf.mxu1  ;;  %v1773_v24 = vmax.f32 %v1664_v60, 0.0  ;;  %v1775_v23 = vmax.f32 %v1737_v61, 0.0 }
 0x8ed   :  { %v1668_v2 = vadd.f32 %v1667_v35, %v3520_v15  ;;  %v1741_v57 = vadd.f32 %v1740_v54, %v3522_v52  ;;  %2108 = vmatprep.mubr.bf16.mxu0 %v1798_v39  ;;  %2173 = vmatprep.mubr.bf16.mxu1 %v1800_v43  ;;  %v1774_v62 = vmax.f32 %v1666_v49, 0.0  ;;  %v1776_v47 = vmax.f32 %v1739_v27, 0.0 }
 0x8ee   :  { %v1669_v58 = vpop.f32.mrf.mxu0  ;;  %v1742_v59 = vpop.f32.mrf.mxu1  ;;  %2109 = vmatmul.mubr.bf16.vlgmr.msra.gmra.mxu0 %v1797_v31  ;;  %2174 = vmatmul.mubr.bf16.vlgmr.msra.gmra.mxu1 %v1799_v44 }
 0x8ef   :  { %v1670_v33 = vadd.f32 %v1669_v58, %v3516_v28  ;;  %v1743_v13 = vadd.f32 %v1742_v59, %v3518_v29  ;;  %v1777_v42 = vmax.f32 %v1668_v2, 0.0  ;;  %v1779_v46 = vmax.f32 %v1741_v57, 0.0 }
 0x8f0   :  { %v1673_v45 = vpop.f32.mrf.mxu0  ;;  %v1746_v56 = vpop.f32.mrf.mxu1 }
 0x8f1   :  { %v1778_v3 = vmax.f32 %v1670_v33, 0.0  ;;  %v1780_v14 = vmax.f32 %v1743_v13, 0.0  ;;  %v1801_v16 = vpack.c.bf16 %v1777_v42, %v1773_v24  ;;  %v1803_v1 = vpack.c.bf16 %v1779_v46, %v1775_v23 }
 0x8f2   :  { %v1675_v4 = vpop.f32.mrf.mxu0  ;;  %v1748_v11 = vpop.f32.mrf.mxu1  ;;  %v1674_v17 = vadd.f32 %v1673_v45, %v3520_v15  ;;  %v1747_v19 = vadd.f32 %v1746_v56, %v3522_v52 }
 0x8f3   :  { %v1802_v0 = vpack.c.bf16 %v1778_v3, %v1774_v62  ;;  %v1804_v63 = vpack.c.bf16 %v1780_v14, %v1776_v47  ;;  %v1676_v5 = vadd.f32 %v1675_v4, %v3516_v28  ;;  %v1749_v9 = vadd.f32 %v1748_v11, %v3518_v29 }
 0x8f4   :  { %v1677_v6 = vpop.f32.mrf.mxu0  ;;  %v1750_v7 = vpop.f32.mrf.mxu1  ;;  %v1781_v39 = vmax.f32 %v1674_v17, 0.0  ;;  %v1783_v43 = vmax.f32 %v1747_v19, 0.0 }
 0x8f5   :  { %v1678_v10 = vadd.f32 %v1677_v6, %v3520_v15  ;;  %v1751_v12 = vadd.f32 %v1750_v7, %v3522_v52  ;;  %2116 = vmatprep.mubr.bf16.mxu0 %v1802_v0  ;;  %2181 = vmatprep.mubr.bf16.mxu1 %v1804_v63  ;;  %v1782_v36 = vmax.f32 %v1676_v5, 0.0  ;;  %v1784_v37 = vmax.f32 %v1749_v9, 0.0 }
 0x8f6   :  { %v1679_v20 = vpop.f32.mrf.mxu0  ;;  %v1752_v21 = vpop.f32.mrf.mxu1  ;;  %2117 = vmatmul.mubr.bf16.gmra.mxu0 %v1801_v16  ;;  %2182 = vmatmul.mubr.bf16.gmra.mxu1 %v1803_v1 }
 0x8f7   :  { %v1680_v22 = vadd.f32 %v1679_v20, %v3516_v28  ;;  %v1753_v30 = vadd.f32 %v1752_v21, %v3518_v29  ;;  %v1785_v25 = vmax.f32 %v1678_v10, 0.0  ;;  %v1787_v26 = vmax.f32 %v1751_v12, 0.0 }
 0x8f8   :  { %v1683_v32 = vpop.f32.mrf.mxu0  ;;  %v1756_v34 = vpop.f32.mrf.mxu1 }
 0x8f9   :  { %v1786_v53 = vmax.f32 %v1680_v22, 0.0  ;;  %v1788_v55 = vmax.f32 %v1753_v30, 0.0  ;;  %v1805_v54 = vpack.c.bf16 %v1785_v25, %v1781_v39  ;;  %v1807_v27 = vpack.c.bf16 %v1787_v26, %v1783_v43 }
 0x8fa   :  { %v1685_v31 = vpop.f32.mrf.mxu0  ;;  %v1758_v44 = vpop.f32.mrf.mxu1  ;;  %v1684_v33 = vadd.f32 %v1683_v32, %v3520_v15  ;;  %v1757_v13 = vadd.f32 %v1756_v34, %v3522_v52 }
 0x8fb   :  { %v1806_v49 = vpack.c.bf16 %v1786_v53, %v1782_v36  ;;  %v1808_v35 = vpack.c.bf16 %v1788_v55, %v1784_v37  ;;  %v1686_v2 = vadd.f32 %v1685_v31, %v3516_v28  ;;  %v1759_v61 = vadd.f32 %v1758_v44, %v3518_v29 }
 0x8fc   :  { %v1687_v57 = vpop.f32.mrf.mxu0  ;;  %v1760_v60 = vpop.f32.mrf.mxu1  ;;  %v1789_v4 = vmax.f32 %v1684_v33, 0.0  ;;  %v1791_v11 = vmax.f32 %v1757_v13, 0.0 }
 0x8fd   :  { %v1688_v58 = vadd.f32 %v1687_v57, %v3520_v15  ;;  %v1761_v59 = vadd.f32 %v1760_v60, %v3522_v52  ;;  %2124 = vmatprep.mubr.bf16.mxu0 %v1806_v49  ;;  %2189 = vmatprep.mubr.bf16.mxu1 %v1808_v35  ;;  %v1790_v3 = vmax.f32 %v1686_v2, 0.0  ;;  %v1792_v14 = vmax.f32 %v1759_v61, 0.0 }
 0x8fe   :  { %v1689_v42 = vpop.f32.mrf.mxu0  ;;  %v1762_v46 = vpop.f32.mrf.mxu1  ;;  %2125 = vmatmul.mubr.bf16.gmra.mxu0 %v1805_v54  ;;  %2190 = vmatmul.mubr.bf16.gmra.mxu1 %v1807_v27 }
 0x8ff   :  { %v1690_v45 = vadd.f32 %v1689_v42, %v3516_v28  ;;  %v1763_v56 = vadd.f32 %v1762_v46, %v3518_v29  ;;  %v1793_v62 = vmax.f32 %v1688_v58, 0.0  ;;  %v1795_v47 = vmax.f32 %v1761_v59, 0.0  ;;  %v3559_v29 = vld [vmem:[%s3594_s14] ss:$0 sm:$0xff]  ;;  %s2819_s14 = smov [#allocation2]  }
 0x900   :  { %s2227_s23 = sshll.u32 %s2819_s14, 4  ;;  %s2228_s23 = int_to_ptr.vmem [resolvable:$true] %s2227_s23 }
 0x901   :  { %v1794_v24 = vmax.f32 %v1690_v45, 0.0  ;;  %v1796_v23 = vmax.f32 %v1763_v56, 0.0  ;;  %v1809_v63 = vpack.c.bf16 %v1793_v62, %v1789_v4  ;;  %v1811_v52 = vpack.c.bf16 %v1795_v47, %v1791_v11  ;;  %s2794_s3 = scalar_lea.vmem %s2228_s23, 1024  ;;  %p2799_p1 = scmp.lt.s32.totalorder %s2228_s23, %s2228_s23 }
 0x902   :  { %p2795_p0 = scmp.ne.s32.totalorder %s2228_s23, %s2794_s3  ;;  %p2800_p2 = scmp.lt.s32.totalorder %s2794_s3, %s2794_s3 }
 0x903   :  { %v1810_v0 = vpack.c.bf16 %v1794_v24, %v1790_v3  ;;  %v1812_v15 = vpack.c.bf16 %v1796_v23, %v1792_v14 }
 0x904   :  { %p2801_p3 = por %p2800_p2, %p2799_p1 }
 0x905   :  { %2132 = vmatprep.mubr.bf16.mxu0 %v1810_v0  ;;  %2197 = vmatprep.mubr.bf16.mxu1 %v1812_v15 }
 0x906   :  { %2133 = vmatmul.mubr.bf16.gmra.mxu0 %v1809_v63  ;;  %2198 = vmatmul.mubr.bf16.gmra.mxu1 %v1811_v52  ;;  %p2802_p4 = pnand %p2801_p3, %p2795_p0 }
 0x9ae   :  { %v2426_v16 = vpop.f32.mrf.mxu0  ;;  %v2466_v28 = vpop.f32.mrf.mxu1 }
 0x9b0   :  { %v2427_v1 = vpop.f32.mrf.mxu0  ;;  %v2467_v5 = vpop.f32.mrf.mxu1 }
 0x9b1   :  { %v2428_v6 = vadd.f32 %v2427_v1, %v2426_v16  ;;  %v2468_v12 = vadd.f32 %v2467_v5, %v2466_v28 }
 0x9b2   :  { %v2429_v7 = vpop.f32.mrf.mxu0  ;;  %v2469_v9 = vpop.f32.mrf.mxu1 }
 0x9b3   :  { %v2111_v10 = vadd.f32 %v2428_v6, %v3559_v29 }
 0x9b4   :  { %v2430_v17 = vpop.f32.mrf.mxu0  ;;  %v2470_v19 = vpop.f32.mrf.mxu1 }
 0x9b5   :  { %v2176_v20 = vadd.f32 %v2468_v12, %v2111_v10  ;;  %v2431_v21 = vadd.f32 %v2430_v17, %v2429_v7  ;;  %v2471_v32 = vadd.f32 %v2470_v19, %v2469_v9 }
 0x9b6   :  { %v2432_v22 = vpop.f32.mrf.mxu0  ;;  %v2472_v30 = vpop.f32.mrf.mxu1 }
 0x9b7   :  { %v2206_v25 = vadd.f32 %v2176_v20, %v3209_v40  ;;  %v2114_v26 = vadd.f32 %v2431_v21, %v3559_v29 }
 0x9b8   :  { %v2433_v34 = vpop.f32.mrf.mxu0  ;;  %v2473_v36 = vpop.f32.mrf.mxu1 }
 0x9b9   :  { %2214 = vst [vmem:[#allocation2] sm:$0xff] %v2206_v25  ;;  %v2179_v37 = vadd.f32 %v2471_v32, %v2114_v26  ;;  %v2434_v53 = vadd.f32 %v2433_v34, %v2432_v22  ;;  %v2474_v44 = vadd.f32 %v2473_v36, %v2472_v30 }
 0x9ba   :  { %v2435_v55 = vpop.f32.mrf.mxu0  ;;  %v2475_v39 = vpop.f32.mrf.mxu1 }
 0x9bb   :  { %v2207_v43 = vadd.f32 %v2179_v37, %v3216_v51  ;;  %v2119_v31 = vadd.f32 %v2434_v53, %v3559_v29 }
 0x9bc   :  { %v2436_v49 = vpop.f32.mrf.mxu0  ;;  %v2476_v35 = vpop.f32.mrf.mxu1 }
 0x9bd   :  { %2215 = vst [vmem:[#allocation2 + $0x8] sm:$0xff] %v2207_v43  ;;  %v2184_v54 = vadd.f32 %v2474_v44, %v2119_v31  ;;  %v2437_v40 = vadd.f32 %v2436_v49, %v2435_v55  ;;  %v2477_v61 = vadd.f32 %v2476_v35, %v2475_v39 }
 0x9be   :  { %v2438_v27 = vpop.f32.mrf.mxu0  ;;  %v2478_v2 = vpop.f32.mrf.mxu1 }
 0x9bf   :  { %v2208_v57 = vadd.f32 %v2184_v54, %v3213_v48  ;;  %v2122_v60 = vadd.f32 %v2437_v40, %v3559_v29 }
 0x9c0   :  { %v2439_v58 = vpop.f32.mrf.mxu0  ;;  %v2479_v59 = vpop.f32.mrf.mxu1 }
 0x9c1   :  { %2216 = vst [vmem:[#allocation2 + $0x10] sm:$0xff] %v2208_v57  ;;  %v2187_v33 = vadd.f32 %v2477_v61, %v2122_v60  ;;  %v2440_v51 = vadd.f32 %v2439_v58, %v2438_v27  ;;  %v2480_v56 = vadd.f32 %v2479_v59, %v2478_v2 }
 0x9c2   :  { %v2441_v13 = vpop.f32.mrf.mxu0  ;;  %v2481_v42 = vpop.f32.mrf.mxu1 }
 0x9c3   :  { %v2209_v46 = vadd.f32 %v2187_v33, %v3221_v50  ;;  %v2127_v45 = vadd.f32 %v2440_v51, %v3559_v29 }
 0x9c4   :  { %v2442_v62 = vpop.f32.mrf.mxu0  ;;  %v2482_v47 = vpop.f32.mrf.mxu1 }
 0x9c5   :  { %2217 = vst [vmem:[#allocation2 + $0x18] sm:$0xff] %v2209_v46  ;;  %v2192_v3 = vadd.f32 %v2480_v56, %v2127_v45  ;;  %v2443_v48 = vadd.f32 %v2442_v62, %v2441_v13  ;;  %v2483_v11 = vadd.f32 %v2482_v47, %v2481_v42 }
 0x9c6   :  { %v2444_v14 = vpop.f32.mrf.mxu0  ;;  %v2484_v24 = vpop.f32.mrf.mxu1 }
 0x9c7   :  { %v2210_v23 = vadd.f32 %v2192_v3, %v3225_v38  ;;  %v2130_v4 = vadd.f32 %v2443_v48, %v3559_v29 }
 0x9c8   :  { %v2445_v0 = vpop.f32.mrf.mxu0  ;;  %v2485_v15 = vpop.f32.mrf.mxu1 }
 0x9c9   :  { %2218 = vst [vmem:[#allocation2 + $0x20] sm:$0xff] %v2210_v23  ;;  %v2195_v63 = vadd.f32 %v2483_v11, %v2130_v4  ;;  %v2446_v50 = vadd.f32 %v2445_v0, %v2444_v14  ;;  %v2486_v5 = vadd.f32 %v2485_v15, %v2484_v24 }
 0x9ca   :  { %v2447_v52 = vpop.f32.mrf.mxu0  ;;  %v2487_v16 = vpop.f32.mrf.mxu1 }
 0x9cb   :  { %v2211_v28 = vadd.f32 %v2195_v63, %v3232_v41  ;;  %v2135_v1 = vadd.f32 %v2446_v50, %v3559_v29 }
 0x9cc   :  { %v2448_v6 = vpop.f32.mrf.mxu0  ;;  %v2488_v7 = vpop.f32.mrf.mxu1 }
 0x9cd   :  { %2219 = vst [vmem:[#allocation2 + $0x28] sm:$0xff] %v2211_v28  ;;  %v2200_v9 = vadd.f32 %v2486_v5, %v2135_v1  ;;  %v2449_v38 = vadd.f32 %v2448_v6, %v2447_v52  ;;  %v2489_v17 = vadd.f32 %v2488_v7, %v2487_v16 }
 0x9cf   :  { %v2212_v10 = vadd.f32 %v2200_v9, %v3229_v8  ;;  %v2138_v12 = vadd.f32 %v2449_v38, %v3559_v29 }
 0x9d1   :  { %2220 = vst [vmem:[#allocation2 + $0x30] sm:$0xff] %v2212_v10  ;;  %v2203_v19 = vadd.f32 %v2489_v17, %v2138_v12 }
 0x9d3   :  { %v2213_v20 = vadd.f32 %v2203_v19, %v3237_v18 }
 0x9d5   :  { %2221 = vst [vmem:[#allocation2 + $0x38] sm:$0xff] %v2213_v20 }
 0x9d6   :  { %2805 = shalt.err (!%p2802_p4)
}
 0x9d7   :  { %s2820_s24 = smov 128   ;;  %s2821_s2 = smov 8  }
 0x9d8   :  { %2233 = dma.vmem_to_hbm [thread:$0]  %s2228_s23, 1024, %s3595_s15, [#allocation3], %s2820_s24, %s2820_s24, %s2821_s2  }
 0x9d9   :  { %2814 = dma.done.wait [#allocation3], 1024  }
 0x9da   :  { %2815 = vsyncadd [#allocation3], 4294966272 }
 0x9db   :  { %2237 = vsyncpa [#allocation3], 1 }

// kernel: encoder_forward.1
= control target key start
LH: loop header
LB: loop body
LE: loop exit
PB: predicated region body
PF: predicated region fallthrough
CT: control target
= control target key end

     0   :  { %v2816_v2 = vmov 0   ;;  %s3580_s0 = inlined_call_operand.vmem [shape: s32[64,1], index: 0, kind: input, shape index: {}]   ;;  %s3581_s1 = inlined_call_operand.vmem [shape: f32[16,128], index: 1, kind: input, shape index: {}]   ;;  %s3582_s2 = inlined_call_operand.vmem [shape: f32[16,128], index: 2, kind: input, shape index: {}]   ;;  %s3583_s3 = inlined_call_operand.vmem [shape: f32[16,16], index: 3, kind: input, shape index: {}]   ;;  %s3584_s4 = inlined_call_operand.vmem [shape: f32[1,128], index: 4, kind: input, shape index: {}]   ;;  %s3585_s5 = inlined_call_operand.vmem [shape: f32[1,128], index: 5, kind: input, shape index: {}]   ;;  %s3586_s6 = inlined_call_operand.vmem [shape: bf16[128,384], index: 6, kind: input, shape index: {}]   ;;  %s3587_s7 = inlined_call_operand.vmem [shape: bf16[128,128], index: 7, kind: input, shape index: {}]   ;;  %s3588_s8 = inlined_call_operand.vmem [shape: f32[1,128], index: 8, kind: input, shape index: {}]   ;;  %s3589_s9 = inlined_call_operand.vmem [shape: f32[1,128], index: 9, kind: input, shape index: {}]   ;;  %s3590_s10 = inlined_call_operand.vmem [shape: f32[1,128], index: 10, kind: input, shape index: {}]   ;;  %s3591_s11 = inlined_call_operand.vmem [shape: bf16[128,512], index: 11, kind: input, shape index: {}]   ;;  %s3592_s12 = inlined_call_operand.vmem [shape: f32[1,512], index: 12, kind: input, shape index: {}]   ;;  %s3593_s13 = inlined_call_operand.vmem [shape: bf16[512,128], index: 13, kind: input, shape index: {}]   ;;  %s3594_s14 = inlined_call_operand.vmem [shape: f32[1,128], index: 14, kind: input, shape index: {}]   ;;  %s3595_s15 = inlined_call_operand.hbm [shape: f32[4,16,128], index: 15, kind: output, shape index: {}]  }
   0x1   :  { %v54_v0 = vld [vmem:[%s3580_s0 + $0x10] sm:$0xff]  ;;  %v52_v1 = vld [vmem:[%s3580_s0] sm:$0xff]  ;;  %2609 = vset.pattern.permute.xlu1 %v2816_v2  ;;  %2608 = vset.pattern.permute.xlu0 %v2816_v2  ;;  %v55_v3 = vld [vmem:[%s3580_s0 + $0x18] sm:$0xff] }
   0x2   :  { %69 = vperm.xlu1 %2609, %v54_v0   ;;  %63 = vperm.xlu0 %2608, %v52_v1   ;;  %v53_v4 = vld [vmem:[%s3580_s0 + $0x8] sm:$0xff]  ;;  %v110_v6 = vld [vmem:[%s3581_s1] sm:$0xff]  ;;  %v59_v9 = vld [vmem:[%s3580_s0 + $0x38] sm:$0xff] }
   0x3   :  { %v111_v5 = vld [vmem:[%s3581_s1 + $0x8] sm:$0xff]  ;;  %567 = vmatprep.mubr.bf16.mxu1 %v2816_v2  ;;  %v56_v8 = vld [vmem:[%s3580_s0 + $0x20] sm:$0xff]  ;;  %v58_v10 = vld [vmem:[%s3580_s0 + $0x30] sm:$0xff] }
   0x4   :  { %2490 = vmatprep.subr.mxu0 %v111_v5  ;;  %v57_v7 = vld [vmem:[%s3580_s0 + $0x28] sm:$0xff] }
   0x5   :  { %2491 = vmatpush3.msra.mxu0 %v111_v5 }
   0x6   :  { %2492 = vmatprep.subr.mxu0 %v110_v6  ;;  %72 = vperm.xlu1 %2609, %v55_v3  }
   0x7   :  { %66 = vperm.xlu0 %2608, %v53_v4   ;;  %2493 = vmatpush3.msra.mxu0 %v110_v6 }
   0xa   :  { %78 = vperm.xlu1 %2609, %v57_v7  }
   0xb   :  { %75 = vperm.xlu0 %2608, %v56_v8  }
   0xe   :  { %84 = vperm.xlu1 %2609, %v59_v9  }
   0xf   :  { %81 = vperm.xlu0 %2608, %v58_v10  }
  0x10   :  { %20 = vsyncpa [#allocation3], 0  ;;  %v60_v11 = vlaneseq  ;;  %vm112_vm0 = vcmask 130048   ;;  %v2817_v15 = vmov 0.0   ;;  %v243_v30 = vld [vmem:[%s3582_s2 + $0x8] sm:$0xff]  ;;  %v242_v32 = vld [vmem:[%s3582_s2] sm:$0xff] }
  0x11   :  { %v2610_v48 = vld [vmem:[%s3586_s6 + $0xac] ss:$12 sps:$4 sm:$0xff]   ;;  %v2612_v49 = vld [vmem:[%s3586_s6 + $0xa8] ss:$12 sps:$4 sm:$0xff]   ;;  %vm2818_vm9 = vmmov 0  }
  0x12   :  { %v61_v12 = vand.u32 127, %v60_v11  ;;  %535 = vmatprep.subr.bf16.mxu1 %v2610_v48  ;;  %v2639_v48 = vld [vmem:[%s3586_s6] ss:$12 sps:$4 sm:$0xff]  }
  0x13   :  { %536 = vmatpush1.bf16.msra.mxu1 %v2612_v49  ;;  %v2640_v49 = vld [vmem:[%s3586_s6 + $0x20] ss:$12 sps:$4 sm:$0xff]  }
  0x7d   :  { %v70_v13 = vpop.permute.xlu1 %69  ;;  %v64_v14 = vpop.permute.xlu0 %63 }
  0x7e   :  { %vm86_vm1 = vcmp.eq.s32.totalorder %v64_v14, %v61_v12  ;;  %vm88_vm2 = vcmp.eq.s32.totalorder %v70_v13, %v61_v12  ;;  %v2615_v13 = vld [vmem:[%s3586_s6 + $0x90] ss:$12 sps:$4 sm:$0xff]  }
  0x7f   :  { %v2238_v16 = vsel %vm86_vm1, 1.0, %v2817_v15  ;;  %v2240_v19 = vsel %vm88_vm2, 1.0, %v2817_v15 }
  0x80   :  { %2494 = vmatprep.mubr.msk.f32.mxu0 %vm112_vm0, %v2238_v16 }
  0x81   :  { %v73_v17 = vpop.permute.xlu1 %72 }
  0x82   :  { %v67_v18 = vpop.permute.xlu0 %66  ;;  %vm89_vm4 = vcmp.eq.s32.totalorder %v73_v17, %v61_v12 }
  0x83   :  { %vm87_vm3 = vcmp.eq.s32.totalorder %v67_v18, %v61_v12  ;;  %v2241_v23 = vsel %vm89_vm4, 1.0, %v2817_v15 }
  0x84   :  { %v2239_v20 = vsel %vm87_vm3, 1.0, %v2817_v15 }
  0x85   :  { %2495 = vmatmul.mubr.msk.f32.vlgmr.msra.gmra.mxu0 %vm112_vm0, %v2239_v20  ;;  %v79_v21 = vpop.permute.xlu1 %78 }
  0x86   :  { %v76_v22 = vpop.permute.xlu0 %75  ;;  %2497 = vmatprep.mubr.msk.f32.mxu0 %vm112_vm0, %v2240_v19  ;;  %vm91_vm6 = vcmp.eq.s32.totalorder %v79_v21, %v61_v12  ;;  %v2616_v21 = vld [vmem:[%s3586_s6 + $0x7c] ss:$12 sps:$4 sm:$0xff]  }
  0x87   :  { %vm90_vm5 = vcmp.eq.s32.totalorder %v76_v22, %v61_v12  ;;  %v2243_v27 = vsel %vm91_vm6, 1.0, %v2817_v15  ;;  %v2618_v22 = vld [vmem:[%s3586_s6 + $0xb0] ss:$12 sps:$4 sm:$0xff]  }
  0x88   :  { %v2242_v24 = vsel %vm90_vm5, 1.0, %v2817_v15  ;;  %2506 = vmatprep.subr.bf16.mxu0 %v2618_v22 }
  0x89   :  { %2498 = vmatmul.mubr.msk.f32.gmra.mxu0 %vm112_vm0, %v2241_v23  ;;  %v85_v25 = vpop.permute.xlu1 %84  ;;  %v2619_v23 = vld [vmem:[%s3586_s6 + $0x78] ss:$12 sps:$4 sm:$0xff]  }
  0x8a   :  { %2500 = vmatprep.mubr.msk.f32.mxu0 %vm112_vm0, %v2242_v24  ;;  %v82_v26 = vpop.permute.xlu0 %81  ;;  %vm93_vm8 = vcmp.eq.s32.totalorder %v85_v25, %v61_v12  ;;  %2507 = vmatpush3.bf16.msra.mxu0 %v2618_v22 }
  0x8b   :  { %vm92_vm7 = vcmp.eq.s32.totalorder %v82_v26, %v61_v12  ;;  %v2245_v29 = vsel %vm93_vm8, 1.0, %v2817_v15  ;;  %v2613_v12 = vld [vmem:[%s3586_s6 + $0x94] ss:$12 sps:$4 sm:$0xff]   ;;  %v2620_v26 = vld [vmem:[%s3586_s6 + $0x64] ss:$12 sps:$4 sm:$0xff]  }
  0x8c   :  { %v2244_v28 = vsel %vm92_vm7, 1.0, %v2817_v15  ;;  %537 = vmatprep.subr.bf16.mxu1 %v2613_v12 }
  0x8d   :  { %2501 = vmatmul.mubr.msk.f32.gmra.mxu0 %vm112_vm0, %v2243_v27  ;;  %538 = vmatpush1.bf16.msra.mxu1 %v2615_v13  ;;  %v2622_v27 = vld [vmem:[%s3586_s6 + $0x98] ss:$12 sps:$4 sm:$0xff]  }
  0x8e   :  { %2503 = vmatprep.mubr.msk.f32.mxu0 %vm112_vm0, %v2244_v28  ;;  %539 = vmatprep.subr.bf16.mxu1 %v2616_v21  ;;  %v2623_v28 = vld [vmem:[%s3586_s6 + $0x60] ss:$12 sps:$4 sm:$0xff]  }
  0x8f   :  { %2508 = vmatprep.subr.bf16.mxu0 %v2622_v27 }
  0x90   :  { %2509 = vmatpush3.bf16.msra.mxu0 %v2622_v27 }
  0x91   :  { %2504 = vmatmul.mubr.msk.f32.gmra.mxu0 %vm112_vm0, %v2245_v29  ;;  %540 = vmatpush1.bf16.msra.mxu1 %v2619_v23  ;;  %v2624_v29 = vld [vmem:[%s3586_s6 + $0x4c] ss:$12 sps:$4 sm:$0xff]  }
  0x92   :  { %541 = vmatprep.subr.bf16.mxu1 %v2620_v26 }
  0x95   :  { %542 = vmatpush1.bf16.msra.mxu1 %v2623_v28  ;;  %v2255_v28 = vld [vmem:[%s3585_s5] ss:$0 sm:$0xff] }
  0x96   :  { %543 = vmatprep.subr.bf16.mxu1 %v2624_v29 }
 0x145   :  { %v2496_v31 = vpop.f32.mrf.mxu0 }
 0x146   :  { %v2958_v33 = vadd.f32 %v2496_v31, %v243_v30  ;;  %v2627_v31 = vld [vmem:[%s3586_s6 + $0x48] ss:$12 sps:$4 sm:$0xff]  }
 0x147   :  { %v203_v34 = vpop.f32.mrf.mxu0  ;;  %544 = vmatpush1.bf16.msra.mxu1 %v2627_v31 }
 0x148   :  { %v2960_v35 = vadd.f32 %v242_v32, %v203_v34  ;;  %256 = vadd.xlane.f32.xlu1 %v2958_v33  ;;  %v2630_v34 = vld [vmem:[%s3586_s6 + $0x68] ss:$12 sps:$4 sm:$0xff]  }
 0x149   :  { %v2499_v36 = vpop.f32.mrf.mxu0 }
 0x14a   :  { %254 = vadd.xlane.f32.xlu0 %v2960_v35  ;;  %v2967_v41 = vadd.f32 %v2499_v36, %v243_v30  ;;  %v2631_v36 = vld [vmem:[%s3586_s6 + $0x30] ss:$12 sps:$4 sm:$0xff]  }
 0x14b   :  { %v213_v37 = vpop.f32.mrf.mxu0 }
 0x14c   :  { %v2964_v38 = vadd.f32 %v242_v32, %v213_v37  ;;  %v2632_v37 = vld [vmem:[%s3586_s6 + $0x1c] ss:$12 sps:$4 sm:$0xff]  }
 0x14d   :  { %v2502_v39 = vpop.f32.mrf.mxu0 }
 0x14e   :  { %258 = vadd.xlane.f32.xlu0 %v2964_v38  ;;  %v2973_v45 = vadd.f32 %v2502_v39, %v243_v30  ;;  %v2634_v39 = vld [vmem:[%s3586_s6 + $0x50] ss:$12 sps:$4 sm:$0xff]  }
 0x14f   :  { %v223_v40 = vpop.f32.mrf.mxu0 }
 0x150   :  { %v2969_v42 = vadd.f32 %v242_v32, %v223_v40  ;;  %v2635_v40 = vld [vmem:[%s3586_s6 + $0x18] ss:$12 sps:$4 sm:$0xff]  }
 0x151   :  { %v2505_v43 = vpop.f32.mrf.mxu0 }
 0x152   :  { %260 = vadd.xlane.f32.xlu0 %v2967_v41  ;;  %262 = vadd.xlane.f32.xlu1 %v2969_v42  ;;  %v2979_v47 = vadd.f32 %v2505_v43, %v243_v30  ;;  %v2626_v30 = vld [vmem:[%s3586_s6 + $0x80] ss:$12 sps:$4 sm:$0xff]   ;;  %v2636_v43 = vld [vmem:[%s3586_s6 + $0x4] ss:$12 sps:$4 sm:$0xff]  }
 0x153   :  { %v233_v44 = vpop.f32.mrf.mxu0  ;;  %2510 = vmatprep.subr.bf16.mxu0 %v2626_v30 }
 0x154   :  { %v2975_v46 = vadd.f32 %v242_v32, %v233_v44  ;;  %2511 = vmatpush3.bf16.msra.mxu0 %v2626_v30  ;;  %v2628_v32 = vld [vmem:[%s3586_s6 + $0x34] ss:$12 sps:$4 sm:$0xff]   ;;  %v2638_v44 = vld [vmem:[%s3586_s6 + $0x38] ss:$12 sps:$4 sm:$0xff]  }
 0x155   :  { %545 = vmatprep.subr.bf16.mxu1 %v2628_v32  ;;  %2512 = vmatprep.subr.bf16.mxu0 %v2630_v34 }
 0x156   :  { %264 = vadd.xlane.f32.xlu0 %v2973_v45  ;;  %266 = vadd.xlane.f32.xlu1 %v2975_v46 }
 0x157   :  { %546 = vmatpush1.bf16.msra.mxu1 %v2631_v36 }
 0x158   :  { %2513 = vmatpush3.bf16.msra.mxu0 %v2630_v34  ;;  %547 = vmatprep.subr.bf16.mxu1 %v2632_v37 }
 0x159   :  { %2514 = vmatprep.subr.bf16.mxu0 %v2634_v39 }
 0x15a   :  { %268 = vadd.xlane.f32.xlu0 %v2979_v47 }
 0x15b   :  { %548 = vmatpush1.bf16.msra.mxu1 %v2635_v40 }
 0x15c   :  { %2515 = vmatpush3.bf16.msra.mxu0 %v2634_v39  ;;  %549 = vmatprep.subr.bf16.mxu1 %v2636_v43 }
 0x15d   :  { %2516 = vmatprep.subr.bf16.mxu0 %v2638_v44 }
 0x15f   :  { %550 = vmatpush1.bf16.msra.mxu1 %v2639_v48 }
 0x160   :  { %2517 = vmatpush3.bf16.msra.mxu0 %v2638_v44  ;;  %2566 = vmatprep.subr.bf16.mxu1 %v2817_v15 }
 0x161   :  { %2518 = vmatprep.subr.bf16.mxu0 %v2640_v49 }
 0x164   :  { %2519 = vmatpush3.bf16.msra.mxu0 %v2640_v49 }
 0x1d1   :  { %v257_v50 = vpop.xlane.xlu1 %256 }
 0x1d2   :  { %v272_v51 = vmul.f32 0.0078125, %v257_v50  ;;  %v2641_v50 = vld [vmem:[%s3586_s6 + $0x8] ss:$12 sps:$4 sm:$0xff]  }
 0x1d3   :  { %v255_v52 = vpop.xlane.xlu0 %254  ;;  %2520 = vmatprep.subr.bf16.mxu0 %v2641_v50 }
 0x1d4   :  { %v2989_v53 = vsub.f32 %v2958_v33, %v272_v51  ;;  %v271_v54 = vmul.f32 0.0078125, %v255_v52  ;;  %2521 = vmatpush3.bf16.msra.mxu0 %v2641_v50 }
 0x1d5   :  { %2530 = vmatprep.subr.bf16.mxu0 %v2817_v15 }
 0x1d6   :  { %v2992_v55 = vsub.f32 %v2960_v35, %v271_v54  ;;  %v288_v56 = vmul.f32 %v2989_v53, %v2989_v53 }
 0x1d7   :  { %v259_v57 = vpop.xlane.xlu0 %258 }
 0x1d8   :  { %v273_v58 = vmul.f32 0.0078125, %v259_v57  ;;  %297 = vadd.xlane.f32.xlu0 %v288_v56  ;;  %v287_v59 = vmul.f32 %v2992_v55, %v2992_v55 }
 0x1da   :  { %v2999_v60 = vsub.f32 %v2964_v38, %v273_v58  ;;  %295 = vadd.xlane.f32.xlu1 %v287_v59 }
 0x1db   :  { %v263_v61 = vpop.xlane.xlu1 %262  ;;  %v261_v62 = vpop.xlane.xlu0 %260 }
 0x1dc   :  { %v275_v63 = vmul.f32 0.0078125, %v263_v61  ;;  %v274_v0 = vmul.f32 0.0078125, %v261_v62  ;;  %v289_v1 = vmul.f32 %v2999_v60, %v2999_v60 }
 0x1de   :  { %v3004_v3 = vsub.f32 %v2969_v42, %v275_v63  ;;  %v3007_v4 = vsub.f32 %v2967_v41, %v274_v0  ;;  %299 = vadd.xlane.f32.xlu1 %v289_v1 }
 0x1df   :  { %v267_v5 = vpop.xlane.xlu1 %266  ;;  %v265_v6 = vpop.xlane.xlu0 %264 }
 0x1e0   :  { %v277_v7 = vmul.f32 0.0078125, %v267_v5  ;;  %v276_v8 = vmul.f32 0.0078125, %v265_v6  ;;  %v291_v9 = vmul.f32 %v3004_v3, %v3004_v3  ;;  %v290_v10 = vmul.f32 %v3007_v4, %v3007_v4 }
 0x1e2   :  { %v3020_v14 = vsub.f32 %v2975_v46, %v277_v7  ;;  %v3023_v16 = vsub.f32 %v2973_v45, %v276_v8  ;;  %303 = vadd.xlane.f32.xlu1 %v291_v9  ;;  %301 = vadd.xlane.f32.xlu0 %v290_v10 }
 0x1e3   :  { %v269_v17 = vpop.xlane.xlu0 %268 }
 0x1e4   :  { %v278_v18 = vmul.f32 0.0078125, %v269_v17  ;;  %v293_v19 = vmul.f32 %v3020_v14, %v3020_v14  ;;  %v292_v20 = vmul.f32 %v3023_v16, %v3023_v16 }
 0x1e6   :  { %v3039_v24 = vsub.f32 %v2979_v47, %v278_v18  ;;  %307 = vadd.xlane.f32.xlu1 %v293_v19  ;;  %305 = vadd.xlane.f32.xlu0 %v292_v20  ;;  %v2254_v20 = vld [vmem:[%s3584_s4] ss:$0 sm:$0xff] }
 0x1e8   :  { %v294_v25 = vmul.f32 %v3039_v24, %v3039_v24 }
 0x1ea   :  { %309 = vadd.xlane.f32.xlu0 %v294_v25 }
 0x261   :  { %v298_v51 = vpop.xlane.xlu0 %297 }
 0x262   :  { %v312_v52 = vmul.f32 0.0078125, %v298_v51 }
 0x263   :  { %v296_v54 = vpop.xlane.xlu1 %295 }
 0x264   :  { %v320_v56 = vadd.f32 1e-05, %v312_v52  ;;  %v311_v57 = vmul.f32 0.0078125, %v296_v54 }
 0x266   :  { %2730 = vrsqrt.f32 %v320_v56  ;;  %v319_v58 = vadd.f32 1e-05, %v311_v57 }
 0x267   :  { %v300_v59 = vpop.xlane.xlu1 %299 }
 0x268   :  { %2732 = vrsqrt.f32 %v319_v58  ;;  %v313_v61 = vmul.f32 0.0078125, %v300_v59 }
 0x26a   :  { %v321_v62 = vadd.f32 1e-05, %v313_v61 }
 0x26b   :  { %v304_v63 = vpop.xlane.xlu1 %303  ;;  %v302_v0 = vpop.xlane.xlu0 %301 }
 0x26c   :  { %2734 = vrsqrt.f32 %v321_v62  ;;  %v315_v1 = vmul.f32 0.0078125, %v304_v63  ;;  %v314_v5 = vmul.f32 0.0078125, %v302_v0 }
 0x26e   :  { %v323_v6 = vadd.f32 1e-05, %v315_v1  ;;  %v322_v7 = vadd.f32 1e-05, %v314_v5 }
 0x26f   :  { %v308_v8 = vpop.xlane.xlu1 %307  ;;  %v306_v9 = vpop.xlane.xlu0 %305 }
 0x270   :  { %2736 = vrsqrt.f32 %v323_v6  ;;  %v317_v10 = vmul.f32 0.0078125, %v308_v8  ;;  %v316_v12 = vmul.f32 0.0078125, %v306_v9 }
 0x271   :  { %2738 = vrsqrt.f32 %v322_v7 }
 0x272   :  { %v325_v13 = vadd.f32 1e-05, %v317_v10  ;;  %v324_v17 = vadd.f32 1e-05, %v316_v12 }
 0x273   :  { %v2731_v18 = vpop.eup %2730  ;;  %v310_v19 = vpop.xlane.xlu0 %309 }
 0x274   :  { %2740 = vrsqrt.f32 %v325_v13  ;;  %v318_v21 = vmul.f32 0.0078125, %v310_v19  ;;  %v336_v22 = vmul.f32 %v2731_v18, %v2989_v53 }
 0x275   :  { %v2733_v23 = vpop.eup %2732  ;;  %2742 = vrsqrt.f32 %v324_v17 }
 0x276   :  { %v326_v25 = vadd.f32 1e-05, %v318_v21  ;;  %v335_v26 = vmul.f32 %v2733_v23, %v2992_v55  ;;  %v350_v27 = vmul.f32 %v2254_v20, %v336_v22 }
 0x278   :  { %2744 = vrsqrt.f32 %v326_v25  ;;  %v349_v29 = vmul.f32 %v2254_v20, %v335_v26  ;;  %v364_v32 = vadd.f32 %v2255_v28, %v350_v27 }
 0x279   :  { %v2735_v30 = vpop.eup %2734 }
 0x27a   :  { %v363_v31 = vadd.f32 %v2255_v28, %v349_v29  ;;  %v337_v34 = vmul.f32 %v2735_v30, %v2999_v60 }
 0x27c   :  { %v371_v36 = vpack.c.bf16 %v364_v32, %v363_v31  ;;  %v351_v39 = vmul.f32 %v2254_v20, %v337_v34 }
 0x27d   :  { %v2737_v37 = vpop.eup %2736 }
 0x27e   :  { %v2739_v53 = vpop.eup %2738  ;;  %568 = vmatmul.mubr.bf16.vlgmr.msra.gmra.mxu1 %v371_v36  ;;  %2522 = vmatprep.mubr.bf16.mxu0 %v371_v36  ;;  %v339_v40 = vmul.f32 %v2737_v37, %v3004_v3  ;;  %v365_v50 = vadd.f32 %v2255_v28, %v351_v39 }
 0x27f   :  { %577 = vmatprep.mubr.bf16.mxu1 %v2816_v2  ;;  %v338_v55 = vmul.f32 %v2739_v53, %v3007_v4 }
 0x280   :  { %v353_v52 = vmul.f32 %v2254_v20, %v339_v40 }
 0x281   :  { %v2741_v43 = vpop.eup %2740  ;;  %v352_v44 = vmul.f32 %v2254_v20, %v338_v55 }
 0x282   :  { %v2743_v48 = vpop.eup %2742  ;;  %v341_v49 = vmul.f32 %v2741_v43, %v3020_v14  ;;  %v367_v4 = vadd.f32 %v2255_v28, %v353_v52 }
 0x283   :  { %v366_v51 = vadd.f32 %v2255_v28, %v352_v44  ;;  %v340_v60 = vmul.f32 %v2743_v48, %v3023_v16 }
 0x284   :  { %v355_v59 = vmul.f32 %v2254_v20, %v341_v49 }
 0x285   :  { %v2745_v54 = vpop.eup %2744  ;;  %v372_v56 = vpack.c.bf16 %v366_v51, %v365_v50  ;;  %v354_v57 = vmul.f32 %v2254_v20, %v340_v60  ;;  %v857_v50 = vld [vmem:[%s3583_s3] sm:$0xff] }
 0x286   :  { %v342_v58 = vmul.f32 %v2745_v54, %v3039_v24  ;;  %v369_v14 = vadd.f32 %v2255_v28, %v355_v59 }
 0x287   :  { %578 = vmatmul.mubr.bf16.gmra.mxu1 %v372_v56  ;;  %2523 = vmatmul.mubr.bf16.vlgmr.msra.gmra.mxu0 %v372_v56  ;;  %v368_v3 = vadd.f32 %v2255_v28, %v354_v57  ;;  %v858_v56 = vld [vmem:[%s3583_s3 + $0x8] sm:$0xff] }
 0x288   :  { %587 = vmatprep.mubr.bf16.mxu1 %v2816_v2  ;;  %v356_v61 = vmul.f32 %v2254_v20, %v342_v58 }
 0x289   :  { %v373_v62 = vpack.c.bf16 %v368_v3, %v367_v4 }
 0x28a   :  { %v370_v63 = vadd.f32 %v2255_v28, %v356_v61 }
 0x28b   :  { %2526 = vmatprep.mubr.bf16.mxu0 %v373_v62 }
 0x28c   :  { %v374_v0 = vpack.c.bf16 %v370_v63, %v369_v14 }
 0x28f   :  { %588 = vmatmul.mubr.bf16.gmra.mxu1 %v373_v62  ;;  %2527 = vmatmul.mubr.bf16.gmra.mxu0 %v374_v0 }
 0x290   :  { %597 = vmatprep.mubr.bf16.mxu1 %v2816_v2  ;;  %2532 = vmatprep.mubr.msk.bf16.mxu0 %vm2818_vm9, %v2817_v15 }
 0x297   :  { %598 = vmatmul.mubr.bf16.gmra.mxu1 %v374_v0 }
 0x298   :  { %2568 = vmatprep.mubr.msk.bf16.mxu1 %vm2818_vm9, %v2817_v15 }
 0x33e   :  { %v569_v16 = vpop.f32.mrf.mxu1 }
 0x340   :  { %v571_v24 = vpop.f32.mrf.mxu1 }
 0x342   :  { %v573_v1 = vpop.f32.mrf.mxu1 }
 0x343   :  { %v673_v17 = vpack.c.bf16 %v573_v1, %v569_v16 }
 0x344   :  { %v575_v5 = vpop.f32.mrf.mxu1 }
 0x345   :  { %v677_v6 = vpack.c.bf16 %v575_v5, %v571_v24 }
 0x347   :  { %v579_v7 = vpop.f32.mrf.mxu1  ;;  %v3117_v8 = vpop.f32.mrf.mxu0  ;;  %2531 = vmatpush3.bf16.xpose.msra.mxu0 %v677_v6 }
 0x348   :  { %2536 = vmatprep.subr.bf16.mxu0 %v2817_v15 }
 0x349   :  { %v581_v9 = vpop.f32.mrf.mxu1  ;;  %v642_v10 = vpop.f32.mrf.mxu0 }
 0x34b   :  { %v583_v12 = vpop.f32.mrf.mxu1  ;;  %v3120_v13 = vpop.f32.mrf.mxu0 }
 0x34c   :  { %v682_v18 = vpack.c.bf16 %v3120_v13, %v3117_v8  ;;  %v674_v30 = vpack.c.bf16 %v583_v12, %v579_v7 }
 0x34d   :  { %v585_v19 = vpop.f32.mrf.mxu1  ;;  %v645_v20 = vpop.f32.mrf.mxu0 }
 0x34e   :  { %v678_v21 = vpack.c.bf16 %v585_v19, %v581_v9  ;;  %2533 = vmatmul.mubr.bf16.vlgmr.msra.gmra.mxu0 %v673_v17  ;;  %v681_v48 = vpack.c.bf16 %v645_v20, %v642_v10 }
 0x34f   :  { %v589_v22 = vpop.f32.mrf.mxu1  ;;  %v3124_v23 = vpop.f32.mrf.mxu0  ;;  %2538 = vmatprep.mubr.msk.bf16.mxu0 %vm2818_vm9, %v2817_v15 }
 0x350   :  { %2537 = vmatpush3.bf16.xpose.msra.mxu0 %v678_v21 }
 0x351   :  { %v591_v25 = vpop.f32.mrf.mxu1  ;;  %v658_v26 = vpop.f32.mrf.mxu0  ;;  %2542 = vmatprep.subr.bf16.mxu0 %v2817_v15 }
 0x353   :  { %v593_v27 = vpop.f32.mrf.mxu1  ;;  %v3129_v28 = vpop.f32.mrf.mxu0 }
 0x354   :  { %v684_v29 = vpack.c.bf16 %v3129_v28, %v3124_v23  ;;  %v675_v39 = vpack.c.bf16 %v593_v27, %v589_v22  ;;  %v2644_v23 = vld [vmem:[%s3587_s7 + $0x28] sm:$0xff]  }
 0x355   :  { %v595_v31 = vpop.f32.mrf.mxu1  ;;  %v661_v32 = vpop.f32.mrf.mxu0 }
 0x356   :  { %v679_v34 = vpack.c.bf16 %v595_v31, %v591_v25  ;;  %v683_v36 = vpack.c.bf16 %v661_v32, %v658_v26 }
 0x357   :  { %v599_v37 = vpop.f32.mrf.mxu1  ;;  %2539 = vmatmul.mubr.bf16.vlgmr.msra.gmra.mxu0 %v674_v30 }
 0x358   :  { %2543 = vmatpush3.bf16.xpose.msra.mxu0 %v679_v34  ;;  %2567 = vmatpush3.bf16.msra.mxu1 %v683_v36 }
 0x359   :  { %v601_v53 = vpop.f32.mrf.mxu1  ;;  %2544 = vmatprep.mubr.msk.bf16.mxu0 %vm2818_vm9, %v2817_v15  ;;  %2548 = vmatprep.subr.bf16.mxu0 %v2817_v15 }
 0x35b   :  { %v603_v55 = vpop.f32.mrf.mxu1 }
 0x35c   :  { %v676_v44 = vpack.c.bf16 %v603_v55, %v599_v37 }
 0x35d   :  { %v605_v40 = vpop.f32.mrf.mxu1 }
 0x35e   :  { %v680_v43 = vpack.c.bf16 %v605_v40, %v601_v53 }
 0x35f   :  { %2545 = vmatmul.mubr.bf16.vlgmr.msra.gmra.mxu0 %v675_v39 }
 0x360   :  { %2549 = vmatpush3.bf16.xpose.msra.mxu0 %v680_v43  ;;  %2550 = vmatprep.mubr.msk.bf16.mxu0 %vm2818_vm9, %v2817_v15 }
 0x361   :  { %2554 = vmatprep.subr.bf16.mxu0 %v2817_v15 }
 0x367   :  { %2551 = vmatmul.mubr.bf16.vlgmr.msra.gmra.mxu0 %v676_v44 }
 0x368   :  { %2555 = vmatpush3.bf16.msra.mxu0 %v681_v48  ;;  %2556 = vmatprep.mubr.msk.bf16.mxu0 %vm2818_vm9, %v2817_v15 }
 0x369   :  { %2560 = vmatprep.subr.bf16.mxu0 %v2817_v15 }
 0x40e   :  { %v719_v49 = vpop.f32.mrf.mxu0 }
 0x40f   :  { %v849_v51 = vmul.f32 0.088388346, %v719_v49 }
 0x410   :  { %v2534_v60 = vpop.f32.mrf.mxu0 }
 0x411   :  { %v859_v52 = vadd.f32 %v857_v50, %v849_v51 }
 0x412   :  { %v722_v54 = vpop.f32.mrf.mxu0 }
 0x413   :  { %v850_v57 = vmul.f32 0.088388346, %v722_v54  ;;  %v867_v58 = vsel %vm112_vm0, %v859_v52, -inf }
 0x414   :  { %868 = vmax.xlane.f32.xlu1 %v867_v58  ;;  %v2535_v59 = vpop.f32.mrf.mxu0 }
 0x415   :  { %v860_v4 = vadd.f32 %v858_v56, %v850_v57 }
 0x417   :  { %v760_v3 = vpop.f32.mrf.mxu0  ;;  %v870_v61 = vsel %vm112_vm0, %v860_v4, -inf }
 0x418   :  { %v851_v62 = vmul.f32 0.088388346, %v760_v3  ;;  %871 = vmax.xlane.f32.xlu0 %v870_v61 }
 0x419   :  { %v2540_v14 = vpop.f32.mrf.mxu0 }
 0x41a   :  { %v861_v63 = vadd.f32 %v857_v50, %v851_v62 }
 0x41b   :  { %v763_v0 = vpop.f32.mrf.mxu0 }
 0x41c   :  { %v852_v16 = vmul.f32 0.088388346, %v763_v0  ;;  %v873_v24 = vsel %vm112_vm0, %v861_v63, -inf }
 0x41d   :  { %874 = vmax.xlane.f32.xlu1 %v873_v24  ;;  %v2541_v1 = vpop.f32.mrf.mxu0 }
 0x41e   :  { %v862_v5 = vadd.f32 %v858_v56, %v852_v16 }
 0x41f   :  { %v801_v6 = vpop.f32.mrf.mxu0 }
 0x420   :  { %v853_v7 = vmul.f32 0.088388346, %v801_v6  ;;  %v876_v9 = vsel %vm112_vm0, %v862_v5, -inf }
 0x421   :  { %877 = vmax.xlane.f32.xlu0 %v876_v9  ;;  %v2546_v10 = vpop.f32.mrf.mxu0 }
 0x422   :  { %v863_v12 = vadd.f32 %v857_v50, %v853_v7 }
 0x423   :  { %v804_v17 = vpop.f32.mrf.mxu0 }
 0x424   :  { %v854_v19 = vmul.f32 0.088388346, %v804_v17  ;;  %v879_v20 = vsel %vm112_vm0, %v863_v12, -inf }
 0x425   :  { %880 = vmax.xlane.f32.xlu1 %v879_v20  ;;  %v2547_v21 = vpop.f32.mrf.mxu0 }
 0x426   :  { %v864_v22 = vadd.f32 %v858_v56, %v854_v19 }
 0x427   :  { %v842_v25 = vpop.f32.mrf.mxu0 }
 0x428   :  { %v855_v26 = vmul.f32 0.088388346, %v842_v25  ;;  %v882_v27 = vsel %vm112_vm0, %v864_v22, -inf }
 0x429   :  { %883 = vmax.xlane.f32.xlu0 %v882_v27  ;;  %v2552_v30 = vpop.f32.mrf.mxu0 }
 0x42a   :  { %v865_v31 = vadd.f32 %v857_v50, %v855_v26 }
 0x42b   :  { %v845_v32 = vpop.f32.mrf.mxu0 }
 0x42c   :  { %v856_v34 = vmul.f32 0.088388346, %v845_v32  ;;  %v885_v36 = vsel %vm112_vm0, %v865_v31, -inf }
 0x42d   :  { %886 = vmax.xlane.f32.xlu1 %v885_v36  ;;  %v2553_v37 = vpop.f32.mrf.mxu0 }
 0x42e   :  { %v866_v53 = vadd.f32 %v858_v56, %v856_v34 }
 0x430   :  { %v888_v55 = vsel %vm112_vm0, %v866_v53, -inf }
 0x431   :  { %889 = vmax.xlane.f32.xlu0 %v888_v55 }
 0x49d   :  { %v869_v39 = vpop.xlane.xlu1 %868 }
 0x49e   :  { %v891_v40 = vsub.f32 %v859_v52, %v869_v39 }
 0x4a0   :  { %v899_v43 = vmul.f32 1.442695, %v891_v40 }
 0x4a1   :  { %v872_v44 = vpop.xlane.xlu0 %871 }
 0x4a2   :  { %2746 = vpow2.f32 %v899_v43  ;;  %v892_v48 = vsub.f32 %v860_v4, %v872_v44 }
 0x4a4   :  { %v901_v49 = vmul.f32 1.442695, %v892_v48 }
 0x4a6   :  { %2748 = vpow2.f32 %v901_v49  ;;  %v875_v51 = vpop.xlane.xlu1 %874 }
 0x4a7   :  { %v893_v50 = vsub.f32 %v861_v63, %v875_v51 }
 0x4a9   :  { %v903_v60 = vmul.f32 1.442695, %v893_v50 }
 0x4aa   :  { %v878_v54 = vpop.xlane.xlu0 %877 }
 0x4ab   :  { %2750 = vpow2.f32 %v903_v60  ;;  %v894_v57 = vsub.f32 %v862_v5, %v878_v54 }
 0x4ad   :  { %v905_v58 = vmul.f32 1.442695, %v894_v57 }
 0x4ae   :  { %v881_v59 = vpop.xlane.xlu1 %880 }
 0x4af   :  { %v2747_v56 = vpop.eup %2746  ;;  %2752 = vpow2.f32 %v905_v58  ;;  %v895_v3 = vsub.f32 %v863_v12, %v881_v59 }
 0x4b0   :  { %v915_v61 = vsel %vm112_vm0, %v2747_v56, 0.0 }
 0x4b1   :  { %v907_v52 = vmul.f32 1.442695, %v895_v3  ;;  %916 = vadd.xlane.f32.xlu1 %v915_v61  ;;  %v2643_v3 = vld [vmem:[%s3587_s7 + $0x30] sm:$0xff]  }
 0x4b2   :  { %v884_v62 = vpop.xlane.xlu0 %883 }
 0x4b3   :  { %v2749_v14 = vpop.eup %2748  ;;  %2754 = vpow2.f32 %v907_v52  ;;  %v896_v4 = vsub.f32 %v864_v22, %v884_v62  ;;  %v2645_v62 = vld [vmem:[%s3587_s7 + $0x20] sm:$0xff]  }
 0x4b4   :  { %v918_v0 = vsel %vm112_vm0, %v2749_v14, 0.0 }
 0x4b5   :  { %v909_v63 = vmul.f32 1.442695, %v896_v4  ;;  %919 = vadd.xlane.f32.xlu0 %v918_v0  ;;  %v2647_v4 = vld [vmem:[%s3587_s7 + $0x10] sm:$0xff]   ;;  %v2648_v0 = vld [vmem:[%s3587_s7 + $0x8] sm:$0xff]  }
 0x4b6   :  { %v887_v16 = vpop.xlane.xlu1 %886 }
 0x4b7   :  { %2756 = vpow2.f32 %v909_v63  ;;  %v897_v24 = vsub.f32 %v865_v31, %v887_v16  ;;  %v2642_v31 = vld [vmem:[%s3587_s7 + $0x38] sm:$0xff]   ;;  %v2649_v63 = vld [vmem:[%s3587_s7] sm:$0xff]  }
 0x4b8   :  { %v2751_v1 = vpop.eup %2750  ;;  %2578 = vmatprep.subr.bf16.mxu1 %v2642_v31 }
 0x4b9   :  { %v911_v5 = vmul.f32 1.442695, %v897_v24  ;;  %v921_v6 = vsel %vm112_vm0, %v2751_v1, 0.0 }
 0x4ba   :  { %922 = vadd.xlane.f32.xlu1 %v921_v6  ;;  %v890_v7 = vpop.xlane.xlu0 %889 }
 0x4bb   :  { %2758 = vpow2.f32 %v911_v5  ;;  %v898_v9 = vsub.f32 %v866_v53, %v890_v7 }
 0x4bc   :  { %v2753_v10 = vpop.eup %2752 }
 0x4bd   :  { %v913_v12 = vmul.f32 1.442695, %v898_v9  ;;  %v924_v17 = vsel %vm112_vm0, %v2753_v10, 0.0 }
 0x4be   :  { %925 = vadd.xlane.f32.xlu0 %v924_v17 }
 0x4bf   :  { %2760 = vpow2.f32 %v913_v12 }
 0x4c0   :  { %v2755_v19 = vpop.eup %2754 }
 0x4c1   :  { %v927_v20 = vsel %vm112_vm0, %v2755_v19, 0.0 }
 0x4c2   :  { %928 = vadd.xlane.f32.xlu1 %v927_v20 }
 0x4c4   :  { %v2757_v21 = vpop.eup %2756 }
 0x4c5   :  { %v930_v22 = vsel %vm112_vm0, %v2757_v21, 0.0 }
 0x4c6   :  { %931 = vadd.xlane.f32.xlu0 %v930_v22 }
 0x4c8   :  { %v2759_v25 = vpop.eup %2758 }
 0x4c9   :  { %v933_v26 = vsel %vm112_vm0, %v2759_v25, 0.0 }
 0x4ca   :  { %934 = vadd.xlane.f32.xlu1 %v933_v26 }
 0x4cc   :  { %v2761_v27 = vpop.eup %2760 }
 0x4cd   :  { %v936_v30 = vsel %vm112_vm0, %v2761_v27, 0.0 }
 0x4ce   :  { %937 = vadd.xlane.f32.xlu0 %v936_v30 }
 0x53a   :  { %v917_v32 = vpop.xlane.xlu1 %916 }
 0x53b   :  { %2762 = vrcp.f32 %v917_v32 }
 0x53e   :  { %v920_v34 = vpop.xlane.xlu0 %919 }
 0x53f   :  { %2764 = vrcp.f32 %v920_v34 }
 0x543   :  { %v923_v36 = vpop.xlane.xlu1 %922 }
 0x544   :  { %2766 = vrcp.f32 %v923_v36  ;;  %v2284_v36 = vld [vmem:[%s3588_s8] ss:$0 sm:$0xff] }
 0x547   :  { %v926_v37 = vpop.xlane.xlu0 %925 }
 0x548   :  { %2768 = vrcp.f32 %v926_v37  ;;  %v2763_v53 = vpop.eup %2762 }
 0x549   :  { %v947_v40 = vmul.f32 %v2763_v53, %v2747_v56 }
 0x54b   :  { %v929_v55 = vpop.xlane.xlu1 %928 }
 0x54c   :  { %v2765_v39 = vpop.eup %2764  ;;  %2770 = vrcp.f32 %v929_v55 }
 0x54d   :  { %v948_v43 = vmul.f32 %v2765_v39, %v2749_v14  ;;  %v2646_v14 = vld [vmem:[%s3587_s7 + $0x18] sm:$0xff]  }
 0x54f   :  { %v932_v44 = vpop.xlane.xlu0 %931  ;;  %v955_v48 = vpack.c.bf16 %v948_v43, %v947_v40 }
 0x550   :  { %2772 = vrcp.f32 %v932_v44 }
 0x551   :  { %2557 = vmatmul.mubr.msk.bf16.vlgmr.msra.gmra.mxu0 %vm112_vm0, %v955_v48  ;;  %v2767_v49 = vpop.eup %2766 }
 0x552   :  { %2561 = vmatpush3.bf16.msra.mxu0 %v682_v18  ;;  %2562 = vmatprep.mubr.msk.bf16.mxu0 %vm2818_vm9, %v2817_v15  ;;  %v949_v60 = vmul.f32 %v2767_v49, %v2751_v1 }
 0x553   :  { %v935_v51 = vpop.xlane.xlu1 %934  ;;  %2572 = vmatprep.subr.bf16.mxu0 %v2817_v15 }
 0x554   :  { %2774 = vrcp.f32 %v935_v51 }
 0x555   :  { %v2769_v50 = vpop.eup %2768 }
 0x556   :  { %v950_v54 = vmul.f32 %v2769_v50, %v2753_v10 }
 0x557   :  { %v938_v57 = vpop.xlane.xlu0 %937 }
 0x558   :  { %2776 = vrcp.f32 %v938_v57  ;;  %v956_v58 = vpack.c.bf16 %v950_v54, %v949_v60 }
 0x559   :  { %v2771_v59 = vpop.eup %2770 }
 0x55a   :  { %2563 = vmatmul.mubr.msk.bf16.vlgmr.msra.gmra.mxu0 %vm112_vm0, %v956_v58  ;;  %v951_v13 = vmul.f32 %v2771_v59, %v2755_v19 }
 0x55b   :  { %2573 = vmatpush3.bf16.msra.mxu0 %v684_v29  ;;  %2574 = vmatprep.mubr.msk.bf16.mxu0 %vm2818_vm9, %v2817_v15 }
 0x55d   :  { %v2773_v8 = vpop.eup %2772 }
 0x55e   :  { %v952_v18 = vmul.f32 %v2773_v8, %v2757_v21 }
 0x560   :  { %v957_v56 = vpack.c.bf16 %v952_v18, %v951_v13 }
 0x561   :  { %v2775_v61 = vpop.eup %2774 }
 0x562   :  { %2569 = vmatmul.mubr.msk.bf16.vlgmr.msra.gmra.mxu1 %vm112_vm0, %v957_v56  ;;  %v953_v29 = vmul.f32 %v2775_v61, %v2759_v25  ;;  %v2655_v56 = vld [vmem:[%s3591_s11 + $0xec] ss:$16 sps:$4 sm:$0xff]  }
 0x563   :  { %2579 = vmatpush3.bf16.msra.mxu1 %v2642_v31 }
 0x564   :  { %2580 = vmatprep.subr.bf16.mxu1 %v2643_v3 }
 0x565   :  { %v2777_v28 = vpop.eup %2776 }
 0x566   :  { %v954_v15 = vmul.f32 %v2777_v28, %v2761_v27 }
 0x567   :  { %2581 = vmatpush3.bf16.msra.mxu1 %v2643_v3 }
 0x568   :  { %v958_v52 = vpack.c.bf16 %v954_v15, %v953_v29  ;;  %2582 = vmatprep.subr.bf16.mxu1 %v2644_v23 }
 0x56a   :  { %2575 = vmatmul.mubr.msk.bf16.vlgmr.msra.gmra.mxu0 %vm112_vm0, %v958_v52 }
 0x56b   :  { %2583 = vmatpush3.bf16.msra.mxu1 %v2644_v23  ;;  %1651 = vmatprep.mubr.bf16.mxu0 %v2816_v2 }
 0x56c   :  { %2584 = vmatprep.subr.bf16.mxu1 %v2645_v62 }
 0x56f   :  { %2585 = vmatpush3.bf16.msra.mxu1 %v2645_v62 }
 0x570   :  { %2586 = vmatprep.subr.bf16.mxu1 %v2646_v14 }
 0x573   :  { %2587 = vmatpush3.bf16.msra.mxu1 %v2646_v14 }
 0x574   :  { %2588 = vmatprep.subr.bf16.mxu1 %v2647_v4 }
 0x577   :  { %2589 = vmatpush3.bf16.msra.mxu1 %v2647_v4 }
 0x578   :  { %2590 = vmatprep.subr.bf16.mxu1 %v2648_v0 }
 0x57b   :  { %2591 = vmatpush3.bf16.msra.mxu1 %v2648_v0 }
 0x57c   :  { %2592 = vmatprep.subr.bf16.mxu1 %v2649_v63 }
 0x57f   :  { %2593 = vmatpush3.bf16.msra.mxu1 %v2649_v63 }
 0x580   :  { %1692 = vmatprep.subr.bf16.mxu1 %v2655_v56  ;;  %v2691_v56 = vld [vmem:[%s3591_s11 + $0x2c] ss:$16 sps:$4 sm:$0xff]  }
 0x611   :  { %v996_v16 = vpop.f32.mrf.mxu0 }
 0x613   :  { %v2558_v24 = vpop.f32.mrf.mxu0 }
 0x615   :  { %v999_v1 = vpop.f32.mrf.mxu0 }
 0x616   :  { %v1135_v5 = vpack.c.bf16 %v999_v1, %v996_v16 }
 0x617   :  { %v2559_v6 = vpop.f32.mrf.mxu0 }
 0x618   :  { %2594 = vmatprep.mubr.bf16.mxu1 %v1135_v5 }
 0x61a   :  { %v1040_v7 = vpop.f32.mrf.mxu0 }
 0x61c   :  { %v2564_v9 = vpop.f32.mrf.mxu0 }
 0x61d   :  { %v2661_v9 = vld [vmem:[%s3591_s11 + $0xcc] ss:$16 sps:$4 sm:$0xff]  }
 0x61e   :  { %v1043_v10 = vpop.f32.mrf.mxu0 }
 0x61f   :  { %v1136_v12 = vpack.c.bf16 %v1043_v10, %v1040_v7  ;;  %v2658_v7 = vld [vmem:[%s3591_s11 + $0xc4] ss:$16 sps:$4 sm:$0xff]  }
 0x620   :  { %v2565_v17 = vpop.f32.mrf.mxu0 }
 0x621   :  { %2595 = vmatmul.mubr.bf16.vlgmr.msra.gmra.mxu1 %v1136_v12  ;;  %v2656_v12 = vld [vmem:[%s3591_s11 + $0xc0] ss:$16 sps:$4 sm:$0xff]   ;;  %v2659_v17 = vld [vmem:[%s3591_s11 + $0xc8] ss:$16 sps:$4 sm:$0xff]  }
 0x622   :  { %v1084_v19 = vpop.f32.mrf.mxu1 }
 0x624   :  { %v2570_v20 = vpop.f32.mrf.mxu1 }
 0x626   :  { %v1087_v21 = vpop.f32.mrf.mxu1 }
 0x627   :  { %v1137_v22 = vpack.c.bf16 %v1087_v21, %v1084_v19 }
 0x628   :  { %v2571_v25 = vpop.f32.mrf.mxu1 }
 0x629   :  { %2598 = vmatprep.mubr.bf16.mxu1 %v1137_v22 }
 0x62a   :  { %v1128_v26 = vpop.f32.mrf.mxu0 }
 0x62c   :  { %v2576_v27 = vpop.f32.mrf.mxu0 }
 0x62d   :  { %v2667_v27 = vld [vmem:[%s3591_s11 + $0xac] ss:$16 sps:$4 sm:$0xff]  }
 0x62e   :  { %v1131_v30 = vpop.f32.mrf.mxu0 }
 0x62f   :  { %v1138_v31 = vpack.c.bf16 %v1131_v30, %v1128_v26  ;;  %v2664_v26 = vld [vmem:[%s3591_s11 + $0xa4] ss:$16 sps:$4 sm:$0xff]  }
 0x630   :  { %v2577_v32 = vpop.f32.mrf.mxu0 }
 0x631   :  { %2599 = vmatmul.mubr.bf16.gmra.mxu1 %v1138_v31  ;;  %v2662_v32 = vld [vmem:[%s3591_s11 + $0xa0] ss:$16 sps:$4 sm:$0xff]  }
 0x632   :  { %1724 = vmatprep.mubr.bf16.mxu1 %v2816_v2 }
 0x6e1   :  { %v2596_v34 = vpop.f32.mrf.mxu1 }
 0x6e2   :  { %v1253_v39 = vadd.f32 %v2596_v34, %v2284_v36  ;;  %v2665_v34 = vld [vmem:[%s3591_s11 + $0xa8] ss:$16 sps:$4 sm:$0xff]  }
 0x6e3   :  { %v1244_v37 = vpop.f32.mrf.mxu1 }
 0x6e4   :  { %v1245_v53 = vadd.f32 %v2284_v36, %v1244_v37  ;;  %v3213_v48 = vadd.f32 %v1253_v39, %v2964_v38  ;;  %v2670_v39 = vld [vmem:[%s3591_s11 + $0x84] ss:$16 sps:$4 sm:$0xff]  }
 0x6e5   :  { %v2597_v55 = vpop.f32.mrf.mxu1 }
 0x6e6   :  { %v3209_v40 = vadd.f32 %v1245_v53, %v2960_v35  ;;  %v1256_v49 = vadd.f32 %v2597_v55, %v2284_v36 }
 0x6e7   :  { %v1247_v43 = vpop.f32.mrf.mxu1 }
 0x6e8   :  { %v1248_v44 = vadd.f32 %v2284_v36, %v1247_v43  ;;  %1285 = vadd.xlane.f32.xlu1 %v3209_v40  ;;  %v3221_v50 = vadd.f32 %v1256_v49, %v2967_v41  ;;  %v2673_v43 = vld [vmem:[%s3591_s11 + $0x8c] ss:$16 sps:$4 sm:$0xff]   ;;  %v2668_v49 = vld [vmem:[%s3591_s11 + $0x80] ss:$16 sps:$4 sm:$0xff]  }
 0x6ea   :  { %v3216_v51 = vadd.f32 %v1248_v44, %v2958_v33 }
 0x6ec   :  { %1287 = vadd.xlane.f32.xlu0 %v3216_v51  ;;  %1289 = vadd.xlane.f32.xlu1 %v3213_v48 }
 0x6f0   :  { %1291 = vadd.xlane.f32.xlu0 %v3221_v50 }
 0x6f1   :  { %v2600_v35 = vpop.f32.mrf.mxu1 }
 0x6f2   :  { %v1269_v58 = vadd.f32 %v2600_v35, %v2284_v36  ;;  %v2671_v35 = vld [vmem:[%s3591_s11 + $0x88] ss:$16 sps:$4 sm:$0xff]  }
 0x6f3   :  { %v1260_v60 = vpop.f32.mrf.mxu1 }
 0x6f4   :  { %v1261_v54 = vadd.f32 %v2284_v36, %v1260_v60  ;;  %v3229_v8 = vadd.f32 %v1269_v58, %v2975_v46  ;;  %v2652_v46 = vld [vmem:[%s3591_s11 + $0xe4] ss:$16 sps:$4 sm:$0xff]   ;;  %v2677_v58 = vld [vmem:[%s3591_s11 + $0x68] ss:$16 sps:$4 sm:$0xff]  }
 0x6f5   :  { %v2601_v57 = vpop.f32.mrf.mxu1  ;;  %1619 = vmatprep.subr.bf16.mxu0 %v2652_v46  ;;  %v2683_v46 = vld [vmem:[%s3591_s11 + $0x48] ss:$16 sps:$4 sm:$0xff]  }
 0x6f6   :  { %v3225_v38 = vadd.f32 %v1261_v54, %v2969_v42  ;;  %v1272_v13 = vadd.f32 %v2601_v57, %v2284_v36  ;;  %v2650_v42 = vld [vmem:[%s3591_s11 + $0xe0] ss:$16 sps:$4 sm:$0xff]   ;;  %v2676_v57 = vld [vmem:[%s3591_s11 + $0x64] ss:$16 sps:$4 sm:$0xff]  }
 0x6f7   :  { %v1263_v59 = vpop.f32.mrf.mxu1  ;;  %1620 = vmatpush1.bf16.msra.mxu0 %v2650_v42  ;;  %v2674_v54 = vld [vmem:[%s3591_s11 + $0x60] ss:$16 sps:$4 sm:$0xff]  }
 0x6f8   :  { %v1264_v33 = vadd.f32 %v2284_v36, %v1263_v59  ;;  %1293 = vadd.xlane.f32.xlu1 %v3225_v38  ;;  %v3237_v18 = vadd.f32 %v1272_v13, %v2979_v47  ;;  %1621 = vmatprep.subr.bf16.mxu0 %v2658_v7  ;;  %v2679_v59 = vld [vmem:[%s3591_s11 + $0x6c] ss:$16 sps:$4 sm:$0xff]   ;;  %v2680_v42 = vld [vmem:[%s3591_s11 + $0x40] ss:$16 sps:$4 sm:$0xff]  }
 0x6f9   :  { %v2685_v13 = vld [vmem:[%s3591_s11 + $0x4c] ss:$16 sps:$4 sm:$0xff]  }
 0x6fa   :  { %v3232_v41 = vadd.f32 %v1264_v33, %v2973_v45  ;;  %v2653_v45 = vld [vmem:[%s3591_s11 + $0xe8] ss:$16 sps:$4 sm:$0xff]   ;;  %v2682_v33 = vld [vmem:[%s3591_s11 + $0x44] ss:$16 sps:$4 sm:$0xff]  }
 0x6fb   :  { %1693 = vmatpush1.bf16.msra.mxu1 %v2653_v45  ;;  %1622 = vmatpush1.bf16.msra.mxu0 %v2656_v12  ;;  %v2688_v45 = vld [vmem:[%s3591_s11 + $0x24] ss:$16 sps:$4 sm:$0xff]  }
 0x6fc   :  { %1295 = vadd.xlane.f32.xlu0 %v3232_v41  ;;  %1297 = vadd.xlane.f32.xlu1 %v3229_v8 }
 0x6fd   :  { %1694 = vmatprep.subr.bf16.mxu1 %v2661_v9  ;;  %1623 = vmatprep.subr.bf16.mxu0 %v2664_v26 }
 0x6ff   :  { %1695 = vmatpush1.bf16.msra.mxu1 %v2659_v17  ;;  %1624 = vmatpush1.bf16.msra.mxu0 %v2662_v32 }
 0x700   :  { %1299 = vadd.xlane.f32.xlu0 %v3237_v18  ;;  %1696 = vmatprep.subr.bf16.mxu1 %v2667_v27  ;;  %v3385_v27 = vld [vmem:[%s3589_s9] ss:$0 sm:$0xff] }
 0x701   :  { %1625 = vmatprep.subr.bf16.mxu0 %v2670_v39 }
 0x703   :  { %1697 = vmatpush1.bf16.msra.mxu1 %v2665_v34  ;;  %1626 = vmatpush1.bf16.msra.mxu0 %v2668_v49 }
 0x704   :  { %1698 = vmatprep.subr.bf16.mxu1 %v2673_v43  ;;  %1627 = vmatprep.subr.bf16.mxu0 %v2676_v57 }
 0x707   :  { %1699 = vmatpush1.bf16.msra.mxu1 %v2671_v35  ;;  %1628 = vmatpush1.bf16.msra.mxu0 %v2674_v54 }
 0x708   :  { %1700 = vmatprep.subr.bf16.mxu1 %v2679_v59  ;;  %1629 = vmatprep.subr.bf16.mxu0 %v2682_v33 }
 0x70b   :  { %1701 = vmatpush1.bf16.msra.mxu1 %v2677_v58  ;;  %1630 = vmatpush1.bf16.msra.mxu0 %v2680_v42 }
 0x70c   :  { %1702 = vmatprep.subr.bf16.mxu1 %v2685_v13  ;;  %1631 = vmatprep.subr.bf16.mxu0 %v2688_v45 }
 0x70f   :  { %1703 = vmatpush1.bf16.msra.mxu1 %v2683_v46 }
 0x710   :  { %1704 = vmatprep.subr.bf16.mxu1 %v2691_v56 }
 0x771   :  { %v1286_v47 = vpop.xlane.xlu1 %1285 }
 0x772   :  { %v1301_v3 = vmul.f32 0.0078125, %v1286_v47  ;;  %v2686_v47 = vld [vmem:[%s3591_s11 + $0x20] ss:$16 sps:$4 sm:$0xff]  }
 0x773   :  { %1632 = vmatpush1.bf16.msra.mxu0 %v2686_v47  ;;  %v2700_v47 = vld [vmem:[%s3593_s13 + $0x38] sm:$0xff]  }
 0x774   :  { %v3253_v61 = vsub.f32 %v3209_v40, %v1301_v3  ;;  %v2689_v3 = vld [vmem:[%s3591_s11 + $0x28] ss:$16 sps:$4 sm:$0xff]  }
 0x775   :  { %v1288_v23 = vpop.xlane.xlu0 %1287  ;;  %v1290_v28 = vpop.xlane.xlu1 %1289  ;;  %1705 = vmatpush1.bf16.msra.mxu1 %v2689_v3  ;;  %v2701_v3 = vld [vmem:[%s3593_s13 + $0xb8] sm:$0xff]  }
 0x776   :  { %v1302_v29 = vmul.f32 0.0078125, %v1288_v23  ;;  %v1303_v15 = vmul.f32 0.0078125, %v1290_v28  ;;  %v1317_v52 = vmul.f32 %v3253_v61, %v3253_v61  ;;  %v2694_v23 = vld [vmem:[%s3591_s11 + $0x4] ss:$16 sps:$4 sm:$0xff]   ;;  %v2697_v28 = vld [vmem:[%s3591_s11 + $0xc] ss:$16 sps:$4 sm:$0xff]  }
 0x777   :  { %1633 = vmatprep.subr.bf16.mxu0 %v2694_v23  ;;  %1706 = vmatprep.subr.bf16.mxu1 %v2697_v28 }
 0x778   :  { %v3258_v62 = vsub.f32 %v3216_v51, %v1302_v29  ;;  %v3261_v14 = vsub.f32 %v3213_v48, %v1303_v15  ;;  %1325 = vadd.xlane.f32.xlu1 %v1317_v52  ;;  %v2692_v29 = vld [vmem:[%s3591_s11] ss:$16 sps:$4 sm:$0xff]   ;;  %v2695_v15 = vld [vmem:[%s3591_s11 + $0x8] ss:$16 sps:$4 sm:$0xff]  }
 0x779   :  { %v1292_v4 = vpop.xlane.xlu0 %1291  ;;  %1634 = vmatpush1.bf16.msra.mxu0 %v2692_v29  ;;  %1707 = vmatpush1.bf16.msra.mxu1 %v2695_v15  ;;  %v2698_v52 = vld [vmem:[%s3593_s13 + $0x78] sm:$0xff]   ;;  %v2704_v29 = vld [vmem:[%s3593_s13 + $0x30] sm:$0xff]  }
 0x77a   :  { %v1304_v0 = vmul.f32 0.0078125, %v1292_v4  ;;  %v1318_v63 = vmul.f32 %v3258_v62, %v3258_v62  ;;  %v1319_v16 = vmul.f32 %v3261_v14, %v3261_v14  ;;  %v2699_v4 = vld [vmem:[%s3593_s13 + $0xf8] sm:$0xff]   ;;  %2410 = vmatprep.subr.bf16.mxu0 %v2698_v52  ;;  %v2705_v15 = vld [vmem:[%s3593_s13 + $0xb0] sm:$0xff]  }
 0x77b   :  { %2450 = vmatprep.subr.bf16.mxu1 %v2699_v4  ;;  %v2706_v4 = vld [vmem:[%s3593_s13 + $0x68] sm:$0xff]  }
 0x77c   :  { %v3268_v24 = vsub.f32 %v3221_v50, %v1304_v0  ;;  %1327 = vadd.xlane.f32.xlu0 %v1318_v63  ;;  %1329 = vadd.xlane.f32.xlu1 %v1319_v16 }
 0x77e   :  { %v1320_v1 = vmul.f32 %v3268_v24, %v3268_v24 }
 0x780   :  { %1331 = vadd.xlane.f32.xlu0 %v1320_v1 }
 0x781   :  { %v1294_v5 = vpop.xlane.xlu1 %1293 }
 0x782   :  { %v1305_v6 = vmul.f32 0.0078125, %v1294_v5 }
 0x784   :  { %v3279_v10 = vsub.f32 %v3225_v38, %v1305_v6 }
 0x785   :  { %v1296_v19 = vpop.xlane.xlu0 %1295  ;;  %v1298_v20 = vpop.xlane.xlu1 %1297 }
 0x786   :  { %v1306_v21 = vmul.f32 0.0078125, %v1296_v19  ;;  %v1307_v22 = vmul.f32 0.0078125, %v1298_v20  ;;  %v1321_v25 = vmul.f32 %v3279_v10, %v3279_v10 }
 0x788   :  { %v3296_v30 = vsub.f32 %v3232_v41, %v1306_v21  ;;  %v3299_v31 = vsub.f32 %v3229_v8, %v1307_v22  ;;  %1333 = vadd.xlane.f32.xlu1 %v1321_v25 }
 0x789   :  { %v1300_v36 = vpop.xlane.xlu0 %1299 }
 0x78a   :  { %v1308_v37 = vmul.f32 0.0078125, %v1300_v36  ;;  %v1322_v53 = vmul.f32 %v3296_v30, %v3296_v30  ;;  %v1323_v55 = vmul.f32 %v3299_v31, %v3299_v31 }
 0x78c   :  { %v3318_v44 = vsub.f32 %v3237_v18, %v1308_v37  ;;  %1335 = vadd.xlane.f32.xlu0 %v1322_v53  ;;  %1337 = vadd.xlane.f32.xlu1 %v1323_v55 }
 0x78e   :  { %v1324_v60 = vmul.f32 %v3318_v44, %v3318_v44 }
 0x790   :  { %1339 = vadd.xlane.f32.xlu0 %v1324_v60  ;;  %v3392_v60 = vld [vmem:[%s3590_s10] ss:$0 sm:$0xff] }
 0x801   :  { %v1326_v0 = vpop.xlane.xlu1 %1325 }
 0x802   :  { %v1341_v63 = vmul.f32 0.0078125, %v1326_v0  ;;  %v2707_v0 = vld [vmem:[%s3593_s13 + $0xe8] sm:$0xff]  }
 0x804   :  { %v1349_v16 = vadd.f32 1e-05, %v1341_v63 }
 0x805   :  { %v1328_v1 = vpop.xlane.xlu0 %1327  ;;  %v1330_v5 = vpop.xlane.xlu1 %1329 }
 0x806   :  { %2778 = vrsqrt.f32 %v1349_v16  ;;  %v1342_v6 = vmul.f32 0.0078125, %v1328_v1  ;;  %v1343_v7 = vmul.f32 0.0078125, %v1330_v5  ;;  %v2708_v5 = vld [vmem:[%s3593_s13 + $0x28] sm:$0xff]  }
 0x808   :  { %v1350_v9 = vadd.f32 1e-05, %v1342_v6  ;;  %v1351_v12 = vadd.f32 1e-05, %v1343_v7  ;;  %v2709_v6 = vld [vmem:[%s3593_s13 + $0xa8] sm:$0xff]  }
 0x809   :  { %v1332_v17 = vpop.xlane.xlu0 %1331 }
 0x80a   :  { %2780 = vrsqrt.f32 %v1350_v9  ;;  %v1344_v19 = vmul.f32 0.0078125, %v1332_v17  ;;  %v2710_v9 = vld [vmem:[%s3593_s13 + $0x60] sm:$0xff]  }
 0x80b   :  { %2782 = vrsqrt.f32 %v1351_v12 }
 0x80c   :  { %v1352_v20 = vadd.f32 1e-05, %v1344_v19 }
 0x80e   :  { %2784 = vrsqrt.f32 %v1352_v20 }
 0x811   :  { %v1334_v21 = vpop.xlane.xlu1 %1333 }
 0x812   :  { %v1345_v22 = vmul.f32 0.0078125, %v1334_v21  ;;  %v2712_v21 = vld [vmem:[%s3593_s13 + $0x20] sm:$0xff]  }
 0x813   :  { %v2779_v25 = vpop.eup %2778 }
 0x814   :  { %v1353_v26 = vadd.f32 1e-05, %v1345_v22  ;;  %v1365_v32 = vmul.f32 %v2779_v25, %v3253_v61  ;;  %v2713_v22 = vld [vmem:[%s3593_s13 + $0xa0] sm:$0xff]   ;;  %v2714_v25 = vld [vmem:[%s3593_s13 + $0x58] sm:$0xff]  }
 0x815   :  { %v1336_v34 = vpop.xlane.xlu0 %1335  ;;  %v1338_v36 = vpop.xlane.xlu1 %1337 }
 0x816   :  { %2786 = vrsqrt.f32 %v1353_v26  ;;  %v1346_v37 = vmul.f32 0.0078125, %v1336_v34  ;;  %v1347_v53 = vmul.f32 0.0078125, %v1338_v36  ;;  %v1379_v39 = vmul.f32 %v3385_v27, %v1365_v32  ;;  %v2715_v26 = vld [vmem:[%s3593_s13 + $0xd8] sm:$0xff]  }
 0x817   :  { %v2781_v55 = vpop.eup %2780 }
 0x818   :  { %v2783_v43 = vpop.eup %2782  ;;  %v1354_v49 = vadd.f32 1e-05, %v1346_v37  ;;  %v1355_v35 = vadd.f32 1e-05, %v1347_v53  ;;  %v1366_v54 = vmul.f32 %v2781_v55, %v3258_v62  ;;  %v1393_v33 = vadd.f32 %v3392_v60, %v1379_v39  ;;  %v2716_v39 = vld [vmem:[%s3593_s13 + $0x18] sm:$0xff]  }
 0x819   :  { %v1340_v57 = vpop.xlane.xlu0 %1339  ;;  %v1367_v13 = vmul.f32 %v2783_v43, %v3261_v14  ;;  %v2702_v14 = vld [vmem:[%s3593_s13 + $0x70] sm:$0xff]   ;;  %v2717_v43 = vld [vmem:[%s3593_s13 + $0x98] sm:$0xff]  }
 0x81a   :  { %2788 = vrsqrt.f32 %v1354_v49  ;;  %v1348_v61 = vmul.f32 0.0078125, %v1340_v57  ;;  %v1380_v58 = vmul.f32 %v3385_v27, %v1366_v54  ;;  %v2718_v54 = vld [vmem:[%s3593_s13 + $0x50] sm:$0xff]  }
 0x81b   :  { %v2785_v59 = vpop.eup %2784  ;;  %2790 = vrsqrt.f32 %v1355_v35  ;;  %v1381_v23 = vmul.f32 %v3385_v27, %v1367_v13  ;;  %v2721_v57 = vld [vmem:[%s3593_s13 + $0x90] sm:$0xff]   ;;  %v2727_v13 = vld [vmem:[%s3593_s13 + $0xc0] sm:$0xff]  }
 0x81c   :  { %v1356_v42 = vadd.f32 1e-05, %v1348_v61  ;;  %v1394_v46 = vadd.f32 %v3392_v60, %v1380_v58  ;;  %v1368_v45 = vmul.f32 %v2785_v59, %v3268_v24  ;;  %v2703_v24 = vld [vmem:[%s3593_s13 + $0xf0] sm:$0xff]   ;;  %v2723_v61 = vld [vmem:[%s3593_s13 + $0xc8] sm:$0xff]  }
 0x81d   :  { %v1395_v63 = vadd.f32 %v3392_v60, %v1381_v23  ;;  %v2724_v58 = vld [vmem:[%s3593_s13 + $0x8] sm:$0xff]  }
 0x81e   :  { %2792 = vrsqrt.f32 %v1356_v42  ;;  %v1401_v56 = vpack.c.bf16 %v1394_v46, %v1393_v33  ;;  %v1382_v62 = vmul.f32 %v3385_v27, %v1368_v45  ;;  %v2725_v59 = vld [vmem:[%s3593_s13 + $0x88] sm:$0xff]   ;;  %v2726_v33 = vld [vmem:[%s3593_s13 + $0x40] sm:$0xff]   ;;  %v1440_v45 = vshrl.u32 %v60_v11, 7 }
 0x81f   :  { %v2728_v42 = vld [vmem:[%s3593_s13] sm:$0xff]  }
 0x820   :  { %1652 = vmatmul.mubr.bf16.vlgmr.msra.gmra.mxu0 %v1401_v56  ;;  %1725 = vmatmul.mubr.bf16.vlgmr.msra.gmra.mxu1 %v1401_v56  ;;  %v1396_v28 = vadd.f32 %v3392_v60, %v1382_v62  ;;  %v2729_v46 = vld [vmem:[%s3593_s13 + $0x80] sm:$0xff]   ;;  %v1445_v56 = vsub.s32 1, %v1440_v45  ;;  %v1453_v62 = vsub.s32 3, %v1440_v45 }
 0x821   :  { %1661 = vmatprep.mubr.bf16.mxu0 %v2816_v2  ;;  %1734 = vmatprep.mubr.bf16.mxu1 %v2816_v2 }
 0x822   :  { %2411 = vmatpush3.bf16.msra.mxu0 %v2700_v47  ;;  %2451 = vmatpush3.bf16.msra.mxu1 %v2701_v3  ;;  %v1402_v1 = vpack.c.bf16 %v1396_v28, %v1395_v63  ;;  %v1441_v47 = vsub.s32 0, %v1440_v45  ;;  %v1449_v3 = vsub.s32 2, %v1440_v45 }
 0x823   :  { %v2787_v52 = vpop.eup %2786  ;;  %2412 = vmatprep.subr.bf16.mxu0 %v2702_v14  ;;  %2452 = vmatprep.subr.bf16.mxu1 %v2703_v24  ;;  %v1437_v14 = vld [vmem:[%s3592_s12] sm:$0xf] }
 0x824   :  { %v1369_v16 = vmul.f32 %v2787_v52, %v3279_v10  ;;  %v2711_v10 = vld [vmem:[%s3593_s13 + $0xe0] sm:$0xff]   ;;  %v3516_v28 = vrot.slane %v1437_v14, %v1445_v56  ;;  %v3522_v52 = vrot.slane %v1437_v14, %v1449_v3 }
 0x826   :  { %2413 = vmatpush3.bf16.msra.mxu0 %v2704_v29  ;;  %2453 = vmatpush3.bf16.msra.mxu1 %v2705_v15  ;;  %v1383_v17 = vmul.f32 %v3385_v27, %v1369_v16  ;;  %v3518_v29 = vrot.slane %v1437_v14, %v1453_v62  ;;  %v3520_v15 = vrot.slane %v1437_v14, %v1441_v47 }
 0x827   :  { %v2789_v7 = vpop.eup %2788  ;;  %2414 = vmatprep.subr.bf16.mxu0 %v2706_v4  ;;  %2454 = vmatprep.subr.bf16.mxu1 %v2707_v0 }
 0x828   :  { %1662 = vmatmul.mubr.bf16.gmra.mxu0 %v1402_v1  ;;  %1735 = vmatmul.mubr.bf16.gmra.mxu1 %v1402_v1  ;;  %v1370_v12 = vmul.f32 %v2789_v7, %v3296_v30  ;;  %v2791_v19 = vpop.eup %2790  ;;  %v1397_v32 = vadd.f32 %v3392_v60, %v1383_v17 }
 0x829   :  { %1671 = vmatprep.mubr.bf16.mxu0 %v2816_v2  ;;  %1744 = vmatprep.mubr.bf16.mxu1 %v2816_v2  ;;  %v1371_v36 = vmul.f32 %v2791_v19, %v3299_v31 }
 0x82a   :  { %v1384_v20 = vmul.f32 %v3385_v27, %v1370_v12  ;;  %2415 = vmatpush3.bf16.msra.mxu0 %v2708_v5  ;;  %2455 = vmatpush3.bf16.msra.mxu1 %v2709_v6 }
 0x82b   :  { %v2793_v30 = vpop.eup %2792  ;;  %2416 = vmatprep.subr.bf16.mxu0 %v2710_v9  ;;  %2456 = vmatprep.subr.bf16.mxu1 %v2711_v10  ;;  %v1385_v31 = vmul.f32 %v3385_v27, %v1371_v36 }
 0x82c   :  { %v1398_v34 = vadd.f32 %v3392_v60, %v1384_v20  ;;  %v1372_v37 = vmul.f32 %v2793_v30, %v3318_v44 }
 0x82d   :  { %v1399_v49 = vadd.f32 %v3392_v60, %v1385_v31 }
 0x82e   :  { %v1403_v53 = vpack.c.bf16 %v1398_v34, %v1397_v32  ;;  %v1386_v55 = vmul.f32 %v3385_v27, %v1372_v37  ;;  %2417 = vmatpush3.bf16.msra.mxu0 %v2712_v21  ;;  %2457 = vmatpush3.bf16.msra.mxu1 %v2713_v22  ;;  %v2719_v27 = vld [vmem:[%s3593_s13 + $0xd0] sm:$0xff]  }
 0x82f   :  { %2418 = vmatprep.subr.bf16.mxu0 %v2714_v25  ;;  %2458 = vmatprep.subr.bf16.mxu1 %v2715_v26 }
 0x830   :  { %1672 = vmatmul.mubr.bf16.gmra.mxu0 %v1403_v53  ;;  %1745 = vmatmul.mubr.bf16.gmra.mxu1 %v1403_v53  ;;  %v1400_v44 = vadd.f32 %v3392_v60, %v1386_v55  ;;  %v2722_v60 = vld [vmem:[%s3593_s13 + $0x48] sm:$0xff]  }
 0x831   :  { %1681 = vmatprep.mubr.bf16.mxu0 %v2816_v2  ;;  %1754 = vmatprep.mubr.bf16.mxu1 %v2816_v2  ;;  %v2720_v2 = vld [vmem:[%s3593_s13 + $0x10] sm:$0xff]  }
 0x832   :  { %2419 = vmatpush3.bf16.msra.mxu0 %v2716_v39  ;;  %2459 = vmatpush3.bf16.msra.mxu1 %v2717_v43  ;;  %v1404_v35 = vpack.c.bf16 %v1400_v44, %v1399_v49 }
 0x833   :  { %2420 = vmatprep.subr.bf16.mxu0 %v2718_v54  ;;  %2460 = vmatprep.subr.bf16.mxu1 %v2719_v27 }
 0x836   :  { %2421 = vmatpush3.bf16.msra.mxu0 %v2720_v2  ;;  %2461 = vmatpush3.bf16.msra.mxu1 %v2721_v57 }
 0x837   :  { %2422 = vmatprep.subr.bf16.mxu0 %v2722_v60  ;;  %2462 = vmatprep.subr.bf16.mxu1 %v2723_v61 }
 0x838   :  { %1682 = vmatmul.mubr.bf16.gmra.mxu0 %v1404_v35  ;;  %1755 = vmatmul.mubr.bf16.gmra.mxu1 %v1404_v35 }
 0x83a   :  { %2423 = vmatpush3.bf16.msra.mxu0 %v2724_v58  ;;  %2463 = vmatpush3.bf16.msra.mxu1 %v2725_v59 }
 0x83b   :  { %2424 = vmatprep.subr.bf16.mxu0 %v2726_v33  ;;  %2464 = vmatprep.subr.bf16.mxu1 %v2727_v13 }
 0x83e   :  { %2425 = vmatpush3.bf16.msra.mxu0 %v2728_v42  ;;  %2465 = vmatpush3.bf16.msra.mxu1 %v2729_v46 }
 0x8e0   :  { %v1653_v24 = vpop.f32.mrf.mxu0  ;;  %v1726_v23 = vpop.f32.mrf.mxu1 }
 0x8e1   :  { %v1654_v7 = vadd.f32 %v1653_v24, %v3520_v15  ;;  %v1727_v9 = vadd.f32 %v1726_v23, %v3522_v52 }
 0x8e2   :  { %v1655_v4 = vpop.f32.mrf.mxu0  ;;  %v1728_v11 = vpop.f32.mrf.mxu1 }
 0x8e3   :  { %v1656_v16 = vadd.f32 %v1655_v4, %v3516_v28  ;;  %v1729_v1 = vadd.f32 %v1728_v11, %v3518_v29  ;;  %v1765_v36 = vmax.f32 %v1654_v7, 0.0  ;;  %v1767_v37 = vmax.f32 %v1727_v9, 0.0 }
 0x8e4   :  { %v1657_v0 = vpop.f32.mrf.mxu0  ;;  %v1730_v63 = vpop.f32.mrf.mxu1 }
 0x8e5   :  { %v1658_v5 = vadd.f32 %v1657_v0, %v3520_v15  ;;  %v1731_v6 = vadd.f32 %v1730_v63, %v3522_v52  ;;  %v1766_v25 = vmax.f32 %v1656_v16, 0.0  ;;  %v1768_v26 = vmax.f32 %v1729_v1, 0.0 }
 0x8e6   :  { %v1659_v10 = vpop.f32.mrf.mxu0  ;;  %v1732_v12 = vpop.f32.mrf.mxu1 }
 0x8e7   :  { %v1660_v17 = vadd.f32 %v1659_v10, %v3516_v28  ;;  %v1733_v19 = vadd.f32 %v1732_v12, %v3518_v29  ;;  %v1769_v20 = vmax.f32 %v1658_v5, 0.0  ;;  %v1771_v21 = vmax.f32 %v1731_v6, 0.0 }
 0x8e8   :  { %v1663_v22 = vpop.f32.mrf.mxu0  ;;  %v1736_v30 = vpop.f32.mrf.mxu1 }
 0x8e9   :  { %v1770_v32 = vmax.f32 %v1660_v17, 0.0  ;;  %v1772_v34 = vmax.f32 %v1733_v19, 0.0  ;;  %v1797_v31 = vpack.c.bf16 %v1769_v20, %v1765_v36  ;;  %v1799_v44 = vpack.c.bf16 %v1771_v21, %v1767_v37 }
 0x8ea   :  { %v1665_v53 = vpop.f32.mrf.mxu0  ;;  %v1738_v55 = vpop.f32.mrf.mxu1  ;;  %v1664_v60 = vadd.f32 %v1663_v22, %v3520_v15  ;;  %v1737_v61 = vadd.f32 %v1736_v30, %v3522_v52 }
 0x8eb   :  { %v1798_v39 = vpack.c.bf16 %v1770_v32, %v1766_v25  ;;  %v1800_v43 = vpack.c.bf16 %v1772_v34, %v1768_v26  ;;  %v1666_v49 = vadd.f32 %v1665_v53, %v3516_v28  ;;  %v1739_v27 = vadd.f32 %v1738_v55, %v3518_v29 }
 0x8ec   :  { %v1667_v35 = vpop.f32.mrf.mxu0  ;;  %v1740_v54 = vpop.f32.mrf.mxu1  ;;  %v1773_v24 = vmax.f32 %v1664_v60, 0.0  ;;  %v1775_v23 = vmax.f32 %v1737_v61, 0.0 }
 0x8ed   :  { %v1668_v2 = vadd.f32 %v1667_v35, %v3520_v15  ;;  %v1741_v57 = vadd.f32 %v1740_v54, %v3522_v52  ;;  %2108 = vmatprep.mubr.bf16.mxu0 %v1798_v39  ;;  %2173 = vmatprep.mubr.bf16.mxu1 %v1800_v43  ;;  %v1774_v62 = vmax.f32 %v1666_v49, 0.0  ;;  %v1776_v47 = vmax.f32 %v1739_v27, 0.0 }
 0x8ee   :  { %v1669_v58 = vpop.f32.mrf.mxu0  ;;  %v1742_v59 = vpop.f32.mrf.mxu1  ;;  %2109 = vmatmul.mubr.bf16.vlgmr.msra.gmra.mxu0 %v1797_v31  ;;  %2174 = vmatmul.mubr.bf16.vlgmr.msra.gmra.mxu1 %v1799_v44 }
 0x8ef   :  { %v1670_v33 = vadd.f32 %v1669_v58, %v3516_v28  ;;  %v1743_v13 = vadd.f32 %v1742_v59, %v3518_v29  ;;  %v1777_v42 = vmax.f32 %v1668_v2, 0.0  ;;  %v1779_v46 = vmax.f32 %v1741_v57, 0.0 }
 0x8f0   :  { %v1673_v45 = vpop.f32.mrf.mxu0  ;;  %v1746_v56 = vpop.f32.mrf.mxu1 }
 0x8f1   :  { %v1778_v3 = vmax.f32 %v1670_v33, 0.0  ;;  %v1780_v14 = vmax.f32 %v1743_v13, 0.0  ;;  %v1801_v16 = vpack.c.bf16 %v1777_v42, %v1773_v24  ;;  %v1803_v1 = vpack.c.bf16 %v1779_v46, %v1775_v23 }
 0x8f2   :  { %v1675_v4 = vpop.f32.mrf.mxu0  ;;  %v1748_v11 = vpop.f32.mrf.mxu1  ;;  %v1674_v17 = vadd.f32 %v1673_v45, %v3520_v15  ;;  %v1747_v19 = vadd.f32 %v1746_v56, %v3522_v52 }
 0x8f3   :  { %v1802_v0 = vpack.c.bf16 %v1778_v3, %v1774_v62  ;;  %v1804_v63 = vpack.c.bf16 %v1780_v14, %v1776_v47  ;;  %v1676_v5 = vadd.f32 %v1675_v4, %v3516_v28  ;;  %v1749_v9 = vadd.f32 %v1748_v11, %v3518_v29 }
 0x8f4   :  { %v1677_v6 = vpop.f32.mrf.mxu0  ;;  %v1750_v7 = vpop.f32.mrf.mxu1  ;;  %v1781_v39 = vmax.f32 %v1674_v17, 0.0  ;;  %v1783_v43 = vmax.f32 %v1747_v19, 0.0 }
 0x8f5   :  { %v1678_v10 = vadd.f32 %v1677_v6, %v3520_v15  ;;  %v1751_v12 = vadd.f32 %v1750_v7, %v3522_v52  ;;  %2116 = vmatprep.mubr.bf16.mxu0 %v1802_v0  ;;  %2181 = vmatprep.mubr.bf16.mxu1 %v1804_v63  ;;  %v1782_v36 = vmax.f32 %v1676_v5, 0.0  ;;  %v1784_v37 = vmax.f32 %v1749_v9, 0.0 }
 0x8f6   :  { %v1679_v20 = vpop.f32.mrf.mxu0  ;;  %v1752_v21 = vpop.f32.mrf.mxu1  ;;  %2117 = vmatmul.mubr.bf16.gmra.mxu0 %v1801_v16  ;;  %2182 = vmatmul.mubr.bf16.gmra.mxu1 %v1803_v1 }
 0x8f7   :  { %v1680_v22 = vadd.f32 %v1679_v20, %v3516_v28  ;;  %v1753_v30 = vadd.f32 %v1752_v21, %v3518_v29  ;;  %v1785_v25 = vmax.f32 %v1678_v10, 0.0  ;;  %v1787_v26 = vmax.f32 %v1751_v12, 0.0 }
 0x8f8   :  { %v1683_v32 = vpop.f32.mrf.mxu0  ;;  %v1756_v34 = vpop.f32.mrf.mxu1 }
 0x8f9   :  { %v1786_v53 = vmax.f32 %v1680_v22, 0.0  ;;  %v1788_v55 = vmax.f32 %v1753_v30, 0.0  ;;  %v1805_v54 = vpack.c.bf16 %v1785_v25, %v1781_v39  ;;  %v1807_v27 = vpack.c.bf16 %v1787_v26, %v1783_v43 }
 0x8fa   :  { %v1685_v31 = vpop.f32.mrf.mxu0  ;;  %v1758_v44 = vpop.f32.mrf.mxu1  ;;  %v1684_v33 = vadd.f32 %v1683_v32, %v3520_v15  ;;  %v1757_v13 = vadd.f32 %v1756_v34, %v3522_v52 }
 0x8fb   :  { %v1806_v49 = vpack.c.bf16 %v1786_v53, %v1782_v36  ;;  %v1808_v35 = vpack.c.bf16 %v1788_v55, %v1784_v37  ;;  %v1686_v2 = vadd.f32 %v1685_v31, %v3516_v28  ;;  %v1759_v61 = vadd.f32 %v1758_v44, %v3518_v29 }
 0x8fc   :  { %v1687_v57 = vpop.f32.mrf.mxu0  ;;  %v1760_v60 = vpop.f32.mrf.mxu1  ;;  %v1789_v4 = vmax.f32 %v1684_v33, 0.0  ;;  %v1791_v11 = vmax.f32 %v1757_v13, 0.0 }
 0x8fd   :  { %v1688_v58 = vadd.f32 %v1687_v57, %v3520_v15  ;;  %v1761_v59 = vadd.f32 %v1760_v60, %v3522_v52  ;;  %2124 = vmatprep.mubr.bf16.mxu0 %v1806_v49  ;;  %2189 = vmatprep.mubr.bf16.mxu1 %v1808_v35  ;;  %v1790_v3 = vmax.f32 %v1686_v2, 0.0  ;;  %v1792_v14 = vmax.f32 %v1759_v61, 0.0 }
 0x8fe   :  { %v1689_v42 = vpop.f32.mrf.mxu0  ;;  %v1762_v46 = vpop.f32.mrf.mxu1  ;;  %2125 = vmatmul.mubr.bf16.gmra.mxu0 %v1805_v54  ;;  %2190 = vmatmul.mubr.bf16.gmra.mxu1 %v1807_v27 }
 0x8ff   :  { %v1690_v45 = vadd.f32 %v1689_v42, %v3516_v28  ;;  %v1763_v56 = vadd.f32 %v1762_v46, %v3518_v29  ;;  %v1793_v62 = vmax.f32 %v1688_v58, 0.0  ;;  %v1795_v47 = vmax.f32 %v1761_v59, 0.0  ;;  %v3559_v29 = vld [vmem:[%s3594_s14] ss:$0 sm:$0xff]  ;;  %s2819_s14 = smov [#allocation2]  }
 0x900   :  { %s2227_s23 = sshll.u32 %s2819_s14, 4  ;;  %s2228_s23 = int_to_ptr.vmem [resolvable:$true] %s2227_s23 }
 0x901   :  { %v1794_v24 = vmax.f32 %v1690_v45, 0.0  ;;  %v1796_v23 = vmax.f32 %v1763_v56, 0.0  ;;  %v1809_v63 = vpack.c.bf16 %v1793_v62, %v1789_v4  ;;  %v1811_v52 = vpack.c.bf16 %v1795_v47, %v1791_v11  ;;  %s2794_s3 = scalar_lea.vmem %s2228_s23, 1024  ;;  %p2799_p1 = scmp.lt.s32.totalorder %s2228_s23, %s2228_s23 }
 0x902   :  { %p2795_p0 = scmp.ne.s32.totalorder %s2228_s23, %s2794_s3  ;;  %p2800_p2 = scmp.lt.s32.totalorder %s2794_s3, %s2794_s3 }
 0x903   :  { %v1810_v0 = vpack.c.bf16 %v1794_v24, %v1790_v3  ;;  %v1812_v15 = vpack.c.bf16 %v1796_v23, %v1792_v14 }
 0x904   :  { %p2801_p3 = por %p2800_p2, %p2799_p1 }
 0x905   :  { %2132 = vmatprep.mubr.bf16.mxu0 %v1810_v0  ;;  %2197 = vmatprep.mubr.bf16.mxu1 %v1812_v15 }
 0x906   :  { %2133 = vmatmul.mubr.bf16.gmra.mxu0 %v1809_v63  ;;  %2198 = vmatmul.mubr.bf16.gmra.mxu1 %v1811_v52  ;;  %p2802_p4 = pnand %p2801_p3, %p2795_p0 }
 0x9ae   :  { %v2426_v16 = vpop.f32.mrf.mxu0  ;;  %v2466_v28 = vpop.f32.mrf.mxu1 }
 0x9b0   :  { %v2427_v1 = vpop.f32.mrf.mxu0  ;;  %v2467_v5 = vpop.f32.mrf.mxu1 }
 0x9b1   :  { %v2428_v6 = vadd.f32 %v2427_v1, %v2426_v16  ;;  %v2468_v12 = vadd.f32 %v2467_v5, %v2466_v28 }
 0x9b2   :  { %v2429_v7 = vpop.f32.mrf.mxu0  ;;  %v2469_v9 = vpop.f32.mrf.mxu1 }
 0x9b3   :  { %v2111_v10 = vadd.f32 %v2428_v6, %v3559_v29 }
 0x9b4   :  { %v2430_v17 = vpop.f32.mrf.mxu0  ;;  %v2470_v19 = vpop.f32.mrf.mxu1 }
 0x9b5   :  { %v2176_v20 = vadd.f32 %v2468_v12, %v2111_v10  ;;  %v2431_v21 = vadd.f32 %v2430_v17, %v2429_v7  ;;  %v2471_v32 = vadd.f32 %v2470_v19, %v2469_v9 }
 0x9b6   :  { %v2432_v22 = vpop.f32.mrf.mxu0  ;;  %v2472_v30 = vpop.f32.mrf.mxu1 }
 0x9b7   :  { %v2206_v25 = vadd.f32 %v2176_v20, %v3209_v40  ;;  %v2114_v26 = vadd.f32 %v2431_v21, %v3559_v29 }
 0x9b8   :  { %v2433_v34 = vpop.f32.mrf.mxu0  ;;  %v2473_v36 = vpop.f32.mrf.mxu1 }
 0x9b9   :  { %2214 = vst [vmem:[#allocation2] sm:$0xff] %v2206_v25  ;;  %v2179_v37 = vadd.f32 %v2471_v32, %v2114_v26  ;;  %v2434_v53 = vadd.f32 %v2433_v34, %v2432_v22  ;;  %v2474_v44 = vadd.f32 %v2473_v36, %v2472_v30 }
 0x9ba   :  { %v2435_v55 = vpop.f32.mrf.mxu0  ;;  %v2475_v39 = vpop.f32.mrf.mxu1 }
 0x9bb   :  { %v2207_v43 = vadd.f32 %v2179_v37, %v3216_v51  ;;  %v2119_v31 = vadd.f32 %v2434_v53, %v3559_v29 }
 0x9bc   :  { %v2436_v49 = vpop.f32.mrf.mxu0  ;;  %v2476_v35 = vpop.f32.mrf.mxu1 }
 0x9bd   :  { %2215 = vst [vmem:[#allocation2 + $0x8] sm:$0xff] %v2207_v43  ;;  %v2184_v54 = vadd.f32 %v2474_v44, %v2119_v31  ;;  %v2437_v40 = vadd.f32 %v2436_v49, %v2435_v55  ;;  %v2477_v61 = vadd.f32 %v2476_v35, %v2475_v39 }
 0x9be   :  { %v2438_v27 = vpop.f32.mrf.mxu0  ;;  %v2478_v2 = vpop.f32.mrf.mxu1 }
 0x9bf   :  { %v2208_v57 = vadd.f32 %v2184_v54, %v3213_v48  ;;  %v2122_v60 = vadd.f32 %v2437_v40, %v3559_v29 }
 0x9c0   :  { %v2439_v58 = vpop.f32.mrf.mxu0  ;;  %v2479_v59 = vpop.f32.mrf.mxu1 }
 0x9c1   :  { %2216 = vst [vmem:[#allocation2 + $0x10] sm:$0xff] %v2208_v57  ;;  %v2187_v33 = vadd.f32 %v2477_v61, %v2122_v60  ;;  %v2440_v51 = vadd.f32 %v2439_v58, %v2438_v27  ;;  %v2480_v56 = vadd.f32 %v2479_v59, %v2478_v2 }
 0x9c2   :  { %v2441_v13 = vpop.f32.mrf.mxu0  ;;  %v2481_v42 = vpop.f32.mrf.mxu1 }
 0x9c3   :  { %v2209_v46 = vadd.f32 %v2187_v33, %v3221_v50  ;;  %v2127_v45 = vadd.f32 %v2440_v51, %v3559_v29 }
 0x9c4   :  { %v2442_v62 = vpop.f32.mrf.mxu0  ;;  %v2482_v47 = vpop.f32.mrf.mxu1 }
 0x9c5   :  { %2217 = vst [vmem:[#allocation2 + $0x18] sm:$0xff] %v2209_v46  ;;  %v2192_v3 = vadd.f32 %v2480_v56, %v2127_v45  ;;  %v2443_v48 = vadd.f32 %v2442_v62, %v2441_v13  ;;  %v2483_v11 = vadd.f32 %v2482_v47, %v2481_v42 }
 0x9c6   :  { %v2444_v14 = vpop.f32.mrf.mxu0  ;;  %v2484_v24 = vpop.f32.mrf.mxu1 }
 0x9c7   :  { %v2210_v23 = vadd.f32 %v2192_v3, %v3225_v38  ;;  %v2130_v4 = vadd.f32 %v2443_v48, %v3559_v29 }
 0x9c8   :  { %v2445_v0 = vpop.f32.mrf.mxu0  ;;  %v2485_v15 = vpop.f32.mrf.mxu1 }
 0x9c9   :  { %2218 = vst [vmem:[#allocation2 + $0x20] sm:$0xff] %v2210_v23  ;;  %v2195_v63 = vadd.f32 %v2483_v11, %v2130_v4  ;;  %v2446_v50 = vadd.f32 %v2445_v0, %v2444_v14  ;;  %v2486_v5 = vadd.f32 %v2485_v15, %v2484_v24 }
 0x9ca   :  { %v2447_v52 = vpop.f32.mrf.mxu0  ;;  %v2487_v16 = vpop.f32.mrf.mxu1 }
 0x9cb   :  { %v2211_v28 = vadd.f32 %v2195_v63, %v3232_v41  ;;  %v2135_v1 = vadd.f32 %v2446_v50, %v3559_v29 }
 0x9cc   :  { %v2448_v6 = vpop.f32.mrf.mxu0  ;;  %v2488_v7 = vpop.f32.mrf.mxu1 }
 0x9cd   :  { %2219 = vst [vmem:[#allocation2 + $0x28] sm:$0xff] %v2211_v28  ;;  %v2200_v9 = vadd.f32 %v2486_v5, %v2135_v1  ;;  %v2449_v38 = vadd.f32 %v2448_v6, %v2447_v52  ;;  %v2489_v17 = vadd.f32 %v2488_v7, %v2487_v16 }
 0x9cf   :  { %v2212_v10 = vadd.f32 %v2200_v9, %v3229_v8  ;;  %v2138_v12 = vadd.f32 %v2449_v38, %v3559_v29 }
 0x9d1   :  { %2220 = vst [vmem:[#allocation2 + $0x30] sm:$0xff] %v2212_v10  ;;  %v2203_v19 = vadd.f32 %v2489_v17, %v2138_v12 }
 0x9d3   :  { %v2213_v20 = vadd.f32 %v2203_v19, %v3237_v18 }
 0x9d5   :  { %2221 = vst [vmem:[#allocation2 + $0x38] sm:$0xff] %v2213_v20 }
 0x9d6   :  { %2805 = shalt.err (!%p2802_p4)
}
 0x9d7   :  { %s2820_s24 = smov 128   ;;  %s2821_s2 = smov 8  }
 0x9d8   :  { %2233 = dma.vmem_to_hbm [thread:$0]  %s2228_s23, 1024, %s3595_s15, [#allocation3], %s2820_s24, %s2820_s24, %s2821_s2  }
 0x9d9   :  { %2814 = dma.done.wait [#allocation3], 1024  }
 0x9da   :  { %2815 = vsyncadd [#allocation3], 4294966272 }
 0x9db   :  { %2237 = vsyncpa [#allocation3], 1 }

</bundles_post_ra>
